<compile_context>
chip_gen: v7x
topology: tpu7x:2x2x1
jax: 0.10.0
libtpu: 0.0.40
codegen_flags: <defaults>
</compile_context>

<pallas_src>
import jax
import jax.numpy as jnp
from jax import lax
from jax.experimental import pallas as pl
from jax.experimental.pallas import tpu as pltpu

_CPAD = 128  # cout padded to full lane width for lane-dense matmul output


def _resblock_kernel(x_ref, w1_ref, b1_ref, w2_ref, b2_ref, out_ref, pad_ref):
    """One batch element per grid step.

    x_ref   : (1, H, W, C)    input block, C unpadded (e.g. 8)
    w1_ref  : (9*C, Cp)       conv1 weights, rows = (kh, kw, cin), bf16
    b1_ref  : (1, Cp)         conv1 bias (cout zero-padded), f32
    w2_ref  : (9*C, Cp)       conv2 weights, bf16
    b2_ref  : (1, Cp)         conv2 bias, f32
    out_ref : (1, H, W, Cp)   output block (cout padded; sliced in wrapper)
    pad_ref : (H+2, W+2, C)   f32 VMEM scratch shared by both convs
    """
    _, H, W, C = x_ref.shape
    Cp = out_ref.shape[-1]
    K = 9 * C

    # Zero only the 1-pixel border strips (interior is overwritten below).
    zero_row = jnp.zeros((1, W + 2, C), jnp.float32)
    pad_ref[0:1, :, :] = zero_row
    pad_ref[H + 1:H + 2, :, :] = zero_row
    zero_col = jnp.zeros((H + 2, 1, C), jnp.float32)
    pad_ref[:, 0:1, :] = zero_col
    pad_ref[:, W + 1:W + 2, :] = zero_col

    x = x_ref[0]                                   # (H, W, C) f32
    pad_ref[1:1 + H, 1:1 + W, :] = x

    def conv3x3(w_ref, acc0):
        # Single MXU contraction per conv: (H*W, 9C) @ (9C, Cp), f32 accumulate.
        # Tap order (kh-major, kw, cin) matches the weight row layout.
        cols = jnp.concatenate(
            [pad_ref[kh:kh + H, kw:kw + W, :]
             for kh in range(3) for kw in range(3)],
            axis=-1)                               # (H, W, 9C) f32
        lhs = cols.reshape(H * W, K).astype(jnp.bfloat16)
        return acc0 + jnp.dot(lhs, w_ref[...],
                              preferred_element_type=jnp.float32)

    # conv1: bias folded into the accumulator init, then ReLU.
    h = conv3x3(w1_ref, jnp.broadcast_to(b1_ref[...], (H * W, Cp)))
    h = jnp.maximum(h, 0.0)

    # Re-stage the intermediate (real channels only) into the same scratch;
    # the border is still zero.
    pad_ref[1:1 + H, 1:1 + W, :] = h[:, :C].reshape(H, W, C)

    # conv2: bias + residual folded into the accumulator init.
    x2d = x.reshape(H * W, C)
    if Cp > C:
        res = jnp.concatenate(
            [x2d, jnp.zeros((H * W, Cp - C), jnp.float32)], axis=-1)
    else:
        res = x2d
    o = conv3x3(w2_ref, res + b2_ref[...])
    out_ref[0] = o.reshape(H, W, Cp)


def resblock_pallas(x_nchw, w1, b1, w2, b2):
    """x_nchw: (B, C, H, W) f32; w1/w2 in HWIO (3, 3, C, C); b1/b2: (C,)."""
    B, C, H, W = x_nchw.shape
    Cp = _CPAD
    assert C <= Cp

    # NCHW -> NHWC, channels left UNPADDED in HBM.
    x = jnp.transpose(x_nchw, (0, 2, 3, 1))

    def prep_w(w):
        # (3,3,C,C) -> (9C, C): row = kh*3C + kw*C + cin ; pad cout -> 128, bf16.
        wr = jnp.reshape(w, (9 * C, C))
        wr = jnp.pad(wr, ((0, 0), (0, Cp - C)))
        return wr.astype(jnp.bfloat16)

    def prep_b(b):
        return jnp.pad(b, (0, Cp - C)).reshape(1, Cp).astype(jnp.float32)

    w1p, w2p = prep_w(w1), prep_w(w2)
    b1p, b2p = prep_b(b1), prep_b(b2)

    grid_spec = pltpu.PrefetchScalarGridSpec(
        num_scalar_prefetch=0,
        grid=(B,),
        in_specs=[
            pl.BlockSpec((1, H, W, C), lambda b: (b, 0, 0, 0)),
            pl.BlockSpec((9 * C, Cp), lambda b: (0, 0)),
            pl.BlockSpec((1, Cp), lambda b: (0, 0)),
            pl.BlockSpec((9 * C, Cp), lambda b: (0, 0)),
            pl.BlockSpec((1, Cp), lambda b: (0, 0)),
        ],
        out_specs=pl.BlockSpec((1, H, W, Cp), lambda b: (b, 0, 0, 0)),
        scratch_shapes=[pltpu.VMEM((H + 2, W + 2, C), jnp.float32)],
    )
    out_nhwc = pl.pallas_call(
        _resblock_kernel,
        out_shape=jax.ShapeDtypeStruct((B, H, W, Cp), jnp.float32),
        grid_spec=grid_spec,
        compiler_params=pltpu.CompilerParams(
            dimension_semantics=("parallel",)),
    )(x, w1p, b1p, w2p, b2p)

    # Drop cout padding, back to NCHW.
    return jnp.transpose(out_nhwc[..., :C], (0, 3, 1, 2))


def resblock_reference(x_nchw, w1, b1, w2, b2):
    """Plain-JAX reference (NHWC conv) for correctness checking."""
    x = jnp.transpose(x_nchw, (0, 2, 3, 1))
    dn = lax.conv_dimension_numbers(x.shape, w1.shape, ("NHWC", "HWIO", "NHWC"))
    h = lax.conv_general_dilated(x, w1, (1, 1), "SAME", dimension_numbers=dn) + b1
    h = jnp.maximum(h, 0.0)
    o = lax.conv_general_dilated(h, w2, (1, 1), "SAME", dimension_numbers=dn) + b2
    o = o + x
    return jnp.transpose(o, (0, 3, 1, 2))


if __name__ == "__main__":
    # resblock(nFeat=8, kernel_size=3, bias=True)
    B, C, H, W = 2, 8, 16, 16
    key = jax.random.PRNGKey(0)
    kx, k1, kb1, k2, kb2 = jax.random.split(key, 5)

    x = jax.random.normal(kx, (B, C, H, W), dtype=jnp.float32)       # NCHW like PyTorch
    # deterministic synthetic parameters (HWIO layout for weights)
    w1 = jax.random.normal(k1, (3, 3, C, C), dtype=jnp.float32) * 0.1
    b1 = jax.random.normal(kb1, (C,), dtype=jnp.float32) * 0.1
    w2 = jax.random.normal(k2, (3, 3, C, C), dtype=jnp.float32) * 0.1
    b2 = jax.random.normal(kb2, (C,), dtype=jnp.float32) * 0.1

    out = jax.block_until_ready(resblock_pallas(x, w1, b1, w2, b2))
    ref = jax.block_until_ready(resblock_reference(x, w1, b1, w2, b2))

    assert out.shape == (B, C, H, W)
    # bf16 matmul operands (f32 accumulation) -> looser tolerance than pure f32.
    assert jnp.allclose(out, ref, atol=5e-2, rtol=5e-2)
    print("KERNEL_OK")
</pallas_src>

<mosaic_0001>
module attributes {stable_mosaic.version = 11 : i64} {
  func.func @_resblock_kernel(%arg0: i32, %arg1: memref<1x16x16x8xf32, #tpu.memory_space<vmem>>, %arg2: memref<72x128xbf16, #tpu.memory_space<vmem>>, %arg3: memref<1x128xf32, #tpu.memory_space<vmem>>, %arg4: memref<72x128xbf16, #tpu.memory_space<vmem>>, %arg5: memref<1x128xf32, #tpu.memory_space<vmem>>, %arg6: memref<1x16x16x128xf32, #tpu.memory_space<vmem>>, %arg7: memref<18x18x8xf32, #tpu.memory_space<vmem>>) attributes {dimension_semantics = [#tpu.dimension_semantics<parallel>], iteration_bounds = array<i64: 2>, scalar_prefetch = 0 : i64, scratch_operands = 1 : i64, tpu.core_type = #tpu.core_type<tc>, window_params = [{transform_indices = @transform_0, window_bounds = array<i64: 1, 16, 16, 8>}, {pipeline_mode = #tpu.pipeline_mode<synchronous>, transform_indices = @transform_1, window_bounds = array<i64: 72, 128>}, {pipeline_mode = #tpu.pipeline_mode<synchronous>, transform_indices = @transform_2, window_bounds = array<i64: 1, 128>}, {pipeline_mode = #tpu.pipeline_mode<synchronous>, transform_indices = @transform_3, window_bounds = array<i64: 72, 128>}, {pipeline_mode = #tpu.pipeline_mode<synchronous>, transform_indices = @transform_4, window_bounds = array<i64: 1, 128>}, {transform_indices = @transform_5, window_bounds = array<i64: 1, 16, 16, 128>}]} {
    %cst = arith.constant 0.000000e+00 : f32
    %0 = vector.broadcast %cst : f32 to vector<1x18x8xf32>
    %c0 = arith.constant 0 : index
    %c0_0 = arith.constant 0 : index
    %c0_1 = arith.constant 0 : index
    %1 = vector.load %arg7[%c0, %c0_0, %c0_1] : memref<18x18x8xf32, #tpu.memory_space<vmem>>, vector<1x18x8xf32>
    tpu.vector_store %arg7[%c0, %c0_0, %c0_1], %0 {strides = array<i32>} : memref<18x18x8xf32, #tpu.memory_space<vmem>>, vector<1x18x8xf32>,
    %c17 = arith.constant 17 : index
    %c0_2 = arith.constant 0 : index
    %c0_3 = arith.constant 0 : index
    %2 = vector.load %arg7[%c17, %c0_2, %c0_3] : memref<18x18x8xf32, #tpu.memory_space<vmem>>, vector<1x18x8xf32>
    tpu.vector_store %arg7[%c17, %c0_2, %c0_3], %0 {strides = array<i32>} : memref<18x18x8xf32, #tpu.memory_space<vmem>>, vector<1x18x8xf32>,
    %cst_4 = arith.constant 0.000000e+00 : f32
    %3 = vector.broadcast %cst_4 : f32 to vector<18x1x8xf32>
    %c0_5 = arith.constant 0 : index
    %c0_6 = arith.constant 0 : index
    %c0_7 = arith.constant 0 : index
    %4 = vector.load %arg7[%c0_5, %c0_6, %c0_7] : memref<18x18x8xf32, #tpu.memory_space<vmem>>, vector<18x1x8xf32>
    tpu.vector_store %arg7[%c0_5, %c0_6, %c0_7], %3 {strides = array<i32>} : memref<18x18x8xf32, #tpu.memory_space<vmem>>, vector<18x1x8xf32>,
    %c0_8 = arith.constant 0 : index
    %c17_9 = arith.constant 17 : index
    %c0_10 = arith.constant 0 : index
    %5 = vector.load %arg7[%c0_8, %c17_9, %c0_10] : memref<18x18x8xf32, #tpu.memory_space<vmem>>, vector<18x1x8xf32>
    tpu.vector_store %arg7[%c0_8, %c17_9, %c0_10], %3 {strides = array<i32>} : memref<18x18x8xf32, #tpu.memory_space<vmem>>, vector<18x1x8xf32>,
    %c0_11 = arith.constant 0 : index
    %c0_12 = arith.constant 0 : index
    %c0_13 = arith.constant 0 : index
    %c0_14 = arith.constant 0 : index
    %6 = vector.load %arg1[%c0_11, %c0_12, %c0_13, %c0_14] : memref<1x16x16x8xf32, #tpu.memory_space<vmem>>, vector<1x16x16x8xf32>
    %7 = vector.shape_cast %6 : vector<1x16x16x8xf32> to vector<16x16x8xf32>
    %c1 = arith.constant 1 : index
    %c1_15 = arith.constant 1 : index
    %c0_16 = arith.constant 0 : index
    %8 = vector.load %arg7[%c1, %c1_15, %c0_16] : memref<18x18x8xf32, #tpu.memory_space<vmem>>, vector<16x16x8xf32>
    tpu.vector_store %arg7[%c1, %c1_15, %c0_16], %7 {strides = array<i32>} : memref<18x18x8xf32, #tpu.memory_space<vmem>>, vector<16x16x8xf32>,
    %c0_17 = arith.constant 0 : index
    %c0_18 = arith.constant 0 : index
    %9 = vector.load %arg3[%c0_17, %c0_18] : memref<1x128xf32, #tpu.memory_space<vmem>>, vector<1x128xf32>
    %10 = vector.shape_cast %9 : vector<1x128xf32> to vector<1x128xf32>
    %11 = vector.broadcast %10 : vector<1x128xf32> to vector<256x128xf32>
    %c0_19 = arith.constant 0 : index
    %c0_20 = arith.constant 0 : index
    %c0_21 = arith.constant 0 : index
    %12 = vector.load %arg7[%c0_19, %c0_20, %c0_21] : memref<18x18x8xf32, #tpu.memory_space<vmem>>, vector<16x16x8xf32>
    %c0_22 = arith.constant 0 : index
    %c1_23 = arith.constant 1 : index
    %c0_24 = arith.constant 0 : index
    %13 = vector.load %arg7[%c0_22, %c1_23, %c0_24] : memref<18x18x8xf32, #tpu.memory_space<vmem>>, vector<16x16x8xf32>
    %c0_25 = arith.constant 0 : index
    %c2 = arith.constant 2 : index
    %c0_26 = arith.constant 0 : index
    %14 = vector.load %arg7[%c0_25, %c2, %c0_26] : memref<18x18x8xf32, #tpu.memory_space<vmem>>, vector<16x16x8xf32>
    %c1_27 = arith.constant 1 : index
    %c0_28 = arith.constant 0 : index
    %c0_29 = arith.constant 0 : index
    %15 = vector.load %arg7[%c1_27, %c0_28, %c0_29] : memref<18x18x8xf32, #tpu.memory_space<vmem>>, vector<16x16x8xf32>
    %c1_30 = arith.constant 1 : index
    %c1_31 = arith.constant 1 : index
    %c0_32 = arith.constant 0 : index
    %16 = vector.load %arg7[%c1_30, %c1_31, %c0_32] : memref<18x18x8xf32, #tpu.memory_space<vmem>>, vector<16x16x8xf32>
    %c1_33 = arith.constant 1 : index
    %c2_34 = arith.constant 2 : index
    %c0_35 = arith.constant 0 : index
    %17 = vector.load %arg7[%c1_33, %c2_34, %c0_35] : memref<18x18x8xf32, #tpu.memory_space<vmem>>, vector<16x16x8xf32>
    %c2_36 = arith.constant 2 : index
    %c0_37 = arith.constant 0 : index
    %c0_38 = arith.constant 0 : index
    %18 = vector.load %arg7[%c2_36, %c0_37, %c0_38] : memref<18x18x8xf32, #tpu.memory_space<vmem>>, vector<16x16x8xf32>
    %c2_39 = arith.constant 2 : index
    %c1_40 = arith.constant 1 : index
    %c0_41 = arith.constant 0 : index
    %19 = vector.load %arg7[%c2_39, %c1_40, %c0_41] : memref<18x18x8xf32, #tpu.memory_space<vmem>>, vector<16x16x8xf32>
    %c2_42 = arith.constant 2 : index
    %c2_43 = arith.constant 2 : index
    %c0_44 = arith.constant 0 : index
    %20 = vector.load %arg7[%c2_42, %c2_43, %c0_44] : memref<18x18x8xf32, #tpu.memory_space<vmem>>, vector<16x16x8xf32>
    %21 = tpu.concatenate %12, %13, %14, %15, %16, %17, %18, %19, %20 in 2 : vector<16x16x8xf32>, vector<16x16x8xf32>, vector<16x16x8xf32>, vector<16x16x8xf32>, vector<16x16x8xf32>, vector<16x16x8xf32>, vector<16x16x8xf32>, vector<16x16x8xf32>, vector<16x16x8xf32> -> vector<16x16x72xf32>
    %22 = vector.shape_cast %21 : vector<16x16x72xf32> to vector<256x72xf32>
    %23 = arith.truncf %22 : vector<256x72xf32> to vector<256x72xbf16>
    %c0_45 = arith.constant 0 : index
    %c0_46 = arith.constant 0 : index
    %24 = vector.load %arg2[%c0_45, %c0_46] : memref<72x128xbf16, #tpu.memory_space<vmem>>, vector<72x128xbf16>
    %cst_47 = arith.constant dense<0.000000e+00> : vector<256x128xf32>
    %25 = tpu.matmul %23, %24, %cst_47 {dimension_numbers = #tpu.dot_dimension_numbers<[1], [0], [0], [1], [0, 0, 1, 1], [], []>} : vector<256x72xbf16>, vector<72x128xbf16>, vector<256x128xf32> -> vector<256x128xf32>
    %26 = arith.addf %11, %25 : vector<256x128xf32>
    %cst_48 = arith.constant 0.000000e+00 : f32
    %27 = vector.broadcast %cst_48 : f32 to vector<256x128xf32>
    %28 = arith.maximumf %26, %27 : vector<256x128xf32>
    %29 = vector.extract_strided_slice %28 {offsets = [0, 0], sizes = [256, 8], strides = [1, 1]} : vector<256x128xf32> to vector<256x8xf32>
    %30 = vector.shape_cast %29 : vector<256x8xf32> to vector<16x16x8xf32>
    %c1_49 = arith.constant 1 : index
    %c1_50 = arith.constant 1 : index
    %c0_51 = arith.constant 0 : index
    %31 = vector.load %arg7[%c1_49, %c1_50, %c0_51] : memref<18x18x8xf32, #tpu.memory_space<vmem>>, vector<16x16x8xf32>
    tpu.vector_store %arg7[%c1_49, %c1_50, %c0_51], %30 {strides = array<i32>} : memref<18x18x8xf32, #tpu.memory_space<vmem>>, vector<16x16x8xf32>,
    %32 = vector.shape_cast %7 : vector<16x16x8xf32> to vector<256x8xf32>
    %cst_52 = arith.constant 0.000000e+00 : f32
    %33 = vector.broadcast %cst_52 : f32 to vector<256x120xf32>
    %34 = tpu.concatenate %32, %33 in 1 : vector<256x8xf32>, vector<256x120xf32> -> vector<256x128xf32>
    %c0_53 = arith.constant 0 : index
    %c0_54 = arith.constant 0 : index
    %35 = vector.load %arg5[%c0_53, %c0_54] : memref<1x128xf32, #tpu.memory_space<vmem>>, vector<1x128xf32>
    %36 = vector.broadcast %35 : vector<1x128xf32> to vector<256x128xf32>
    %37 = arith.addf %34, %36 : vector<256x128xf32>
    %c0_55 = arith.constant 0 : index
    %c0_56 = arith.constant 0 : index
    %c0_57 = arith.constant 0 : index
    %38 = vector.load %arg7[%c0_55, %c0_56, %c0_57] : memref<18x18x8xf32, #tpu.memory_space<vmem>>, vector<16x16x8xf32>
    %c0_58 = arith.constant 0 : index
    %c1_59 = arith.constant 1 : index
    %c0_60 = arith.constant 0 : index
    %39 = vector.load %arg7[%c0_58, %c1_59, %c0_60] : memref<18x18x8xf32, #tpu.memory_space<vmem>>, vector<16x16x8xf32>
    %c0_61 = arith.constant 0 : index
    %c2_62 = arith.constant 2 : index
    %c0_63 = arith.constant 0 : index
    %40 = vector.load %arg7[%c0_61, %c2_62, %c0_63] : memref<18x18x8xf32, #tpu.memory_space<vmem>>, vector<16x16x8xf32>
    %c1_64 = arith.constant 1 : index
    %c0_65 = arith.constant 0 : index
    %c0_66 = arith.constant 0 : index
    %41 = vector.load %arg7[%c1_64, %c0_65, %c0_66] : memref<18x18x8xf32, #tpu.memory_space<vmem>>, vector<16x16x8xf32>
    %c1_67 = arith.constant 1 : index
    %c1_68 = arith.constant 1 : index
    %c0_69 = arith.constant 0 : index
    %42 = vector.load %arg7[%c1_67, %c1_68, %c0_69] : memref<18x18x8xf32, #tpu.memory_space<vmem>>, vector<16x16x8xf32>
    %c1_70 = arith.constant 1 : index
    %c2_71 = arith.constant 2 : index
    %c0_72 = arith.constant 0 : index
    %43 = vector.load %arg7[%c1_70, %c2_71, %c0_72] : memref<18x18x8xf32, #tpu.memory_space<vmem>>, vector<16x16x8xf32>
    %c2_73 = arith.constant 2 : index
    %c0_74 = arith.constant 0 : index
    %c0_75 = arith.constant 0 : index
    %44 = vector.load %arg7[%c2_73, %c0_74, %c0_75] : memref<18x18x8xf32, #tpu.memory_space<vmem>>, vector<16x16x8xf32>
    %c2_76 = arith.constant 2 : index
    %c1_77 = arith.constant 1 : index
    %c0_78 = arith.constant 0 : index
    %45 = vector.load %arg7[%c2_76, %c1_77, %c0_78] : memref<18x18x8xf32, #tpu.memory_space<vmem>>, vector<16x16x8xf32>
    %c2_79 = arith.constant 2 : index
    %c2_80 = arith.constant 2 : index
    %c0_81 = arith.constant 0 : index
    %46 = vector.load %arg7[%c2_79, %c2_80, %c0_81] : memref<18x18x8xf32, #tpu.memory_space<vmem>>, vector<16x16x8xf32>
    %47 = tpu.concatenate %38, %39, %40, %41, %42, %43, %44, %45, %46 in 2 : vector<16x16x8xf32>, vector<16x16x8xf32>, vector<16x16x8xf32>, vector<16x16x8xf32>, vector<16x16x8xf32>, vector<16x16x8xf32>, vector<16x16x8xf32>, vector<16x16x8xf32>, vector<16x16x8xf32> -> vector<16x16x72xf32>
    %48 = vector.shape_cast %47 : vector<16x16x72xf32> to vector<256x72xf32>
    %49 = arith.truncf %48 : vector<256x72xf32> to vector<256x72xbf16>
    %c0_82 = arith.constant 0 : index
    %c0_83 = arith.constant 0 : index
    %50 = vector.load %arg4[%c0_82, %c0_83] : memref<72x128xbf16, #tpu.memory_space<vmem>>, vector<72x128xbf16>
    %cst_84 = arith.constant dense<0.000000e+00> : vector<256x128xf32>
    %51 = tpu.matmul %49, %50, %cst_84 {dimension_numbers = #tpu.dot_dimension_numbers<[1], [0], [0], [1], [0, 0, 1, 1], [], []>} : vector<256x72xbf16>, vector<72x128xbf16>, vector<256x128xf32> -> vector<256x128xf32>
    %52 = arith.addf %37, %51 : vector<256x128xf32>
    %53 = vector.shape_cast %52 : vector<256x128xf32> to vector<16x16x128xf32>
    %c0_85 = arith.constant 0 : index
    %c0_86 = arith.constant 0 : index
    %c0_87 = arith.constant 0 : index
    %c0_88 = arith.constant 0 : index
    %54 = vector.load %arg6[%c0_85, %c0_86, %c0_87, %c0_88] : memref<1x16x16x128xf32, #tpu.memory_space<vmem>>, vector<1x16x16x128xf32>
    %55 = vector.shape_cast %54 : vector<1x16x16x128xf32> to vector<16x16x128xf32>
    %56 = vector.shape_cast %53 : vector<16x16x128xf32> to vector<1x16x16x128xf32>
    tpu.vector_store %arg6[%c0_85, %c0_86, %c0_87, %c0_88], %56 {strides = array<i32>} : memref<1x16x16x128xf32, #tpu.memory_space<vmem>>, vector<1x16x16x128xf32>,
    return
  }
  func.func @transform_0(%arg0: i32) -> (i32, i32, i32, i32) {
    %c0_i32 = arith.constant 0 : i32
    %c0_i32_0 = arith.constant 0 : i32
    %c0_i32_1 = arith.constant 0 : i32
    %c0_i32_2 = arith.constant 0 : i32
    return %arg0, %c0_i32, %c0_i32_0, %c0_i32_1 : i32, i32, i32, i32
  }
  func.func @transform_1(%arg0: i32) -> (i32, i32) {
    %c0_i32 = arith.constant 0 : i32
    %c0_i32_0 = arith.constant 0 : i32
    %c0_i32_1 = arith.constant 0 : i32
    return %c0_i32, %c0_i32_0 : i32, i32
  }
  func.func @transform_2(%arg0: i32) -> (i32, i32) {
    %c0_i32 = arith.constant 0 : i32
    %c0_i32_0 = arith.constant 0 : i32
    %c0_i32_1 = arith.constant 0 : i32
    return %c0_i32, %c0_i32_0 : i32, i32
  }
  func.func @transform_3(%arg0: i32) -> (i32, i32) {
    %c0_i32 = arith.constant 0 : i32
    %c0_i32_0 = arith.constant 0 : i32
    %c0_i32_1 = arith.constant 0 : i32
    return %c0_i32, %c0_i32_0 : i32, i32
  }
  func.func @transform_4(%arg0: i32) -> (i32, i32) {
    %c0_i32 = arith.constant 0 : i32
    %c0_i32_0 = arith.constant 0 : i32
    %c0_i32_1 = arith.constant 0 : i32
    return %c0_i32, %c0_i32_0 : i32, i32
  }
  func.func @transform_5(%arg0: i32) -> (i32, i32, i32, i32) {
    %c0_i32 = arith.constant 0 : i32
    %c0_i32_0 = arith.constant 0 : i32
    %c0_i32_1 = arith.constant 0 : i32
    %c0_i32_2 = arith.constant 0 : i32
    return %arg0, %c0_i32, %c0_i32_0, %c0_i32_1 : i32, i32, i32, i32
  }
}

</mosaic_0001>

<bundles_post_ra>
// kernel: tpu_custom_call.1
= control target key start
LH: loop header
LB: loop body
LE: loop exit
PB: predicated region body
PF: predicated region fallthrough
CT: control target
= control target key end

     0   :  { %10 = vsyncpa [#allocation4], 0  ;;  %s8805_s0 = inlined_call_operand.vmem [shape: f32[2,16,16,8], index: 0, kind: input, shape index: {}]   ;;  %s8806_s1 = inlined_call_operand.vmem [shape: bf16[72,128], index: 1, kind: input, shape index: {}]   ;;  %s8807_s2 = inlined_call_operand.vmem [shape: f32[1,128], index: 2, kind: input, shape index: {}]   ;;  %s8808_s3 = inlined_call_operand.vmem [shape: bf16[72,128], index: 3, kind: input, shape index: {}]   ;;  %s8809_s4 = inlined_call_operand.vmem [shape: f32[1,128], index: 4, kind: input, shape index: {}]   ;;  %s8810_s5 = inlined_call_operand.hbm [shape: f32[2,16,16,128], index: 5, kind: output, shape index: {}]  }
   0x1   :  { %12 = vsyncpa [#allocation4 + $0x1], 0  ;;  %s5953_s18 = smov 0   ;;  %s5955_s19 = smov 0  }
   0x2   :  { %s5957_s20 = smov 0   ;;  %s5959_s21 = smov 0  }
   0x3 LB: > { %s5974_s22 = sadd.s32 4294967295, %s5910_s21   ;;  %s4323_s23 = sadd.s32 4294967294, %s5910_s21   ;;  %s5910_s21 = sphi %s5959_s21, %s9126_s21   ;;  %s5906_s20 = sphi %s5957_s20, %s9125_s20   ;;  %s5902_s19 = sphi %s5955_s19, %s9124_s19   ;;  %s5898_s18 = sphi %s5953_s18, %s9123_s18  }
   0x4   : > { %s5978_s24 = sadd.s32 1, %s5910_s21   ;;  %s135_s25 = sadd.s32 1, %s5906_s20 }
   0x5   : > { %s132_s26 = ssub.s32 %s5910_s21, %s5978_s24  ;;  %p145_p0 = scmp.ne.s32.totalorder %s5906_s20, %s5902_s19 }
   0x6   : > { %p133_p1 = scmp.eq.s32.totalorder %s132_s26, 0  ;;  %p146_p2 = scmp.eq.s32.totalorder %s5974_s22, 1 }
   0x7   : > { %p151_p3 = scmp.ne.s32.totalorder %s5902_s19, %s5898_s18  ;;  %p152_p4 = scmp.eq.s32.totalorder %s4323_s23, 1 }
   0x8   : > { %s5989_s27 = scalar_select %p133_p1, %s5906_s20, %s135_s25  }
   0x9   : > { %p5991_p5 = por %p146_p2, %p145_p0  ;;  %p5995_p6 = por %p152_p4, %p151_p3 }
   0xa   : > { %p4326_p7 = scmp.ge.s32.totalorder %s5910_s21, 1  ;;  %p190_p8 = scmp.lt.s32.totalorder %s5910_s21, 3 }
   0xc   : > { %p191_p9 = pnand %p4326_p7, %p190_p8 }
   0xe   : > { %194 = sbr.rel (%p191_p9) target bundleno = 1203 (0x4b3), region = 40 }
  0x15   : > { %vm224_vm0 = vcmask 64512   ;;  %vm227_vm1 = vcmask 58368   ;;  %p218_p10 = scmp.lt.s32.totalorder %s5974_s22, 1  ;;  %vm233_vm2 = vcmask 57344   ;;  %v5912_v0 = vmov 0.0   ;;  %s5913_s10 = smov 8  }
  0x16   : > { %225 = vst.msk [vmem:[#allocation2] sm:$0xff] %vm224_vm0, %v5912_v0  ;;  %226 = vst.msk [vmem:[#allocation2 + $0x8] sm:$0xff] %vm224_vm0, %v5912_v0  ;;  %s5914_s11 = smov 16   ;;  %s5915_s12 = smov 24   ;;  %vm2019_vm3 = vcmask 1043456   ;;  %vm1687_vm4 = vcmask 130048  }
  0x17   : > { %228 = vst.msk [vmem:[#allocation2 + $0x10] sm:$0x3] %vm227_vm1, %v5912_v0  ;;  %232 = vst.msk [vmem:[#allocation2 + $0x1a8] sm:$0x3] %vm227_vm1, %v5912_v0  ;;  %s219_s30 = scalar_select %p218_p10, %s5974_s22, 1  ;;  %vm1720_vm5 = vcmask 195584  }
  0x18   : > { %230 = vst.msk [vmem:[#allocation2 + $0x198] sm:$0xff] %vm224_vm0, %v5912_v0  ;;  %231 = vst.msk [vmem:[#allocation2 + $0x1a0] sm:$0xff] %vm224_vm0, %v5912_v0  ;;  %s5916_s13 = smov 32   ;;  %s5917_s14 = smov 40   ;;  %vm1753_vm6 = vcmask 261120   ;;  %vm1786_vm7 = vcmask 326656  }
  0x19   : > { %235 = vst.msk [vmem:[#allocation2 + $0x18] sm:$0x1] %vm233_vm2, %v5912_v0  ;;  %236 = vst.msk [vmem:[#allocation2 + $0x30] sm:$0x1] %vm233_vm2, %v5912_v0  ;;  %s4379_s6 = sshll.u32 %s219_s30, 8  ;;  %s5918_s15 = smov 48  }
  0x1a   : > { %237 = vst.msk [vmem:[#allocation2 + $0x48] sm:$0x1] %vm233_vm2, %v5912_v0  ;;  %238 = vst.msk [vmem:[#allocation2 + $0x60] sm:$0x1] %vm233_vm2, %v5912_v0  ;;  %s6048_s9 = scalar_lea.vmem %s8805_s0, %s4379_s6  ;;  %s5919_s16 = smov 56   ;;  %vm1819_vm8 = vcmask 392192  }
  0x1b   : > { %239 = vst.msk [vmem:[#allocation2 + $0x78] sm:$0x1] %vm233_vm2, %v5912_v0  ;;  %240 = vst.msk [vmem:[#allocation2 + $0x90] sm:$0x1] %vm233_vm2, %v5912_v0  ;;  %v6051_v1 = vld [vmem:[%s6048_s9 + $0x10] sm:$0xff]  ;;  %v6054_v2 = vld [vmem:[%s6048_s9 + $0x18] sm:$0xff] }
  0x1c   : > { %241 = vst.msk [vmem:[#allocation2 + $0xa8] sm:$0x1] %vm233_vm2, %v5912_v0  ;;  %242 = vst.msk [vmem:[#allocation2 + $0xc0] sm:$0x1] %vm233_vm2, %v5912_v0  ;;  %v6057_v3 = vld [vmem:[%s6048_s9] sm:$0xff]  ;;  %v6064_v4 = vld [vmem:[%s6048_s9 + $0x8] sm:$0xff] }
  0x1d   : > { %243 = vst.msk [vmem:[#allocation2 + $0xd8] sm:$0x1] %vm233_vm2, %v5912_v0  ;;  %244 = vst.msk [vmem:[#allocation2 + $0xf0] sm:$0x1] %vm233_vm2, %v5912_v0  ;;  %v6069_v5 = vld [vmem:[%s6048_s9 + $0x20] sm:$0xff]  ;;  %v6072_v6 = vld [vmem:[%s6048_s9 + $0x28] sm:$0xff] }
  0x1e   : > { %245 = vst.msk [vmem:[#allocation2 + $0x108] sm:$0x1] %vm233_vm2, %v5912_v0  ;;  %246 = vst.msk [vmem:[#allocation2 + $0x120] sm:$0x1] %vm233_vm2, %v5912_v0  ;;  %v374_v7 = vld [vmem:[#allocation2 + $0x1] sm:$0xff]  ;;  %v375_v8 = vld [vmem:[#allocation2 + $0x9] sm:$0xff] }
  0x1f   : > { %247 = vst.msk [vmem:[#allocation2 + $0x138] sm:$0x1] %vm233_vm2, %v5912_v0  ;;  %248 = vst.msk [vmem:[#allocation2 + $0x150] sm:$0x1] %vm233_vm2, %v5912_v0  ;;  %v6081_v9 = vld [vmem:[%s6048_s9 + $0x30] sm:$0xff]  ;;  %v4558_v10 = vpack.i.bf16 %v375_v8, %v374_v7  ;;  %v6084_v11 = vld [vmem:[%s6048_s9 + $0x38] sm:$0xff] }
  0x20   : > { %249 = vst.msk [vmem:[#allocation2 + $0x168] sm:$0x1] %vm233_vm2, %v5912_v0  ;;  %250 = vst.msk [vmem:[#allocation2 + $0x180] sm:$0x1] %vm233_vm2, %v5912_v0  ;;  %v6089_v12 = vld [vmem:[%s6048_s9 + $0x40] sm:$0xff]  ;;  %v6092_v13 = vld [vmem:[%s6048_s9 + $0x48] sm:$0xff] }
  0x21   : > { %253 = vst.msk [vmem:[#allocation2 + $0x29] sm:$0x1] %vm233_vm2, %v5912_v0  ;;  %254 = vst.msk [vmem:[#allocation2 + $0x41] sm:$0x1] %vm233_vm2, %v5912_v0  ;;  %v6101_v14 = vld [vmem:[%s6048_s9 + $0x50] sm:$0xff]  ;;  %v6104_v15 = vld [vmem:[%s6048_s9 + $0x58] sm:$0xff]  ;;  %4559 = vrot.lane.b32.xlu0 %v4558_v10, %s5913_s10 }
  0x22   : > { %255 = vst.msk [vmem:[#allocation2 + $0x59] sm:$0x1] %vm233_vm2, %v5912_v0  ;;  %256 = vst.msk [vmem:[#allocation2 + $0x71] sm:$0x1] %vm233_vm2, %v5912_v0  ;;  %v6107_v16 = vld [vmem:[%s6048_s9 + $0x60] sm:$0xff]  ;;  %v6115_v17 = vld [vmem:[%s6048_s9 + $0x68] sm:$0xff] }
  0x23   : > { %257 = vst.msk [vmem:[#allocation2 + $0x89] sm:$0x1] %vm233_vm2, %v5912_v0  ;;  %258 = vst.msk [vmem:[#allocation2 + $0xa1] sm:$0x1] %vm233_vm2, %v5912_v0  ;;  %v6120_v18 = vld [vmem:[%s6048_s9 + $0x70] sm:$0xff]  ;;  %v6123_v19 = vld [vmem:[%s6048_s9 + $0x78] sm:$0xff] }
  0x24   : > { %259 = vst.msk [vmem:[#allocation2 + $0xb9] sm:$0x1] %vm233_vm2, %v5912_v0  ;;  %260 = vst.msk [vmem:[#allocation2 + $0xd1] sm:$0x1] %vm233_vm2, %v5912_v0  ;;  %v6132_v20 = vld [vmem:[%s6048_s9 + $0x80] sm:$0xff]  ;;  %v6135_v21 = vld [vmem:[%s6048_s9 + $0x88] sm:$0xff] }
  0x25   : > { %261 = vst.msk [vmem:[#allocation2 + $0xe9] sm:$0x1] %vm233_vm2, %v5912_v0  ;;  %262 = vst.msk [vmem:[#allocation2 + $0x101] sm:$0x1] %vm233_vm2, %v5912_v0  ;;  %v6138_v22 = vld [vmem:[%s6048_s9 + $0x90] sm:$0xff]  ;;  %v6145_v23 = vld [vmem:[%s6048_s9 + $0x98] sm:$0xff] }
  0x26   : > { %263 = vst.msk [vmem:[#allocation2 + $0x119] sm:$0x1] %vm233_vm2, %v5912_v0  ;;  %264 = vst.msk [vmem:[#allocation2 + $0x131] sm:$0x1] %vm233_vm2, %v5912_v0  ;;  %v6150_v24 = vld [vmem:[%s6048_s9 + $0xa0] sm:$0xff]  ;;  %v6153_v25 = vld [vmem:[%s6048_s9 + $0xa8] sm:$0xff] }
  0x27   : > { %265 = vst.msk [vmem:[#allocation2 + $0x149] sm:$0x1] %vm233_vm2, %v5912_v0  ;;  %266 = vst.msk [vmem:[#allocation2 + $0x161] sm:$0x1] %vm233_vm2, %v5912_v0  ;;  %v6166_v35 = vld [vmem:[%s6048_s9 + $0xb0] sm:$0xff]  ;;  %v6169_v36 = vld [vmem:[%s6048_s9 + $0xb8] sm:$0xff] }
  0x28   : > { %267 = vst.msk [vmem:[#allocation2 + $0x179] sm:$0x1] %vm233_vm2, %v5912_v0  ;;  %268 = vst.msk [vmem:[#allocation2 + $0x191] sm:$0x1] %vm233_vm2, %v5912_v0  ;;  %v6192_v50 = vld [vmem:[%s6048_s9 + $0xc0] sm:$0xff]  ;;  %v6195_v51 = vld [vmem:[%s6048_s9 + $0xc8] sm:$0xff] }
  0x29   : > { %252 = vst.msk [vmem:[#allocation2 + $0x11] sm:$0x1] %vm233_vm2, %v5912_v0  ;;  %234 = vst.msk [vmem:[#allocation2] sm:$0x1] %vm233_vm2, %v5912_v0  ;;  %v6198_v52 = vld [vmem:[%s6048_s9 + $0xd0] sm:$0xff]  ;;  %v6205_v53 = vld [vmem:[%s6048_s9 + $0xd8] sm:$0xff] }
  0x2a   : > { %251 = vst.msk [vmem:[#allocation2 + $0x198] sm:$0x1] %vm233_vm2, %v5912_v0  ;;  %269 = vst.msk [vmem:[#allocation2 + $0x1a9] sm:$0x1] %vm233_vm2, %v5912_v0  ;;  %v6210_v54 = vld [vmem:[%s6048_s9 + $0xe0] sm:$0xff]  ;;  %v6213_v55 = vld [vmem:[%s6048_s9 + $0xe8] sm:$0xff] }
  0x2b   : > { %8915 = vst [vmem:[#allocation6_spill] sm:$0xff] %v6051_v1  ;;  %8916 = vst [vmem:[#allocation7_spill] sm:$0xff] %v6054_v2  ;;  %s5920_s17 = smov 64   ;;  %vm1852_vm9 = vcmask 457728   ;;  %vm1885_vm10 = vcmask 523264   ;;  %vm1970_vm11 = vcmask 588800  }
  0x2c   : > { %8917 = vst [vmem:[#allocation8_spill] sm:$0xff] %v6057_v3  ;;  %305 = vst.msk [vmem:[#allocation2 + $0x31] sm:$0xff] %vm224_vm0, %v6051_v1  ;;  %s5921_s23 = smov [#allocation3]  }
  0x2d   : > { %306 = vst.msk [vmem:[#allocation2 + $0x39] sm:$0xff] %vm224_vm0, %v6054_v2  ;;  %8918 = vst [vmem:[#allocation9_spill] sm:$0xff] %v6064_v4  ;;  %s5852_s25 = sshll.u32 %s5921_s23, 4  ;;  %s5853_s25 = int_to_ptr.vmem [resolvable:$false] %s5852_s25 }
  0x2e   : > { %303 = vst.msk [vmem:[#allocation2 + $0x19] sm:$0xff] %vm224_vm0, %v6057_v3  ;;  %8919 = vst [vmem:[#allocation10_spill] sm:$0xff] %v6069_v5  ;;  %s5854_s26 = scalar_lea.vmem %s5853_s25, 8192 }
  0x2f   : > { %8920 = vst [vmem:[#allocation11_spill] sm:$0xff] %v6072_v6  ;;  %304 = vst.msk [vmem:[#allocation2 + $0x21] sm:$0xff] %vm224_vm0, %v6064_v4 }
  0x30   : > { %307 = vst.msk [vmem:[#allocation2 + $0x49] sm:$0xff] %vm224_vm0, %v6069_v5  ;;  %308 = vst.msk [vmem:[#allocation2 + $0x51] sm:$0xff] %vm224_vm0, %v6072_v6 }
  0x31   : > { %8921 = vst [vmem:[#allocation12_spill] sm:$0xff] %v6081_v9  ;;  %8922 = vst [vmem:[#allocation13_spill] sm:$0xff] %v6084_v11 }
  0x32   : > { %309 = vst.msk [vmem:[#allocation2 + $0x61] sm:$0xff] %vm224_vm0, %v6081_v9  ;;  %8923 = vst [vmem:[#allocation14_spill] sm:$0xff] %v6089_v12 }
  0x33   : > { %8924 = vst [vmem:[#allocation15_spill] sm:$0xff] %v6092_v13  ;;  %310 = vst.msk [vmem:[#allocation2 + $0x69] sm:$0xff] %vm224_vm0, %v6084_v11  ;;  %v378_v26 = vld [vmem:[#allocation2 + $0x31] sm:$0xff] }
  0x34   : > { %311 = vst.msk [vmem:[#allocation2 + $0x79] sm:$0xff] %vm224_vm0, %v6089_v12  ;;  %312 = vst.msk [vmem:[#allocation2 + $0x81] sm:$0xff] %vm224_vm0, %v6092_v13  ;;  %v379_v27 = vld [vmem:[#allocation2 + $0x39] sm:$0xff] }
  0x35   : > { %8925 = vst [vmem:[#allocation16_spill] sm:$0xff] %v6101_v14  ;;  %8926 = vst [vmem:[#allocation17_spill] sm:$0xff] %v6104_v15  ;;  %v376_v28 = vld [vmem:[#allocation2 + $0x19] sm:$0xff]  ;;  %v6161_v29 = vpack.i.bf16 %v379_v27, %v378_v26 }
  0x36   : > { %8927 = vst [vmem:[#allocation18_spill] sm:$0xff] %v6107_v16  ;;  %313 = vst.msk [vmem:[#allocation2 + $0x91] sm:$0xff] %vm224_vm0, %v6101_v14  ;;  %v377_v30 = vld [vmem:[#allocation2 + $0x21] sm:$0xff] }
  0x37   : > { %314 = vst.msk [vmem:[#allocation2 + $0x99] sm:$0xff] %vm224_vm0, %v6104_v15  ;;  %8928 = vst [vmem:[#allocation19_spill] sm:$0xff] %v6115_v17  ;;  %v380_v31 = vld [vmem:[#allocation2 + $0x49] sm:$0xff]  ;;  %v381_v32 = vld [vmem:[#allocation2 + $0x51] sm:$0xff]  ;;  %v6163_v33 = vpack.i.bf16 %v377_v30, %v376_v28  ;;  %4569 = vrot.lane.b32.xlu1 %v6161_v29, %s5913_s10 }
  0x38   : > { %315 = vst.msk [vmem:[#allocation2 + $0xa9] sm:$0xff] %vm224_vm0, %v6107_v16  ;;  %8929 = vst [vmem:[#allocation20_spill] sm:$0xff] %v6120_v18  ;;  %v6173_v37 = vpack.i.bf16 %v381_v32, %v380_v31 }
  0x39   : > { %8930 = vst [vmem:[#allocation21_spill] sm:$0xff] %v6123_v19  ;;  %316 = vst.msk [vmem:[#allocation2 + $0xb1] sm:$0xff] %vm224_vm0, %v6115_v17  ;;  %v382_v34 = vld [vmem:[#allocation2 + $0x61] sm:$0xff]  ;;  %4564 = vrot.lane.b32.xlu0 %v6163_v33, %s5913_s10 }
  0x3a   : > { %317 = vst.msk [vmem:[#allocation2 + $0xc1] sm:$0xff] %vm224_vm0, %v6120_v18  ;;  %318 = vst.msk [vmem:[#allocation2 + $0xc9] sm:$0xff] %vm224_vm0, %v6123_v19  ;;  %v383_v38 = vld [vmem:[#allocation2 + $0x69] sm:$0xff] }
  0x3b   : > { %8931 = vst [vmem:[#allocation22_spill] sm:$0xff] %v6132_v20  ;;  %8932 = vst [vmem:[#allocation23_spill] sm:$0xff] %v6135_v21  ;;  %v6181_v39 = vpack.i.bf16 %v383_v38, %v382_v34  ;;  %v384_v40 = vld [vmem:[#allocation2 + $0x79] sm:$0xff]  ;;  %v385_v41 = vld [vmem:[#allocation2 + $0x81] sm:$0xff]  ;;  %4574 = vrot.lane.b32.xlu1 %v6173_v37, %s5913_s10 }
  0x3c   : > { %8933 = vst [vmem:[#allocation24_spill] sm:$0xff] %v6138_v22  ;;  %319 = vst.msk [vmem:[#allocation2 + $0xd9] sm:$0xff] %vm224_vm0, %v6132_v20  ;;  %v6185_v45 = vpack.i.bf16 %v385_v41, %v384_v40 }
  0x3d   : > { %320 = vst.msk [vmem:[#allocation2 + $0xe1] sm:$0xff] %vm224_vm0, %v6135_v21  ;;  %8934 = vst [vmem:[#allocation25_spill] sm:$0xff] %v6145_v23  ;;  %v386_v42 = vld [vmem:[#allocation2 + $0x91] sm:$0xff]  ;;  %4579 = vrot.lane.b32.xlu0 %v6181_v39, %s5913_s10 }
  0x3e   : > { %321 = vst.msk [vmem:[#allocation2 + $0xf1] sm:$0xff] %vm224_vm0, %v6138_v22  ;;  %8935 = vst [vmem:[#allocation26_spill] sm:$0xff] %v6150_v24  ;;  %v387_v43 = vld [vmem:[#allocation2 + $0x99] sm:$0xff]  ;;  %v6375_v21 = vld [vmem:[#allocation2 + $0x90] sm:$0xff] }
  0x3f   : > { %8936 = vst [vmem:[#allocation27_spill] sm:$0xff] %v6153_v25  ;;  %322 = vst.msk [vmem:[#allocation2 + $0xf9] sm:$0xff] %vm224_vm0, %v6145_v23  ;;  %v388_v44 = vld [vmem:[#allocation2 + $0xa9] sm:$0xff]  ;;  %v6189_v49 = vpack.i.bf16 %v387_v43, %v386_v42  ;;  %4584 = vrot.lane.b32.xlu1 %v6185_v45, %s5913_s10  ;;  %v6377_v23 = vld [vmem:[#allocation2 + $0x98] sm:$0xff] }
  0x40   : > { %323 = vst.msk [vmem:[#allocation2 + $0x109] sm:$0xff] %vm224_vm0, %v6150_v24  ;;  %324 = vst.msk [vmem:[#allocation2 + $0x111] sm:$0xff] %vm224_vm0, %v6153_v25  ;;  %v389_v46 = vld [vmem:[#allocation2 + $0xb1] sm:$0xff]  ;;  %v406_v42 = vld [vmem:[#allocation2 + $0x2] sm:$0xff]  ;;  %v6387_v17 = vpack.i.bf16 %v6377_v23, %v6375_v21 }
  0x41   : > { %8937 = vst [vmem:[#allocation28_spill] sm:$0xff] %v6166_v35  ;;  %8938 = vst [vmem:[#allocation29_spill] sm:$0xff] %v6169_v36  ;;  %v390_v47 = vld [vmem:[#allocation2 + $0xc1] sm:$0xff]  ;;  %v391_v48 = vld [vmem:[#allocation2 + $0xc9] sm:$0xff]  ;;  %v6223_v56 = vpack.i.bf16 %v389_v46, %v388_v44  ;;  %4589 = vrot.lane.b32.xlu0 %v6189_v49, %s5913_s10 }
  0x42   : > { %325 = vst.msk [vmem:[#allocation2 + $0x121] sm:$0xff] %vm224_vm0, %v6166_v35  ;;  %326 = vst.msk [vmem:[#allocation2 + $0x129] sm:$0xff] %vm224_vm0, %v6169_v36  ;;  %v6227_v57 = vpack.i.bf16 %v391_v48, %v390_v47  ;;  %v407_v43 = vld [vmem:[#allocation2 + $0xa] sm:$0xff]  ;;  %v408_v47 = vld [vmem:[#allocation2 + $0x1a] sm:$0xff] }
  0x43   : > { %8939 = vst [vmem:[#allocation30_spill] sm:$0xff] %v6192_v50  ;;  %8940 = vst [vmem:[#allocation31_spill] sm:$0xff] %v6195_v51  ;;  %v392_v58 = vld [vmem:[#allocation2 + $0xd9] sm:$0xff]  ;;  %4594 = vrot.lane.b32.xlu1 %v6223_v56, %s5913_s10  ;;  %v4638_v46 = vpack.i.bf16 %v407_v43, %v406_v42  ;;  %v409_v48 = vld [vmem:[#allocation2 + $0x22] sm:$0xff] }
  0x44   : > { %8941 = vst [vmem:[#allocation32_spill] sm:$0xff] %v6198_v52  ;;  %327 = vst.msk [vmem:[#allocation2 + $0x139] sm:$0xff] %vm224_vm0, %v6192_v50  ;;  %v393_v59 = vld [vmem:[#allocation2 + $0xe1] sm:$0xff]  ;;  %v418_v42 = vld [vmem:[#allocation2 + $0x92] sm:$0xff] }
  0x45   : > { %328 = vst.msk [vmem:[#allocation2 + $0x141] sm:$0xff] %vm224_vm0, %v6195_v51  ;;  %8942 = vst [vmem:[#allocation33_spill] sm:$0xff] %v6205_v53  ;;  %v394_v60 = vld [vmem:[#allocation2 + $0xf1] sm:$0xff]  ;;  %v6231_v62 = vpack.i.bf16 %v393_v59, %v392_v58  ;;  %4599 = vrot.lane.b32.xlu0 %v6227_v57, %s5913_s10  ;;  %v411_v59 = vld [vmem:[#allocation2 + $0x3a] sm:$0xff] }
  0x46   : > { %329 = vst.msk [vmem:[#allocation2 + $0x151] sm:$0xff] %vm224_vm0, %v6198_v52  ;;  %8943 = vst [vmem:[#allocation34_spill] sm:$0xff] %v6210_v54  ;;  %v395_v61 = vld [vmem:[#allocation2 + $0xf9] sm:$0xff]  ;;  %v6342_v50 = vld [vmem:[#allocation2 + $0x50] sm:$0xff] }
  0x47   : > { %8944 = vst [vmem:[#allocation35_spill] sm:$0xff] %v6213_v55  ;;  %330 = vst.msk [vmem:[#allocation2 + $0x159] sm:$0xff] %vm224_vm0, %v6205_v53  ;;  %v6235_v63 = vpack.i.bf16 %v395_v61, %v394_v60  ;;  %v396_v0 = vld [vmem:[#allocation2 + $0x109] sm:$0xff]  ;;  %v397_v7 = vld [vmem:[#allocation2 + $0x111] sm:$0xff]  ;;  %4604 = vrot.lane.b32.xlu1 %v6231_v62, %s5913_s10  ;;  %v6261_v60 = vpack.i.bf16 %v409_v48, %v408_v47 }
  0x48   : > { %331 = vst.msk [vmem:[#allocation2 + $0x169] sm:$0xff] %vm224_vm0, %v6210_v54  ;;  %332 = vst.msk [vmem:[#allocation2 + $0x171] sm:$0xff] %vm224_vm0, %v6213_v55  ;;  %v6239_v26 = vpack.i.bf16 %v397_v7, %v396_v0  ;;  %v410_v58 = vld [vmem:[#allocation2 + $0x32] sm:$0xff]  ;;  %v412_v0 = vld [vmem:[#allocation2 + $0x4a] sm:$0xff] }
  0x49   : > { %v398_v8 = vld [vmem:[#allocation2 + $0x121] sm:$0xff]  ;;  %v399_v10 = vld [vmem:[#allocation2 + $0x129] sm:$0xff]  ;;  %4609 = vrot.lane.b32.xlu0 %v6235_v63, %s5913_s10  ;;  %v6264_v61 = vpack.i.bf16 %v411_v59, %v410_v58  ;;  %v413_v7 = vld [vmem:[#allocation2 + $0x52] sm:$0xff] }
  0x4a   : > { %v6243_v27 = vpack.i.bf16 %v399_v10, %v398_v8  ;;  %v414_v8 = vld [vmem:[#allocation2 + $0x62] sm:$0xff]  ;;  %v415_v10 = vld [vmem:[#allocation2 + $0x6a] sm:$0xff]  ;;  %v419_v43 = vld [vmem:[#allocation2 + $0x9a] sm:$0xff] }
  0x4b   : > { %v400_v28 = vld [vmem:[#allocation2 + $0x139] sm:$0xff]  ;;  %4614 = vrot.lane.b32.xlu1 %v6239_v26, %s5913_s10  ;;  %v6290_v47 = vpack.i.bf16 %v419_v43, %v418_v42  ;;  %v420_v48 = vld [vmem:[#allocation2 + $0xaa] sm:$0xff]  ;;  %v422_v59 = vld [vmem:[#allocation2 + $0xc2] sm:$0xff] }
  0x4c   : > { %v401_v30 = vld [vmem:[#allocation2 + $0x141] sm:$0xff]  ;;  %v421_v58 = vld [vmem:[#allocation2 + $0xb2] sm:$0xff]  ;;  %v431_v54 = vld [vmem:[#allocation2 + $0x12a] sm:$0xff] }
  0x4d   : > { %v402_v31 = vld [vmem:[#allocation2 + $0x151] sm:$0xff]  ;;  %v6247_v34 = vpack.i.bf16 %v401_v30, %v400_v28  ;;  %4619 = vrot.lane.b32.xlu0 %v6243_v27, %s5913_s10  ;;  %v427_v55 = vld [vmem:[#allocation2 + $0xfa] sm:$0xff]  ;;  %v6357_v25 = vld [vmem:[#allocation2 + $0x68] sm:$0xff] }
  0x4e   : > { %v403_v32 = vld [vmem:[#allocation2 + $0x159] sm:$0xff]  ;;  %v6267_v28 = vld [vmem:[%s6048_s9 + $0xf0] sm:$0xff]  ;;  %v6379_v20 = vld [vmem:[#allocation2 + $0xa8] sm:$0xff] }
  0x4f   : > { %v6251_v38 = vpack.i.bf16 %v403_v32, %v402_v31  ;;  %v404_v40 = vld [vmem:[#allocation2 + $0x169] sm:$0xff]  ;;  %v405_v41 = vld [vmem:[#allocation2 + $0x171] sm:$0xff]  ;;  %4624 = vrot.lane.b32.xlu1 %v6247_v34, %s5913_s10  ;;  %8945 = vst [vmem:[#allocation36_spill] sm:$0xff] %v6267_v28  ;;  %v416_v31 = vld [vmem:[#allocation2 + $0x7a] sm:$0xff] }
  0x50   : > { %v6255_v44 = vpack.i.bf16 %v405_v41, %v404_v40  ;;  %v6270_v30 = vld [vmem:[%s6048_s9 + $0xf8] sm:$0xff]  ;;  %v417_v32 = vld [vmem:[#allocation2 + $0x82] sm:$0xff]  ;;  %333 = vst.msk [vmem:[#allocation2 + $0x181] sm:$0xff] %vm224_vm0, %v6267_v28  ;;  %v6278_v40 = vpack.i.bf16 %v413_v7, %v412_v0  ;;  %v6282_v41 = vpack.i.bf16 %v415_v10, %v414_v8  ;;  %v423_v0 = vld [vmem:[#allocation2 + $0xca] sm:$0xff]  ;;  %v6294_v7 = vpack.i.bf16 %v421_v58, %v420_v48 }
  0x51   : > { %4629 = vrot.lane.b32.xlu0 %v6251_v38, %s5913_s10  ;;  %8946 = vst [vmem:[#allocation37_spill] sm:$0xff] %v6270_v30  ;;  %334 = vst.msk [vmem:[#allocation2 + $0x189] sm:$0xff] %vm224_vm0, %v6270_v30  ;;  %v6298_v8 = vpack.i.bf16 %v423_v0, %v422_v59  ;;  %v424_v10 = vld [vmem:[#allocation2 + $0xda] sm:$0xff]  ;;  %v428_v48 = vld [vmem:[#allocation2 + $0x10a] sm:$0xff] }
  0x52   : > { %v429_v58 = vld [vmem:[#allocation2 + $0x112] sm:$0xff]  ;;  %v430_v30 = vld [vmem:[#allocation2 + $0x122] sm:$0xff]  ;;  %v435_v51 = vld [vmem:[#allocation2 + $0x15a] sm:$0xff]  ;;  %8947 = vst [vmem:[#allocation38_spill] sm:$0xff] %v6379_v20 }
  0x53   : > { %4634 = vrot.lane.b32.xlu1 %v6255_v44, %s5913_s10  ;;  %v6310_v59 = vpack.i.bf16 %v429_v58, %v428_v48  ;;  %v6314_v0 = vpack.i.bf16 %v431_v54, %v430_v30  ;;  %v434_v28 = vld [vmem:[#allocation2 + $0x152] sm:$0xff]  ;;  %v436_v48 = vld [vmem:[#allocation2 + $0x16a] sm:$0xff]  ;;  %v6326_v54 = vld [vmem:[#allocation2 + $0x20] sm:$0xff] }
  0x54   : > { %v437_v58 = vld [vmem:[#allocation2 + $0x172] sm:$0xff]  ;;  %v6355_v52 = vld [vmem:[#allocation2 + $0x60] sm:$0xff]  ;;  %v6397_v18 = vld [vmem:[#allocation2 + $0xc8] sm:$0xff] }
  0x55   : > { %4639 = vrot.lane.b32.xlu0 %v4638_v46, %s5914_s11  ;;  %v6286_v46 = vpack.i.bf16 %v417_v32, %v416_v31  ;;  %v425_v31 = vld [vmem:[#allocation2 + $0xe2] sm:$0xff]  ;;  %v426_v32 = vld [vmem:[#allocation2 + $0xf2] sm:$0xff]  ;;  %v6330_v30 = vpack.i.bf16 %v437_v58, %v436_v48  ;;  %v6367_v35 = vpack.i.bf16 %v6357_v25, %v6355_v52  ;;  %8949 = vst [vmem:[#allocation40_spill] sm:$0xff] %v6397_v18 }
  0x56   : > { %v6302_v42 = vpack.i.bf16 %v425_v31, %v424_v10  ;;  %v6306_v43 = vpack.i.bf16 %v427_v55, %v426_v32  ;;  %v432_v10 = vld [vmem:[#allocation2 + $0x13a] sm:$0xff]  ;;  %v433_v31 = vld [vmem:[#allocation2 + $0x142] sm:$0xff]  ;;  %v6322_v32 = vpack.i.bf16 %v435_v51, %v434_v28  ;;  %v6381_v22 = vld [vmem:[#allocation2 + $0xb0] sm:$0xff] }
  0x57   : > { %4644 = vrot.lane.b32.xlu1 %v6261_v60, %s5914_s11  ;;  %v6318_v55 = vpack.i.bf16 %v433_v31, %v432_v10  ;;  %v6324_v53 = vld [vmem:[#allocation2 + $0x18] sm:$0xff]  ;;  %v6336_v31 = vld [vmem:[#allocation2 + $0x30] sm:$0xff]  ;;  %v6340_v28 = vld [vmem:[#allocation2 + $0x48] sm:$0xff]  ;;  %v6393_v19 = vpack.i.bf16 %v6381_v22, %v6379_v20 }
  0x58   : > { %v4718_v10 = vpack.i.bf16 %v6326_v54, %v6324_v53  ;;  %v6338_v51 = vld [vmem:[#allocation2 + $0x38] sm:$0xff]  ;;  %v6353_v58 = vpack.i.bf16 %v6342_v50, %v6340_v28  ;;  %v6361_v24 = vld [vmem:[#allocation2 + $0x80] sm:$0xff]  ;;  %v6415_v6 = vld [vmem:[#allocation2 + $0xf0] sm:$0xff] }
  0x59   : > { %4649 = vrot.lane.b32.xlu0 %v6264_v61, %s5914_s11  ;;  %v6348_v48 = vpack.i.bf16 %v6338_v51, %v6336_v31  ;;  %v6359_v36 = vld [vmem:[#allocation2 + $0x78] sm:$0xff]  ;;  %v6395_v16 = vld [vmem:[#allocation2 + $0xc0] sm:$0xff]  ;;  %8952 = vst [vmem:[#allocation43_spill] sm:$0xff] %v6415_v6  ;;  %v6419_v5 = vld [vmem:[#allocation2 + $0x108] sm:$0xff] }
  0x5a   : > { %8948 = vst [vmem:[#allocation39_spill] sm:$0xff] %v6395_v16  ;;  %v6399_v13 = vld [vmem:[#allocation2 + $0xd8] sm:$0xff]  ;;  %v6401_v15 = vld [vmem:[#allocation2 + $0xe0] sm:$0xff]  ;;  %v6407_v12 = vpack.i.bf16 %v6397_v18, %v6395_v16  ;;  %8954 = vst [vmem:[#allocation45_spill] sm:$0xff] %v6419_v5 }
  0x5b   : > { %4654 = vrot.lane.b32.xlu1 %v6278_v40, %s5914_s11  ;;  %8950 = vst [vmem:[#allocation41_spill] sm:$0xff] %v6399_v13  ;;  %8951 = vst [vmem:[#allocation42_spill] sm:$0xff] %v6401_v15  ;;  %v6413_v14 = vpack.i.bf16 %v6401_v15, %v6399_v13  ;;  %v6417_v11 = vld [vmem:[#allocation2 + $0xf8] sm:$0xff]  ;;  %v6421_v9 = vld [vmem:[#allocation2 + $0x110] sm:$0xff] }
  0x5c   : > { %8953 = vst [vmem:[#allocation44_spill] sm:$0xff] %v6417_v11  ;;  %8955 = vst [vmem:[#allocation46_spill] sm:$0xff] %v6421_v9  ;;  %v6427_v4 = vpack.i.bf16 %v6417_v11, %v6415_v6  ;;  %v6433_v2 = vpack.i.bf16 %v6421_v9, %v6419_v5  ;;  %v6435_v3 = vld [vmem:[#allocation2 + $0x120] sm:$0xff]  ;;  %v6437_v1 = vld [vmem:[#allocation2 + $0x128] sm:$0xff] }
  0x5d   : > { %4659 = vrot.lane.b32.xlu0 %v6282_v41, %s5914_s11  ;;  %8956 = vst [vmem:[#allocation47_spill] sm:$0xff] %v6435_v3  ;;  %8957 = vst [vmem:[#allocation48_spill] sm:$0xff] %v6437_v1  ;;  %v6439_v13 = vld [vmem:[#allocation2 + $0x138] sm:$0xff]  ;;  %v6441_v15 = vld [vmem:[#allocation2 + $0x140] sm:$0xff]  ;;  %v6447_v6 = vpack.i.bf16 %v6437_v1, %v6435_v3 }
  0x5e   : > { %8958 = vst [vmem:[#allocation49_spill] sm:$0xff] %v6439_v13  ;;  %8959 = vst [vmem:[#allocation50_spill] sm:$0xff] %v6441_v15  ;;  %v6453_v5 = vpack.i.bf16 %v6441_v15, %v6439_v13  ;;  %v6455_v9 = vld [vmem:[#allocation2 + $0x150] sm:$0xff]  ;;  %v6457_v11 = vld [vmem:[#allocation2 + $0x158] sm:$0xff] }
  0x5f   : > { %4664 = vrot.lane.b32.xlu1 %v6286_v46, %s5914_s11  ;;  %v6459_v16 = vld [vmem:[#allocation2 + $0x168] sm:$0xff]  ;;  %v6461_v18 = vld [vmem:[#allocation2 + $0x170] sm:$0xff]  ;;  %v6467_v3 = vpack.i.bf16 %v6457_v11, %v6455_v9  ;;  %v468_v15 = vld [vmem:[#allocation2 + $0x180] sm:$0xff] }
  0x60   : > { %v6473_v13 = vpack.i.bf16 %v6461_v18, %v6459_v16  ;;  %v469_v1 = vld [vmem:[#allocation2 + $0x188] sm:$0xff] }
  0x61   : > { %4669 = vrot.lane.b32.xlu0 %v6290_v47, %s5914_s11  ;;  %v6477_v20 = vpack.i.bf16 %v469_v1, %v468_v15 }
  0x63   : > { %4674 = vrot.lane.b32.xlu1 %v6294_v7, %s5914_s11 }
  0x65   : > { %4679 = vrot.lane.b32.xlu0 %v6298_v8, %s5914_s11 }
  0x67   : > { %4684 = vrot.lane.b32.xlu1 %v6302_v42, %s5914_s11 }
  0x69   : > { %4689 = vrot.lane.b32.xlu0 %v6306_v43, %s5914_s11 }
  0x6b   : > { %4694 = vrot.lane.b32.xlu1 %v6310_v59, %s5914_s11 }
  0x6d   : > { %4699 = vrot.lane.b32.xlu0 %v6314_v0, %s5914_s11 }
  0x6f   : > { %4704 = vrot.lane.b32.xlu1 %v6318_v55, %s5914_s11 }
  0x71   : > { %4709 = vrot.lane.b32.xlu0 %v6322_v32, %s5914_s11 }
  0x73   : > { %4714 = vrot.lane.b32.xlu1 %v6330_v30, %s5914_s11 }
  0x75   : > { %4719 = vrot.lane.b32.xlu0 %v4718_v10, %s5915_s12  ;;  %v6373_v10 = vpack.i.bf16 %v6361_v24, %v6359_v36 }
  0x77   : > { %4724 = vrot.lane.b32.xlu1 %v6348_v48, %s5915_s12 }
  0x79   : > { %4729 = vrot.lane.b32.xlu0 %v6353_v58, %s5915_s12 }
  0x7b   : > { %4734 = vrot.lane.b32.xlu1 %v6367_v35, %s5915_s12 }
  0x7d   : > { %4739 = vrot.lane.b32.xlu0 %v6373_v10, %s5915_s12 }
  0x7f   : > { %4744 = vrot.lane.b32.xlu1 %v6387_v17, %s5915_s12 }
  0x81   : > { %4749 = vrot.lane.b32.xlu0 %v6393_v19, %s5915_s12 }
  0x83   : > { %4754 = vrot.lane.b32.xlu1 %v6407_v12, %s5915_s12 }
  0x85   : > { %4759 = vrot.lane.b32.xlu0 %v6413_v14, %s5915_s12 }
  0x87   : > { %4764 = vrot.lane.b32.xlu1 %v6427_v4, %s5915_s12 }
  0x89   : > { %4769 = vrot.lane.b32.xlu0 %v6433_v2, %s5915_s12 }
  0x8b   : > { %4774 = vrot.lane.b32.xlu1 %v6447_v6, %s5915_s12 }
  0x8d   : > { %4779 = vrot.lane.b32.xlu0 %v6453_v5, %s5915_s12 }
  0x8f   : > { %4784 = vrot.lane.b32.xlu1 %v6467_v3, %s5915_s12 }
  0x91   : > { %4789 = vrot.lane.b32.xlu0 %v6473_v13, %s5915_s12 }
  0x93   : > { %4794 = vrot.lane.b32.xlu1 %v6477_v20, %s5915_s12  ;;  %v6501_v1 = vpop.permute.xlu0 %4559 }
  0x95   : > { %4799 = vrot.lane.b32.xlu0 %v6163_v33, %s5916_s13  ;;  %v500_v33 = vld [vmem:[#allocation2 + $0x181] sm:$0xff] }
  0x97   : > { %4804 = vrot.lane.b32.xlu1 %v6161_v29, %s5916_s13 }
  0x99   : > { %4809 = vrot.lane.b32.xlu0 %v6173_v37, %s5916_s13  ;;  %v501_v37 = vld [vmem:[#allocation2 + $0x189] sm:$0xff] }
  0x9b   : > { %4814 = vrot.lane.b32.xlu1 %v6181_v39, %s5916_s13 }
  0x9d   : > { %4819 = vrot.lane.b32.xlu0 %v6185_v45, %s5916_s13 }
  0x9f   : > { %4824 = vrot.lane.b32.xlu1 %v6189_v49, %s5916_s13  ;;  %v4873_v49 = vpack.i.bf16 %v501_v37, %v500_v33 }
  0xa1   : > { %4829 = vrot.lane.b32.xlu0 %v6223_v56, %s5916_s13 }
  0xa3   : > { %4834 = vrot.lane.b32.xlu1 %v6227_v57, %s5916_s13 }
  0xa5   : > { %4839 = vrot.lane.b32.xlu0 %v6231_v62, %s5916_s13 }
  0xa7   : > { %4844 = vrot.lane.b32.xlu1 %v6235_v63, %s5916_s13 }
  0xa9   : > { %4849 = vrot.lane.b32.xlu0 %v6239_v26, %s5916_s13  ;;  %v6507_v15 = vpop.permute.xlu1 %4569 }
  0xab   : > { %v6509_v29 = vpop.permute.xlu0 %4564  ;;  %4854 = vrot.lane.b32.xlu1 %v6243_v27, %s5916_s13 }
  0xad   : > { %4859 = vrot.lane.b32.xlu0 %v6247_v34, %s5916_s13  ;;  %v6515_v39 = vpop.permute.xlu1 %4574 }
  0xaf   : > { %v6517_v45 = vpop.permute.xlu0 %4579  ;;  %4864 = vrot.lane.b32.xlu1 %v6251_v38, %s5916_s13 }
  0xb1   : > { %4869 = vrot.lane.b32.xlu0 %v6255_v44, %s5916_s13  ;;  %v6523_v56 = vpop.permute.xlu1 %4584 }
  0xb3   : > { %v6525_v57 = vpop.permute.xlu0 %4589  ;;  %4874 = vrot.lane.b32.xlu1 %v4873_v49, %s5916_s13  ;;  %v5840_v49 = vld [vmem:[%s8806_s1 + $0x10] sm:$0xff]  }
  0xb5   : > { %4879 = vrot.lane.b32.xlu0 %v6261_v60, %s5917_s14  ;;  %v6530_v62 = vpop.permute.xlu1 %4594 }
  0xb7   : > { %v6532_v63 = vpop.permute.xlu0 %4599  ;;  %4884 = vrot.lane.b32.xlu1 %v6264_v61, %s5917_s14 }
  0xb9   : > { %4889 = vrot.lane.b32.xlu0 %v6278_v40, %s5917_s14  ;;  %v6538_v26 = vpop.permute.xlu1 %4604 }
  0xbb   : > { %v6540_v27 = vpop.permute.xlu0 %4609  ;;  %4894 = vrot.lane.b32.xlu1 %v6282_v41, %s5917_s14 }
  0xbd   : > { %4899 = vrot.lane.b32.xlu0 %v6286_v46, %s5917_s14  ;;  %v6546_v34 = vpop.permute.xlu1 %4614 }
  0xbf   : > { %v6548_v38 = vpop.permute.xlu0 %4619  ;;  %4904 = vrot.lane.b32.xlu1 %v6290_v47, %s5917_s14  ;;  %v532_v47 = vld [vmem:[#allocation2 + $0x182] sm:$0xff] }
  0xc1   : > { %4909 = vrot.lane.b32.xlu0 %v6294_v7, %s5917_s14  ;;  %v6554_v44 = vpop.permute.xlu1 %4624  ;;  %v533_v7 = vld [vmem:[#allocation2 + $0x18a] sm:$0xff] }
  0xc3   : > { %v6556_v60 = vpop.permute.xlu0 %4629  ;;  %4914 = vrot.lane.b32.xlu1 %v6298_v8, %s5917_s14 }
  0xc5   : > { %4919 = vrot.lane.b32.xlu0 %v6302_v42, %s5917_s14  ;;  %v6562_v61 = vpop.permute.xlu1 %4634 }
  0xc7   : > { %v6564_v40 = vpop.permute.xlu0 %4639  ;;  %4924 = vrot.lane.b32.xlu1 %v6306_v43, %s5917_s14  ;;  %v6584_v43 = vpack.i.bf16 %v533_v7, %v532_v47  ;;  %v5841_v47 = vld [vmem:[%s8806_s1 + $0x18] sm:$0xff]   ;;  %v566_v7 = vld [vmem:[#allocation2 + $0x1a0] sm:$0xff] }
  0xc9   : > { %4929 = vrot.lane.b32.xlu0 %v6310_v59, %s5917_s14  ;;  %v6570_v41 = vpop.permute.xlu1 %4644 }
  0xcb   : > { %v6572_v46 = vpop.permute.xlu0 %4649  ;;  %4934 = vrot.lane.b32.xlu1 %v6314_v0, %s5917_s14 }
  0xcd   : > { %4939 = vrot.lane.b32.xlu0 %v6318_v55, %s5917_s14  ;;  %v6578_v8 = vpop.permute.xlu1 %4654 }
  0xcf   : > { %v6580_v42 = vpop.permute.xlu0 %4659  ;;  %4944 = vrot.lane.b32.xlu1 %v6322_v32, %s5917_s14 }
  0xd1   : > { %4949 = vrot.lane.b32.xlu0 %v6330_v30, %s5917_s14  ;;  %v6588_v59 = vpop.permute.xlu1 %4664 }
  0xd3   : > { %v6590_v0 = vpop.permute.xlu0 %4669  ;;  %4954 = vrot.lane.b32.xlu1 %v6584_v43, %s5917_s14 }
  0xd5   : > { %4959 = vrot.lane.b32.xlu0 %v6348_v48, %s5918_s15  ;;  %v6596_v55 = vpop.permute.xlu1 %4674 }
  0xd6   : > { %8960 = vst [vmem:[#allocation51_spill] sm:$0xff] %v6596_v55 }
  0xd7   : > { %v6598_v33 = vpop.permute.xlu0 %4679  ;;  %4964 = vrot.lane.b32.xlu1 %v6353_v58, %s5918_s15  ;;  %v5838_v58 = vld [vmem:[%s8806_s1] sm:$0xff]  }
  0xd8   : > { %8961 = vst [vmem:[#allocation52_spill] sm:$0xff] %v6598_v33  ;;  %4423 = vmatprep.subr.bf16.mxu0 %v5838_v58  ;;  %v598_v33 = vld [vmem:[#allocation2 + $0x1a1] sm:$0xff] }
  0xd9   : > { %4969 = vrot.lane.b32.xlu0 %v6367_v35, %s5918_s15  ;;  %v6604_v32 = vpop.permute.xlu1 %4684  ;;  %4424 = vmatpush3.bf16.msra.mxu0 %v5838_v58  ;;  %v567_v58 = vld [vmem:[#allocation2 + $0x31] sm:$0xff] }
  0xda   : > { %8962 = vst [vmem:[#allocation53_spill] sm:$0xff] %v6604_v32  ;;  %v4581_v32 = vunpack.i.l.bf16 %v6517_v45 }
  0xdb   : > { %v6606_v30 = vpop.permute.xlu0 %4689  ;;  %4974 = vrot.lane.b32.xlu1 %v6373_v10, %s5918_s15 }
  0xdc   : > { %8963 = vst [vmem:[#allocation54_spill] sm:$0xff] %v6606_v30  ;;  %v4567_v30 = vunpack.i.h.bf16 %v6509_v29 }
  0xdd   : > { %4979 = vrot.lane.b32.xlu0 %v6387_v17, %s5918_s15  ;;  %v6612_v48 = vpop.permute.xlu1 %4694  ;;  %v5839_v17 = vld [vmem:[%s8806_s1 + $0x8] sm:$0xff]  }
  0xde   : > { %8964 = vst [vmem:[#allocation55_spill] sm:$0xff] %v6612_v48  ;;  %4425 = vmatprep.subr.bf16.mxu0 %v5839_v17 }
  0xdf   : > { %v6614_v37 = vpop.permute.xlu0 %4699  ;;  %4984 = vrot.lane.b32.xlu1 %v6393_v19, %s5918_s15  ;;  %4426 = vmatpush3.bf16.msra.mxu0 %v5839_v17  ;;  %v568_v17 = vld [vmem:[#allocation2 + $0x39] sm:$0xff] }
  0xe0   : > { %8965 = vst [vmem:[#allocation56_spill] sm:$0xff] %v6614_v37  ;;  %4427 = vmatprep.subr.bf16.mxu0 %v5840_v49  ;;  %v594_v37 = vld [vmem:[#allocation2 + $0x171] sm:$0xff] }
  0xe1   : > { %4989 = vrot.lane.b32.xlu0 %v6407_v12, %s5918_s15  ;;  %v6623_v35 = vpop.permute.xlu1 %4704 }
  0xe2   : > { %8966 = vst [vmem:[#allocation57_spill] sm:$0xff] %v6623_v35 }
  0xe3   : > { %v6625_v10 = vpop.permute.xlu0 %4709  ;;  %4994 = vrot.lane.b32.xlu1 %v6413_v14, %s5918_s15  ;;  %4428 = vmatpush3.bf16.msra.mxu0 %v5840_v49 }
  0xe4   : > { %8967 = vst [vmem:[#allocation58_spill] sm:$0xff] %v6625_v10  ;;  %4429 = vmatprep.subr.bf16.mxu0 %v5841_v47 }
  0xe5   : > { %4999 = vrot.lane.b32.xlu0 %v6427_v4, %s5918_s15  ;;  %v6634_v19 = vpop.permute.xlu1 %4714 }
  0xe6   : > { %8968 = vst [vmem:[#allocation59_spill] sm:$0xff] %v6634_v19  ;;  %v600_v19 = vld [vmem:[#allocation2 + $0x3a] sm:$0xff] }
  0xe7   : > { %v6636_v12 = vpop.permute.xlu0 %4719  ;;  %5004 = vrot.lane.b32.xlu1 %v6433_v2, %s5918_s15  ;;  %v565_v2 = vld [vmem:[#allocation2 + $0x198] sm:$0xff]  ;;  %4430 = vmatpush3.bf16.msra.mxu0 %v5841_v47 }
  0xe8   : > { %8969 = vst [vmem:[#allocation60_spill] sm:$0xff] %v6636_v12  ;;  %v599_v12 = vld [vmem:[#allocation2 + $0x32] sm:$0xff] }
  0xe9   : > { %5009 = vrot.lane.b32.xlu0 %v6447_v6, %s5918_s15  ;;  %v6645_v14 = vpop.permute.xlu1 %4724 }
  0xea   : > { %8970 = vst [vmem:[#allocation61_spill] sm:$0xff] %v6645_v14  ;;  %v569_v14 = vld [vmem:[#allocation2 + $0x49] sm:$0xff] }
  0xeb   : > { %v6647_v4 = vpop.permute.xlu0 %4729  ;;  %5014 = vrot.lane.b32.xlu1 %v6453_v5, %s5918_s15  ;;  %v5033_v5 = vpack.i.bf16 %v566_v7, %v565_v2  ;;  %v601_v2 = vld [vmem:[#allocation2 + $0x4a] sm:$0xff]  ;;  %v602_v7 = vld [vmem:[#allocation2 + $0x52] sm:$0xff] }
  0xec   : > { %8971 = vst [vmem:[#allocation62_spill] sm:$0xff] %v6647_v4  ;;  %v5842_v4 = vld [vmem:[%s8806_s1 + $0x20] ss:$0 sps:$4 sm:$0xff]  }
  0xed   : > { %5019 = vrot.lane.b32.xlu0 %v6467_v3, %s5918_s15  ;;  %v6656_v6 = vpop.permute.xlu1 %4734  ;;  %v5038_v3 = vpack.i.bf16 %v568_v17, %v567_v58  ;;  %4507 = vmatprep.subr.msk.bf16.mxu0 %vm2019_vm3, %v5842_v4  ;;  %v2021_v47 = vsel %vm2019_vm3, %v5842_v4, 0  ;;  %v571_v17 = vld [vmem:[#allocation2 + $0x61] sm:$0xff]  ;;  %v572_v4 = vld [vmem:[#allocation2 + $0x69] sm:$0xff] }
  0xee   : > { %8972 = vst [vmem:[#allocation63_spill] sm:$0xff] %v6656_v6  ;;  %v570_v6 = vld [vmem:[#allocation2 + $0x51] sm:$0xff]  ;;  %4432 = vmatpush3.bf16.msra.mxu0 %v2021_v47  ;;  %v5053_v47 = vpack.i.bf16 %v602_v7, %v601_v2  ;;  %v606_v2 = vld [vmem:[#allocation2 + $0x82] sm:$0xff] }
  0xef   : > { %v6658_v49 = vpop.permute.xlu0 %4739  ;;  %5024 = vrot.lane.b32.xlu1 %v6473_v13, %s5918_s15  ;;  %v5043_v13 = vpack.i.bf16 %v570_v6, %v569_v14  ;;  %v573_v14 = vld [vmem:[#allocation2 + $0x79] sm:$0xff]  ;;  %v574_v6 = vld [vmem:[#allocation2 + $0x81] sm:$0xff] }
  0xf0   : > { %8973 = vst [vmem:[#allocation64_spill] sm:$0xff] %v6658_v49 }
  0xf1   : > { %5029 = vrot.lane.b32.xlu0 %v6477_v20, %s5918_s15  ;;  %v6669_v49 = vpop.permute.xlu1 %4744  ;;  %v5048_v20 = vpack.i.bf16 %v600_v19, %v599_v12  ;;  %v603_v19 = vld [vmem:[#allocation2 + $0x62] sm:$0xff]  ;;  %v604_v12 = vld [vmem:[#allocation2 + $0x6a] sm:$0xff] }
  0xf2   : > { %8974 = vst [vmem:[#allocation65_spill] sm:$0xff] %v6669_v49  ;;  %v577_v49 = vld [vmem:[#allocation2 + $0xa9] sm:$0xff] }
  0xf3   : > { %v6671_v10 = vpop.permute.xlu0 %4749  ;;  %5034 = vrot.lane.b32.xlu1 %v5033_v5, %s5918_s15  ;;  %v5058_v5 = vpack.i.bf16 %v572_v4, %v571_v17  ;;  %v576_v17 = vld [vmem:[#allocation2 + $0x99] sm:$0xff] }
  0xf4   : > { %8975 = vst [vmem:[#allocation66_spill] sm:$0xff] %v6671_v10 }
  0xf5   : > { %5039 = vrot.lane.b32.xlu0 %v5038_v3, %s5919_s16  ;;  %v6675_v58 = vpop.permute.xlu1 %4754 }
  0xf6   : > { %8976 = vst [vmem:[#allocation67_spill] sm:$0xff] %v6675_v58  ;;  %v5063_v58 = vpack.i.bf16 %v574_v6, %v573_v14  ;;  %v608_v6 = vld [vmem:[#allocation2 + $0x9a] sm:$0xff] }
  0xf7   : > { %v6677_v35 = vpop.permute.xlu0 %4759  ;;  %5044 = vrot.lane.b32.xlu1 %v5043_v13, %s5919_s16  ;;  %v605_v13 = vld [vmem:[#allocation2 + $0x7a] sm:$0xff] }
  0xf8   : > { %8977 = vst [vmem:[#allocation68_spill] sm:$0xff] %v6677_v35  ;;  %v5068_v35 = vpack.i.bf16 %v604_v12, %v603_v19 }
  0xf9   : > { %5049 = vrot.lane.b32.xlu0 %v5048_v20, %s5920_s17  ;;  %v6681_v10 = vpop.permute.xlu1 %4764  ;;  %v575_v20 = vld [vmem:[#allocation2 + $0x91] sm:$0xff] }
  0xfa   : > { %8978 = vst [vmem:[#allocation69_spill] sm:$0xff] %v6681_v10  ;;  %v5073_v10 = vpack.i.bf16 %v606_v2, %v605_v13  ;;  %v580_v2 = vld [vmem:[#allocation2 + $0xc9] sm:$0xff] }
  0xfb   : > { %v6683_v3 = vpop.permute.xlu0 %4769  ;;  %5054 = vrot.lane.b32.xlu1 %v5053_v47, %s5920_s17  ;;  %v578_v47 = vld [vmem:[#allocation2 + $0xb1] sm:$0xff] }
  0xfc   : > { %8979 = vst [vmem:[#allocation70_spill] sm:$0xff] %v6683_v3  ;;  %v5078_v3 = vpack.i.bf16 %v576_v17, %v575_v20  ;;  %v5083_v12 = vpack.i.bf16 %v578_v47, %v577_v49  ;;  %v612_v47 = vld [vmem:[#allocation2 + $0xca] sm:$0xff] }
  0xfd   : > { %5059 = vrot.lane.b32.xlu0 %v5058_v5, %s5919_s16  ;;  %v6687_v7 = vpop.permute.xlu1 %4774  ;;  %v607_v5 = vld [vmem:[#allocation2 + $0x92] sm:$0xff] }
  0xfe   : > { %8980 = vst [vmem:[#allocation71_spill] sm:$0xff] %v6687_v7  ;;  %v609_v7 = vld [vmem:[#allocation2 + $0xaa] sm:$0xff] }
  0xff   : > { %v6689_v4 = vpop.permute.xlu0 %4779  ;;  %5064 = vrot.lane.b32.xlu1 %v5063_v58, %s5919_s16  ;;  %v610_v58 = vld [vmem:[#allocation2 + $0xb2] sm:$0xff] }
 0x100   : > { %8981 = vst [vmem:[#allocation72_spill] sm:$0xff] %v6689_v4  ;;  %v5088_v4 = vpack.i.bf16 %v608_v6, %v607_v5  ;;  %v5093_v17 = vpack.i.bf16 %v610_v58, %v609_v7  ;;  %v584_v58 = vld [vmem:[#allocation2 + $0xf9] sm:$0xff] }
 0x101   : > { %5069 = vrot.lane.b32.xlu0 %v5068_v35, %s5920_s17  ;;  %v6693_v14 = vpop.permute.xlu1 %4784  ;;  %v579_v35 = vld [vmem:[#allocation2 + $0xc1] sm:$0xff] }
 0x102   : > { %8982 = vst [vmem:[#allocation73_spill] sm:$0xff] %v6693_v14  ;;  %v581_v14 = vld [vmem:[#allocation2 + $0xd9] sm:$0xff] }
 0x103   : > { %v6695_v19 = vpop.permute.xlu0 %4789  ;;  %5074 = vrot.lane.b32.xlu1 %v5073_v10, %s5920_s17  ;;  %v582_v10 = vld [vmem:[#allocation2 + $0xe1] sm:$0xff] }
 0x104   : > { %8983 = vst [vmem:[#allocation74_spill] sm:$0xff] %v6695_v19  ;;  %v5098_v19 = vpack.i.bf16 %v580_v2, %v579_v35  ;;  %v5103_v6 = vpack.i.bf16 %v582_v10, %v581_v14  ;;  %v616_v10 = vld [vmem:[#allocation2 + $0xfa] sm:$0xff] }
 0x105   : > { %5079 = vrot.lane.b32.xlu0 %v5078_v3, %s5919_s16  ;;  %v6699_v13 = vpop.permute.xlu1 %4794  ;;  %v611_v3 = vld [vmem:[#allocation2 + $0xc2] sm:$0xff] }
 0x106   : > { %8984 = vst [vmem:[#allocation75_spill] sm:$0xff] %v6699_v13  ;;  %v613_v13 = vld [vmem:[#allocation2 + $0xda] sm:$0xff] }
 0x107   : > { %v6701_v20 = vpop.permute.xlu0 %4799  ;;  %5084 = vrot.lane.b32.xlu1 %v5083_v12, %s5919_s16  ;;  %v614_v12 = vld [vmem:[#allocation2 + $0xe2] sm:$0xff] }
 0x108   : > { %8985 = vst [vmem:[#allocation76_spill] sm:$0xff] %v6701_v20  ;;  %v5108_v20 = vpack.i.bf16 %v612_v47, %v611_v3  ;;  %v5113_v2 = vpack.i.bf16 %v614_v12, %v613_v13  ;;  %v588_v12 = vld [vmem:[#allocation2 + $0x129] sm:$0xff] }
 0x109   : > { %5089 = vrot.lane.b32.xlu0 %v5088_v4, %s5920_s17  ;;  %v6705_v49 = vpop.permute.xlu1 %4804  ;;  %v583_v4 = vld [vmem:[#allocation2 + $0xf1] sm:$0xff] }
 0x10a   : > { %8986 = vst [vmem:[#allocation77_spill] sm:$0xff] %v6705_v49  ;;  %v585_v49 = vld [vmem:[#allocation2 + $0x109] sm:$0xff] }
 0x10b   : > { %v6707_v5 = vpop.permute.xlu0 %4809  ;;  %5094 = vrot.lane.b32.xlu1 %v5093_v17, %s5920_s17  ;;  %v586_v17 = vld [vmem:[#allocation2 + $0x111] sm:$0xff] }
 0x10c   : > { %8987 = vst [vmem:[#allocation78_spill] sm:$0xff] %v6707_v5  ;;  %v5118_v5 = vpack.i.bf16 %v584_v58, %v583_v4  ;;  %v5123_v47 = vpack.i.bf16 %v586_v17, %v585_v49  ;;  %v620_v17 = vld [vmem:[#allocation2 + $0x12a] sm:$0xff] }
 0x10d   : > { %5099 = vrot.lane.b32.xlu0 %v5098_v19, %s5919_s16  ;;  %v6711_v7 = vpop.permute.xlu1 %4814  ;;  %v615_v19 = vld [vmem:[#allocation2 + $0xf2] sm:$0xff] }
 0x10e   : > { %8988 = vst [vmem:[#allocation79_spill] sm:$0xff] %v6711_v7  ;;  %v617_v7 = vld [vmem:[#allocation2 + $0x10a] sm:$0xff] }
 0x10f   : > { %v6713_v35 = vpop.permute.xlu0 %4819  ;;  %5104 = vrot.lane.b32.xlu1 %v5103_v6, %s5919_s16  ;;  %v618_v6 = vld [vmem:[#allocation2 + $0x112] sm:$0xff] }
 0x110   : > { %8989 = vst [vmem:[#allocation80_spill] sm:$0xff] %v6713_v35  ;;  %v5128_v35 = vpack.i.bf16 %v616_v10, %v615_v19  ;;  %v5133_v58 = vpack.i.bf16 %v618_v6, %v617_v7  ;;  %v592_v6 = vld [vmem:[#allocation2 + $0x159] sm:$0xff] }
 0x111   : > { %5109 = vrot.lane.b32.xlu0 %v5108_v20, %s5920_s17  ;;  %v6717_v14 = vpop.permute.xlu1 %4824  ;;  %v587_v20 = vld [vmem:[#allocation2 + $0x121] sm:$0xff] }
 0x112   : > { %8990 = vst [vmem:[#allocation81_spill] sm:$0xff] %v6717_v14  ;;  %v589_v14 = vld [vmem:[#allocation2 + $0x139] sm:$0xff] }
 0x113   : > { %v6719_v3 = vpop.permute.xlu0 %4829  ;;  %5114 = vrot.lane.b32.xlu1 %v5113_v2, %s5920_s17  ;;  %v590_v2 = vld [vmem:[#allocation2 + $0x141] sm:$0xff] }
 0x114   : > { %8991 = vst [vmem:[#allocation82_spill] sm:$0xff] %v6719_v3  ;;  %v5138_v3 = vpack.i.bf16 %v588_v12, %v587_v20  ;;  %v5143_v10 = vpack.i.bf16 %v590_v2, %v589_v14  ;;  %v623_v2 = vld [vmem:[#allocation2 + $0x152] sm:$0xff] }
 0x115   : > { %5119 = vrot.lane.b32.xlu0 %v5118_v5, %s5919_s16  ;;  %v6723_v13 = vpop.permute.xlu1 %4834  ;;  %v619_v5 = vld [vmem:[#allocation2 + $0x122] sm:$0xff] }
 0x116   : > { %8992 = vst [vmem:[#allocation83_spill] sm:$0xff] %v6723_v13  ;;  %v621_v13 = vld [vmem:[#allocation2 + $0x13a] sm:$0xff] }
 0x117   : > { %v6725_v4 = vpop.permute.xlu0 %4839  ;;  %5124 = vrot.lane.b32.xlu1 %v5123_v47, %s5919_s16  ;;  %v622_v47 = vld [vmem:[#allocation2 + $0x142] sm:$0xff] }
 0x118   : > { %8993 = vst [vmem:[#allocation84_spill] sm:$0xff] %v6725_v4  ;;  %v5148_v4 = vpack.i.bf16 %v620_v17, %v619_v5  ;;  %v5153_v12 = vpack.i.bf16 %v622_v47, %v621_v13  ;;  %v624_v5 = vld [vmem:[#allocation2 + $0x15a] sm:$0xff]  ;;  %v4561_v17 = vunpack.i.l.bf16 %v6501_v1  ;;  %v4572_v13 = vunpack.i.h.bf16 %v6507_v15 }
 0x119   : > { %5129 = vrot.lane.b32.xlu0 %v5128_v35, %s5920_s17  ;;  %v6729_v49 = vpop.permute.xlu1 %4844  ;;  %v591_v35 = vld [vmem:[#allocation2 + $0x151] sm:$0xff]  ;;  %v4571_v47 = vunpack.i.l.bf16 %v6507_v15  ;;  %v4582_v15 = vunpack.i.h.bf16 %v6517_v45 }
 0x11a   : > { %8994 = vst [vmem:[#allocation85_spill] sm:$0xff] %v6729_v49  ;;  %v593_v49 = vld [vmem:[#allocation2 + $0x169] sm:$0xff]  ;;  %v5158_v14 = vpack.i.bf16 %v592_v6, %v591_v35  ;;  %v626_v35 = vld [vmem:[#allocation2 + $0x172] sm:$0xff]  ;;  %v595_v6 = vld [vmem:[#allocation2 + $0x181] sm:$0xff]  ;;  %v6774_v45 = vsel %vm224_vm0, %v6338_v51, %v4572_v13  ;;  %v4601_v13 = vunpack.i.l.bf16 %v6532_v63 }
 0x11b   : > { %v6731_v19 = vpop.permute.xlu0 %4849  ;;  %5134 = vrot.lane.b32.xlu1 %v5133_v58, %s5920_s17 }
 0x11c   : > { %8995 = vst [vmem:[#allocation86_spill] sm:$0xff] %v6731_v19  ;;  %v4562_v19 = vunpack.i.h.bf16 %v6501_v1 }
 0x11d   : > { %5139 = vrot.lane.b32.xlu0 %v5138_v3, %s5919_s16  ;;  %v6735_v7 = vpop.permute.xlu1 %4854  ;;  %v343_v3 = vld [vmem:[#allocation2 + $0x8] sm:$0xff] }
 0x11e   : > { %8996 = vst [vmem:[#allocation87_spill] sm:$0xff] %v6735_v7  ;;  %v342_v7 = vld [vmem:[#allocation2] sm:$0xff]  ;;  %v6753_v1 = vsel %vm224_vm0, %v343_v3, %v4562_v19  ;;  %v4587_v19 = vunpack.i.h.bf16 %v6523_v56 }
 0x11f   : > { %v6737_v20 = vpop.permute.xlu0 %4859  ;;  %5144 = vrot.lane.b32.xlu1 %v5143_v10, %s5919_s16  ;;  %v625_v10 = vld [vmem:[#allocation2 + $0x16a] sm:$0xff]  ;;  %v6763_v55 = vsel %vm224_vm0, %v342_v7, %v4561_v17  ;;  %v6782_v7 = vsel %vm224_vm0, %v6326_v54, %v4567_v30  ;;  %v629_v17 = vld [vmem:[#allocation2 + $0x19a] sm:$0xff]  ;;  %v6799_v30 = vsel %vm224_vm0, %v6357_v25, %v4582_v15  ;;  %v4602_v25 = vunpack.i.h.bf16 %v6532_v63 }
 0x120   : > { %8997 = vst [vmem:[#allocation88_spill] sm:$0xff] %v6737_v20  ;;  %v5163_v20 = vpack.i.bf16 %v594_v37, %v593_v49  ;;  %v5168_v37 = vpack.i.bf16 %v624_v5, %v623_v2  ;;  %v4577_v49 = vunpack.i.h.bf16 %v6515_v39  ;;  %v4612_v63 = vunpack.i.h.bf16 %v6540_v27 }
 0x121   : > { %5149 = vrot.lane.b32.xlu0 %v5148_v4, %s5920_s17  ;;  %v6742_v58 = vpop.permute.xlu1 %4864  ;;  %v4566_v4 = vunpack.i.l.bf16 %v6509_v29  ;;  %v4621_v15 = vunpack.i.l.bf16 %v6548_v38 }
 0x122   : > { %8998 = vst [vmem:[#allocation89_spill] sm:$0xff] %v6742_v58  ;;  %v596_v58 = vld [vmem:[#allocation2 + $0x189] sm:$0xff] }
 0x123   : > { %v6745_v48 = vpop.permute.xlu0 %4869  ;;  %5154 = vrot.lane.b32.xlu1 %v5153_v12, %s5920_s17  ;;  %v597_v12 = vld [vmem:[#allocation2 + $0x199] sm:$0xff]  ;;  %v5178_v2 = vpack.i.bf16 %v596_v58, %v595_v6  ;;  %v6778_v5 = vsel %vm224_vm0, %v6324_v53, %v4566_v4  ;;  %v630_v58 = vld [vmem:[#allocation2 + $0x1a2] sm:$0xff]  ;;  %v6791_v53 = vsel %vm224_vm0, %v6342_v50, %v4577_v49  ;;  %v4597_v50 = vunpack.i.h.bf16 %v6530_v62 }
 0x124   : > { %8999 = vst [vmem:[#allocation90_spill] sm:$0xff] %v6745_v48  ;;  %v4576_v48 = vunpack.i.l.bf16 %v6515_v39  ;;  %v6770_v39 = vsel %vm224_vm0, %v6336_v31, %v4571_v47  ;;  %v4592_v31 = vunpack.i.h.bf16 %v6525_v57  ;;  %v4591_v47 = vunpack.i.l.bf16 %v6525_v57 }
 0x125   : > { %5159 = vrot.lane.b32.xlu0 %v5158_v14, %s5919_s16  ;;  %v6760_v29 = vpop.permute.xlu1 %4874  ;;  %v5173_v14 = vpack.i.bf16 %v626_v35, %v625_v10  ;;  %v4586_v10 = vunpack.i.l.bf16 %v6523_v56  ;;  %v5183_v51 = vpack.i.bf16 %v598_v33, %v597_v12  ;;  %v6803_v56 = vsel %vm224_vm0, %v6355_v52, %v4581_v32 }
 0x126   : > { %9000 = vst [vmem:[#allocation91_spill] sm:$0xff] %v6760_v29  ;;  %v6795_v54 = vsel %vm224_vm0, %v6340_v28, %v4576_v48  ;;  %v6809_v33 = vsel %vm224_vm0, %v6361_v24, %v4587_v19  ;;  %v5193_v48 = vpack.i.bf16 %v630_v58, %v629_v17  ;;  %v4607_v52 = vunpack.i.h.bf16 %v6538_v26  ;;  %v9002_v19 = vld [vmem:[#allocation40_spill] sm:$0xff]  ;;  %v9005_v58 = vld [vmem:[#allocation41_spill] sm:$0xff] }
 0x127   : > { %v6766_v3 = vpop.permute.xlu0 %4879  ;;  %5164 = vrot.lane.b32.xlu1 %v5163_v20, %s5919_s16  ;;  %v4596_v20 = vunpack.i.l.bf16 %v6530_v62  ;;  %v4606_v32 = vunpack.i.l.bf16 %v6538_v26  ;;  %v6822_v24 = vsel %vm224_vm0, %v6359_v36, %v4586_v10  ;;  %v6826_v62 = vsel %vm224_vm0, %v6377_v23, %v4592_v31 }
 0x128   : > { %v6830_v4 = vsel %vm224_vm0, %v6375_v21, %v4591_v47  ;;  %v4611_v26 = vunpack.i.l.bf16 %v6540_v27  ;;  %v4617_v35 = vunpack.i.h.bf16 %v6546_v34  ;;  %v4616_v36 = vunpack.i.l.bf16 %v6546_v34  ;;  %v9001_v21 = vld [vmem:[#allocation38_spill] sm:$0xff] }
 0x129   : > { %5169 = vrot.lane.b32.xlu0 %v5168_v37, %s5920_s17  ;;  %v6805_v57 = vpop.permute.xlu1 %4884  ;;  %v4622_v6 = vunpack.i.h.bf16 %v6548_v38  ;;  %v6842_v23 = vsel %vm224_vm0, %v6381_v22, %v4597_v50  ;;  %v6846_v49 = vsel %vm224_vm0, %v9001_v21, %v4596_v20  ;;  %v4627_v27 = vunpack.i.h.bf16 %v6554_v44  ;;  %v9004_v22 = vld [vmem:[#allocation42_spill] sm:$0xff]  ;;  %v9006_v38 = vld [vmem:[#allocation44_spill] sm:$0xff] }
 0x12a   : > { %v6854_v34 = vsel %vm224_vm0, %v9002_v19, %v4602_v25  ;;  %v6862_v17 = vsel %vm224_vm0, %v9004_v22, %v4607_v52  ;;  %v6866_v10 = vsel %vm224_vm0, %v9005_v58, %v4606_v32  ;;  %v6871_v31 = vsel %vm224_vm0, %v9006_v38, %v4612_v63  ;;  %v9007_v25 = vld [vmem:[#allocation43_spill] sm:$0xff]  ;;  %v9008_v52 = vld [vmem:[#allocation46_spill] sm:$0xff]  ;;  %v9009_v32 = vld [vmem:[#allocation45_spill] sm:$0xff] }
 0x12b   : > { %v6813_v28 = vpop.permute.xlu0 %4889  ;;  %5174 = vrot.lane.b32.xlu1 %v5173_v14, %s5920_s17  ;;  %v9003_v14 = vld [vmem:[#allocation39_spill] sm:$0xff]  ;;  %v4626_v47 = vunpack.i.l.bf16 %v6554_v44  ;;  %v4632_v50 = vunpack.i.h.bf16 %v6556_v60  ;;  %v4631_v20 = vunpack.i.l.bf16 %v6556_v60  ;;  %v6888_v63 = vsel %vm224_vm0, %v9009_v32, %v4616_v36  ;;  %v9010_v44 = vld [vmem:[#allocation48_spill] sm:$0xff] }
 0x12c   : > { %v6892_v21 = vsel %vm224_vm0, %v9010_v44, %v4622_v6  ;;  %v9011_v19 = vld [vmem:[#allocation47_spill] sm:$0xff]  ;;  %v4636_v22 = vunpack.i.l.bf16 %v6562_v61  ;;  %v4642_v58 = vunpack.i.h.bf16 %v6564_v40  ;;  %v4641_v6 = vunpack.i.l.bf16 %v6564_v40 }
 0x12d   : > { %5179 = vrot.lane.b32.xlu0 %v5178_v2, %s5919_s16  ;;  %v6838_v37 = vpop.permute.xlu1 %4894  ;;  %v6858_v2 = vsel %vm224_vm0, %v9003_v14, %v4601_v13  ;;  %v6880_v13 = vsel %vm224_vm0, %v9007_v25, %v4611_v26  ;;  %v9012_v26 = vld [vmem:[#allocation50_spill] sm:$0xff]  ;;  %v4647_v38 = vunpack.i.h.bf16 %v6570_v41  ;;  %v4646_v25 = vunpack.i.l.bf16 %v6570_v41 }
 0x12e   : > { %v6902_v14 = vsel %vm224_vm0, %v9012_v26, %v4627_v27  ;;  %v4652_v40 = vunpack.i.h.bf16 %v6572_v46  ;;  %v4651_v32 = vunpack.i.l.bf16 %v6572_v46  ;;  %v4657_v41 = vunpack.i.h.bf16 %v6578_v8 }
 0x12f   : > { %v6850_v12 = vpop.permute.xlu0 %4899  ;;  %5184 = vrot.lane.b32.xlu1 %v5183_v51, %s5919_s16  ;;  %v6884_v51 = vsel %vm224_vm0, %v9008_v52, %v4617_v35  ;;  %v4637_v35 = vunpack.i.h.bf16 %v6562_v61  ;;  %v6919_v52 = vsel %vm224_vm0, %v6457_v11, %v4632_v50  ;;  %v6923_v61 = vsel %vm224_vm0, %v6455_v9, %v4631_v20 }
 0x130   : > { %v4661_v44 = vunpack.i.l.bf16 %v6580_v42  ;;  %v6938_v9 = vsel %vm224_vm0, %v6459_v16, %v4636_v22  ;;  %v4662_v50 = vunpack.i.h.bf16 %v6580_v42  ;;  %v4667_v46 = vunpack.i.h.bf16 %v6588_v59 }
 0x131   : > { %5189 = vrot.lane.b32.xlu0 %v6584_v43, %s5920_s17  ;;  %v6894_v60 = vpop.permute.xlu1 %4904  ;;  %v6898_v43 = vsel %vm224_vm0, %v9011_v19, %v4621_v15  ;;  %v9013_v15 = vld [vmem:[#allocation49_spill] sm:$0xff]  ;;  %v6934_v11 = vsel %vm224_vm0, %v6461_v18, %v4637_v35  ;;  %v6950_v19 = vsel %vm1687_vm4, %v6763_v55, %v4641_v6  ;;  %v6954_v18 = vsel %vm1687_vm4, %v6778_v5, %v4646_v25  ;;  %v9019_v6 = vld [vmem:[#allocation52_spill] sm:$0xff] }
 0x132   : > { %v6915_v27 = vsel %vm224_vm0, %v9013_v15, %v4626_v47  ;;  %v6958_v16 = vsel %vm1687_vm4, %v6782_v7, %v4647_v38  ;;  %v6962_v42 = vsel %vm1687_vm4, %v6774_v45, %v4652_v40  ;;  %v4666_v26 = vunpack.i.l.bf16 %v6588_v59  ;;  %v9020_v25 = vld [vmem:[#allocation53_spill] sm:$0xff] }
 0x133   : > { %v6906_v36 = vpop.permute.xlu0 %4909  ;;  %5194 = vrot.lane.b32.xlu1 %v5193_v48, %s5920_s17  ;;  %v4656_v48 = vunpack.i.l.bf16 %v6578_v8  ;;  %v6946_v8 = vsel %vm1687_vm4, %v6753_v1, %v4642_v58  ;;  %v4672_v1 = vunpack.i.h.bf16 %v6590_v0  ;;  %v4671_v35 = vunpack.i.l.bf16 %v6590_v0 }
 0x134   : > { %v6969_v55 = vsel %vm1687_vm4, %v6770_v39, %v4651_v32  ;;  %v6973_v5 = vsel %vm1687_vm4, %v6791_v53, %v4657_v41  ;;  %v6981_v45 = vsel %vm1687_vm4, %v6803_v56, %v4661_v44  ;;  %v6987_v0 = vsel %vm1687_vm4, %v6799_v30, %v4662_v50  ;;  %v9017_v53 = vld [vmem:[#allocation51_spill] sm:$0xff]  ;;  %v9021_v41 = vld [vmem:[#allocation54_spill] sm:$0xff] }
 0x135   : > { %v6930_v47 = vpop.permute.xlu1 %4914  ;;  %v6977_v7 = vsel %vm1687_vm4, %v6795_v54, %v4656_v48  ;;  %v6991_v39 = vsel %vm1687_vm4, %v6809_v33, %v4667_v46  ;;  %v4677_v22 = vunpack.i.h.bf16 %v9017_v53  ;;  %v4676_v58 = vunpack.i.l.bf16 %v9017_v53  ;;  %v9022_v50 = vld [vmem:[#allocation55_spill] sm:$0xff] }
 0x136   : > { %9014 = vst [vmem:[#allocation38_spill] sm:$0xff] %v6930_v47  ;;  %v4682_v38 = vunpack.i.h.bf16 %v9019_v6  ;;  %v4681_v56 = vunpack.i.l.bf16 %v9019_v6  ;;  %v4687_v15 = vunpack.i.h.bf16 %v9020_v25  ;;  %v4686_v40 = vunpack.i.l.bf16 %v9020_v25  ;;  %v9023_v6 = vld [vmem:[#allocation56_spill] sm:$0xff] }
 0x137   : > { %v6942_v20 = vpop.permute.xlu0 %4919  ;;  %v7003_v30 = vsel %vm1687_vm4, %v6822_v24, %v4666_v26  ;;  %v7007_v33 = vsel %vm1687_vm4, %v6830_v4, %v4671_v35  ;;  %v7011_v32 = vsel %vm1687_vm4, %v6826_v62, %v4672_v1  ;;  %v4691_v48 = vunpack.i.l.bf16 %v9021_v41  ;;  %v9025_v35 = vld [vmem:[#allocation57_spill] sm:$0xff] }
 0x138   : > { %9015 = vst [vmem:[#allocation40_spill] sm:$0xff] %v6942_v20  ;;  %v4692_v44 = vunpack.i.h.bf16 %v9021_v41  ;;  %v4697_v46 = vunpack.i.h.bf16 %v9022_v50  ;;  %v4696_v53 = vunpack.i.l.bf16 %v9022_v50  ;;  %v4701_v24 = vunpack.i.l.bf16 %v9023_v6 }
 0x139   : > { %v6983_v59 = vpop.permute.xlu1 %4924  ;;  %v7022_v4 = vsel %vm1687_vm4, %v6842_v23, %v4677_v22  ;;  %v7026_v62 = vsel %vm1687_vm4, %v6846_v49, %v4676_v58  ;;  %v4702_v1 = vunpack.i.h.bf16 %v9023_v6  ;;  %v4707_v25 = vunpack.i.h.bf16 %v9025_v35 }
 0x13a   : > { %9016 = vst [vmem:[#allocation39_spill] sm:$0xff] %v6983_v59  ;;  %v7034_v50 = vsel %vm1687_vm4, %v6858_v2, %v4681_v56  ;;  %v7042_v23 = vsel %vm1687_vm4, %v6862_v17, %v4687_v15  ;;  %v7046_v49 = vsel %vm1687_vm4, %v6866_v10, %v4686_v40  ;;  %v7050_v22 = vsel %vm1687_vm4, %v6880_v13, %v4691_v48  ;;  %v9027_v2 = vld [vmem:[#allocation58_spill] sm:$0xff]  ;;  %v9044_v59 = vld [vmem:[#allocation72_spill] sm:$0xff] }
 0x13b   : > { %v6995_v54 = vpop.permute.xlu0 %4929  ;;  %v4706_v58 = vunpack.i.l.bf16 %v9025_v35  ;;  %v4712_v56 = vunpack.i.h.bf16 %v9027_v2  ;;  %v4711_v6 = vunpack.i.l.bf16 %v9027_v2  ;;  %v7061_v17 = vsel %vm1687_vm4, %v6884_v51, %v4697_v46  ;;  %v9029_v51 = vld [vmem:[#allocation59_spill] sm:$0xff] }
 0x13c   : > { %9018 = vst [vmem:[#allocation42_spill] sm:$0xff] %v6995_v54  ;;  %v7065_v10 = vsel %vm1687_vm4, %v6888_v63, %v4696_v53  ;;  %v7069_v13 = vsel %vm1687_vm4, %v6898_v43, %v4701_v24  ;;  %v7075_v15 = vsel %vm1687_vm4, %v6892_v21, %v4702_v1  ;;  %v4717_v40 = vunpack.i.h.bf16 %v9029_v51  ;;  %v9032_v53 = vld [vmem:[#allocation61_spill] sm:$0xff] }
 0x13d   : > { %v7018_v26 = vpop.permute.xlu1 %4934  ;;  %v4716_v48 = vunpack.i.l.bf16 %v9029_v51  ;;  %v4727_v24 = vunpack.i.h.bf16 %v9032_v53  ;;  %v4726_v35 = vunpack.i.l.bf16 %v9032_v53  ;;  %v7091_v21 = vsel %vm1687_vm4, %v6915_v27, %v4706_v58 }
 0x13e   : > { %9024 = vst [vmem:[#allocation41_spill] sm:$0xff] %v7018_v26  ;;  %v7038_v26 = vsel %vm1687_vm4, %v6854_v34, %v4682_v38  ;;  %v7057_v34 = vsel %vm1687_vm4, %v6871_v31, %v4692_v44  ;;  %v7079_v31 = vsel %vm1687_vm4, %v6902_v14, %v4707_v25  ;;  %v9031_v44 = vld [vmem:[#allocation60_spill] sm:$0xff]  ;;  %v7095_v14 = vsel %vm1687_vm4, %v6923_v61, %v4711_v6  ;;  %v9033_v25 = vld [vmem:[#allocation62_spill] sm:$0xff] }
 0x13f   : > { %v7030_v41 = vpop.permute.xlu0 %4939  ;;  %v4722_v46 = vunpack.i.h.bf16 %v9031_v44  ;;  %v4721_v43 = vunpack.i.l.bf16 %v9031_v44  ;;  %v7099_v1 = vsel %vm1687_vm4, %v6919_v52, %v4712_v56  ;;  %v4731_v2 = vunpack.i.l.bf16 %v9033_v25  ;;  %v9034_v44 = vld [vmem:[#allocation63_spill] sm:$0xff]  ;;  %v9037_v56 = vld [vmem:[#allocation65_spill] sm:$0xff] }
 0x140   : > { %9026 = vst [vmem:[#allocation44_spill] sm:$0xff] %v7030_v41  ;;  %v4732_v51 = vunpack.i.h.bf16 %v9033_v25  ;;  %v4736_v53 = vunpack.i.l.bf16 %v9034_v44  ;;  %v7110_v61 = vsel %vm1687_vm4, %v6934_v11, %v4717_v40  ;;  %v7114_v52 = vsel %vm1687_vm4, %v6938_v9, %v4716_v48 }
 0x141   : > { %v7071_v38 = vpop.permute.xlu1 %4944  ;;  %v4746_v6 = vunpack.i.l.bf16 %v9037_v56  ;;  %v7130_v11 = vsel %vm1720_vm5, %v6954_v18, %v4726_v35  ;;  %v7134_v9 = vsel %vm1720_vm5, %v6958_v16, %v4727_v24  ;;  %v4747_v40 = vunpack.i.h.bf16 %v9037_v56 }
 0x142   : > { %9028 = vst [vmem:[#allocation43_spill] sm:$0xff] %v7071_v38  ;;  %v9035_v38 = vld [vmem:[#allocation64_spill] sm:$0xff]  ;;  %v7149_v18 = vsel %vm1720_vm5, %v6977_v7, %v4736_v53  ;;  %v9039_v7 = vld [vmem:[#allocation67_spill] sm:$0xff] }
 0x143   : > { %v7083_v63 = vpop.permute.xlu0 %4949  ;;  %v4741_v41 = vunpack.i.l.bf16 %v9035_v38  ;;  %v4742_v58 = vunpack.i.h.bf16 %v9035_v38  ;;  %v7138_v38 = vsel %vm1720_vm5, %v6969_v55, %v4731_v2  ;;  %v4757_v35 = vunpack.i.h.bf16 %v9039_v7 }
 0x144   : > { %9030 = vst [vmem:[#allocation46_spill] sm:$0xff] %v7083_v63  ;;  %v4737_v63 = vunpack.i.h.bf16 %v9034_v44  ;;  %v7122_v44 = vsel %vm1720_vm5, %v6950_v19, %v4721_v43  ;;  %v9038_v19 = vld [vmem:[#allocation66_spill] sm:$0xff]  ;;  %v4756_v2 = vunpack.i.l.bf16 %v9039_v7 }
 0x145   : > { %v7106_v27 = vpop.permute.xlu1 %4954  ;;  %v4752_v48 = vunpack.i.h.bf16 %v9038_v19  ;;  %v4751_v43 = vunpack.i.l.bf16 %v9038_v19  ;;  %v7157_v55 = vsel %vm1720_vm5, %v6981_v45, %v4741_v41  ;;  %v7163_v24 = vsel %vm1720_vm5, %v6987_v0, %v4742_v58  ;;  %v9041_v41 = vld [vmem:[#allocation69_spill] sm:$0xff] }
 0x146   : > { %9036 = vst [vmem:[#allocation45_spill] sm:$0xff] %v7106_v27  ;;  %v7126_v27 = vsel %vm1720_vm5, %v6946_v8, %v4722_v46  ;;  %v7145_v8 = vsel %vm1720_vm5, %v6962_v42, %v4732_v51  ;;  %v7153_v16 = vsel %vm1720_vm5, %v6973_v5, %v4737_v63  ;;  %v7167_v42 = vsel %vm1720_vm5, %v7003_v30, %v4746_v6  ;;  %v9040_v63 = vld [vmem:[#allocation68_spill] sm:$0xff]  ;;  %v9042_v6 = vld [vmem:[#allocation70_spill] sm:$0xff] }
 0x147   : > { %v7118_v25 = vpop.permute.xlu0 %4959  ;;  %v4762_v51 = vunpack.i.h.bf16 %v9040_v63  ;;  %v4761_v45 = vunpack.i.l.bf16 %v9040_v63  ;;  %v4767_v53 = vunpack.i.h.bf16 %v9041_v41  ;;  %v4766_v56 = vunpack.i.l.bf16 %v9041_v41  ;;  %v9043_v63 = vld [vmem:[#allocation71_spill] sm:$0xff] }
 0x148   : > { %v7179_v0 = vsel %vm1720_vm5, %v6991_v39, %v4747_v40  ;;  %v7183_v30 = vsel %vm1720_vm5, %v7007_v33, %v4751_v43  ;;  %v7187_v58 = vsel %vm1720_vm5, %v7011_v32, %v4752_v48  ;;  %v4771_v19 = vunpack.i.l.bf16 %v9042_v6  ;;  %v9045_v43 = vld [vmem:[#allocation73_spill] sm:$0xff] }
 0x149   : > { %v7159_v46 = vpop.permute.xlu1 %4964  ;;  %v4772_v7 = vunpack.i.h.bf16 %v9042_v6  ;;  %v4777_v54 = vunpack.i.h.bf16 %v9043_v63  ;;  %v4776_v41 = vunpack.i.l.bf16 %v9043_v63  ;;  %v4781_v39 = vunpack.i.l.bf16 %v9044_v59 }
 0x14a   : > { %v7198_v33 = vsel %vm1720_vm5, %v7026_v62, %v4756_v2  ;;  %v7202_v32 = vsel %vm1720_vm5, %v7022_v4, %v4757_v35  ;;  %v4782_v48 = vunpack.i.h.bf16 %v9044_v59  ;;  %v4786_v6 = vunpack.i.l.bf16 %v9045_v43 }
 0x14b   : > { %v7171_v5 = vpop.permute.xlu0 %4969  ;;  %v7210_v63 = vsel %vm1720_vm5, %v7034_v50, %v4761_v45  ;;  %v7214_v47 = vsel %vm1720_vm5, %v7038_v26, %v4762_v51  ;;  %v7218_v62 = vsel %vm1720_vm5, %v7046_v49, %v4766_v56  ;;  %v7222_v4 = vsel %vm1720_vm5, %v7042_v23, %v4767_v53  ;;  %v9047_v50 = vld [vmem:[#allocation74_spill] sm:$0xff] }
 0x14c   : > { %v7226_v59 = vsel %vm1720_vm5, %v7050_v22, %v4771_v19  ;;  %v4787_v35 = vunpack.i.h.bf16 %v9045_v43  ;;  %v4792_v2 = vunpack.i.h.bf16 %v9047_v50  ;;  %v4791_v45 = vunpack.i.l.bf16 %v9047_v50 }
 0x14d   : > { %v7194_v40 = vpop.permute.xlu1 %4974  ;;  %v7233_v26 = vsel %vm1720_vm5, %v7057_v34, %v4772_v7  ;;  %v7237_v49 = vsel %vm1720_vm5, %v7065_v10, %v4776_v41  ;;  %v7241_v23 = vsel %vm1720_vm5, %v7061_v17, %v4777_v54  ;;  %v7245_v22 = vsel %vm1720_vm5, %v7069_v13, %v4781_v39  ;;  %v9049_v10 = vld [vmem:[#allocation75_spill] sm:$0xff]  ;;  %v9051_v17 = vld [vmem:[#allocation76_spill] sm:$0xff]  ;;  %v9052_v41 = vld [vmem:[#allocation77_spill] sm:$0xff] }
 0x14e   : > { %v7251_v53 = vsel %vm1720_vm5, %v7075_v15, %v4782_v48  ;;  %v7255_v34 = vsel %vm1720_vm5, %v7091_v21, %v4786_v6  ;;  %v4797_v56 = vunpack.i.h.bf16 %v9049_v10  ;;  %v4796_v19 = vunpack.i.l.bf16 %v9049_v10  ;;  %v9053_v6 = vld [vmem:[#allocation78_spill] sm:$0xff] }
 0x14f   : > { %v7206_v20 = vpop.permute.xlu0 %4979  ;;  %v4802_v7 = vunpack.i.h.bf16 %v9051_v17  ;;  %v4801_v13 = vunpack.i.l.bf16 %v9051_v17  ;;  %v4807_v39 = vunpack.i.h.bf16 %v9052_v41  ;;  %v4806_v43 = vunpack.i.l.bf16 %v9052_v41  ;;  %v9054_v17 = vld [vmem:[#allocation79_spill] sm:$0xff] }
 0x150   : > { %9046 = vst [vmem:[#allocation48_spill] sm:$0xff] %v7206_v20  ;;  %v7267_v15 = vsel %vm1720_vm5, %v7079_v31, %v4787_v35  ;;  %v7271_v21 = vsel %vm1720_vm5, %v7095_v14, %v4791_v45  ;;  %v7275_v48 = vsel %vm1720_vm5, %v7099_v1, %v4792_v2  ;;  %v4811_v50 = vunpack.i.l.bf16 %v9053_v6  ;;  %v9059_v2 = vld [vmem:[#allocation81_spill] sm:$0xff] }
 0x151   : > { %v7247_v51 = vpop.permute.xlu1 %4984  ;;  %v4812_v10 = vunpack.i.h.bf16 %v9053_v6  ;;  %v4816_v41 = vunpack.i.l.bf16 %v9054_v17  ;;  %v7286_v14 = vsel %vm1720_vm5, %v7114_v52, %v4796_v19  ;;  %v7290_v1 = vsel %vm1720_vm5, %v7110_v61, %v4797_v56 }
 0x152   : > { %9048 = vst [vmem:[#allocation47_spill] sm:$0xff] %v7247_v51  ;;  %v9055_v51 = vld [vmem:[#allocation80_spill] sm:$0xff]  ;;  %9057 = vst [vmem:[#allocation51_spill] sm:$0xff] %v7286_v14  ;;  %v4826_v45 = vunpack.i.l.bf16 %v9059_v2  ;;  %v7306_v52 = vsel %vm1753_vm6, %v7130_v11, %v4806_v43  ;;  %v7310_v61 = vsel %vm1753_vm6, %v7134_v9, %v4807_v39  ;;  %v4827_v56 = vunpack.i.h.bf16 %v9059_v2 }
 0x153   : > { %v7259_v54 = vpop.permute.xlu0 %4989  ;;  %v4821_v20 = vunpack.i.l.bf16 %v9055_v51  ;;  %9058 = vst [vmem:[#allocation52_spill] sm:$0xff] %v7290_v1  ;;  %v4822_v35 = vunpack.i.h.bf16 %v9055_v51  ;;  %v7314_v51 = vsel %vm1753_vm6, %v7138_v38, %v4811_v50  ;;  %v7325_v11 = vsel %vm1753_vm6, %v7149_v18, %v4816_v41  ;;  %v9061_v18 = vld [vmem:[#allocation83_spill] sm:$0xff]  ;;  %v9067_v14 = vld [vmem:[#allocation88_spill] sm:$0xff] }
 0x154   : > { %9050 = vst [vmem:[#allocation50_spill] sm:$0xff] %v7259_v54  ;;  %v4817_v54 = vunpack.i.h.bf16 %v9054_v17  ;;  %v7298_v17 = vsel %vm1753_vm6, %v7122_v44, %v4801_v13  ;;  %v9060_v44 = vld [vmem:[#allocation82_spill] sm:$0xff]  ;;  %v4837_v43 = vunpack.i.h.bf16 %v9061_v18  ;;  %v4836_v50 = vunpack.i.l.bf16 %v9061_v18 }
 0x155   : > { %v7282_v31 = vpop.permute.xlu1 %4994  ;;  %v4832_v19 = vunpack.i.h.bf16 %v9060_v44  ;;  %v4831_v13 = vunpack.i.l.bf16 %v9060_v44  ;;  %v7333_v38 = vsel %vm1753_vm6, %v7157_v55, %v4821_v20  ;;  %v7339_v39 = vsel %vm1753_vm6, %v7163_v24, %v4822_v35  ;;  %v9064_v55 = vld [vmem:[#allocation85_spill] sm:$0xff] }
 0x156   : > { %9056 = vst [vmem:[#allocation49_spill] sm:$0xff] %v7282_v31  ;;  %v7302_v31 = vsel %vm1753_vm6, %v7126_v27, %v4802_v7  ;;  %v7321_v27 = vsel %vm1753_vm6, %v7145_v8, %v4812_v10  ;;  %v7329_v9 = vsel %vm1753_vm6, %v7153_v16, %v4817_v54  ;;  %v7343_v8 = vsel %vm1753_vm6, %v7167_v42, %v4826_v45  ;;  %v9063_v54 = vld [vmem:[#allocation84_spill] sm:$0xff]  ;;  %v9065_v45 = vld [vmem:[#allocation86_spill] sm:$0xff] }
 0x157   : > { %v7294_v6 = vpop.permute.xlu0 %4999  ;;  %v4842_v10 = vunpack.i.h.bf16 %v9063_v54  ;;  %v4841_v20 = vunpack.i.l.bf16 %v9063_v54  ;;  %v4847_v41 = vunpack.i.h.bf16 %v9064_v55  ;;  %v4846_v2 = vunpack.i.l.bf16 %v9064_v55  ;;  %v9066_v54 = vld [vmem:[#allocation87_spill] sm:$0xff] }
 0x158   : > { %v7355_v24 = vsel %vm1753_vm6, %v7179_v0, %v4827_v56  ;;  %v7359_v42 = vsel %vm1753_vm6, %v7183_v30, %v4831_v13  ;;  %v7363_v35 = vsel %vm1753_vm6, %v7187_v58, %v4832_v19  ;;  %v4851_v44 = vunpack.i.l.bf16 %v9065_v45  ;;  %v9069_v19 = vld [vmem:[#allocation89_spill] sm:$0xff] }
 0x159   : > { %v7335_v7 = vpop.permute.xlu1 %5004  ;;  %v4852_v18 = vunpack.i.h.bf16 %v9065_v45  ;;  %v4857_v1 = vunpack.i.h.bf16 %v9066_v54  ;;  %v4856_v55 = vunpack.i.l.bf16 %v9066_v54  ;;  %v7374_v30 = vsel %vm1753_vm6, %v7198_v33, %v4836_v50 }
 0x15a   : > { %v7378_v58 = vsel %vm1753_vm6, %v7202_v32, %v4837_v43  ;;  %v4862_v56 = vunpack.i.h.bf16 %v9067_v14  ;;  %v4866_v13 = vunpack.i.l.bf16 %v9069_v19  ;;  %v7386_v54 = vsel %vm1753_vm6, %v7210_v63, %v4841_v20  ;;  %v9070_v43 = vld [vmem:[#allocation90_spill] sm:$0xff] }
 0x15b   : > { %v7347_v16 = vpop.permute.xlu0 %5009  ;;  %v7394_v33 = vsel %vm1753_vm6, %v7218_v62, %v4846_v2  ;;  %v7398_v32 = vsel %vm1753_vm6, %v7222_v4, %v4847_v41  ;;  %v4867_v63 = vunpack.i.h.bf16 %v9069_v19  ;;  %v4872_v50 = vunpack.i.h.bf16 %v9070_v43 }
 0x15c   : > { %9062 = vst [vmem:[#allocation53_spill] sm:$0xff] %v7347_v16  ;;  %v4861_v16 = vunpack.i.l.bf16 %v9067_v14  ;;  %v7402_v14 = vsel %vm1753_vm6, %v7226_v59, %v4851_v44  ;;  %v7413_v62 = vsel %vm1753_vm6, %v7237_v49, %v4856_v55  ;;  %v7417_v4 = vsel %vm1753_vm6, %v7241_v23, %v4857_v1 }
 0x15d   : > { %v7370_v0 = vpop.permute.xlu1 %5014  ;;  %v7427_v41 = vsel %vm1753_vm6, %v7251_v53, %v4862_v56  ;;  %v4882_v49 = vunpack.i.h.bf16 %v6766_v3  ;;  %v4881_v23 = vunpack.i.l.bf16 %v6766_v3  ;;  %v4892_v2 = vunpack.i.h.bf16 %v6813_v28 }
 0x15e   : > { %9068 = vst [vmem:[#allocation54_spill] sm:$0xff] %v7370_v0  ;;  %v7390_v0 = vsel %vm1753_vm6, %v7214_v47, %v4842_v10  ;;  %v4871_v47 = vunpack.i.l.bf16 %v9070_v43  ;;  %v7409_v10 = vsel %vm1753_vm6, %v7233_v26, %v4852_v18  ;;  %v7421_v59 = vsel %vm1753_vm6, %v7245_v22, %v4861_v16 }
 0x15f   : > { %v7382_v45 = vpop.permute.xlu0 %5019  ;;  %v7431_v26 = vsel %vm1753_vm6, %v7255_v34, %v4866_v13  ;;  %v4887_v22 = vunpack.i.h.bf16 %v6805_v57  ;;  %v4886_v16 = vunpack.i.l.bf16 %v6805_v57  ;;  %v4891_v53 = vunpack.i.l.bf16 %v6813_v28 }
 0x160   : > { %v7443_v44 = vsel %vm1753_vm6, %v7267_v15, %v4867_v63  ;;  %v7447_v34 = vsel %vm1753_vm6, %v7271_v21, %v4871_v47  ;;  %v7451_v3 = vsel %vm1753_vm6, %v7275_v48, %v4872_v50  ;;  %v4896_v18 = vunpack.i.l.bf16 %v6838_v37 }
 0x161   : > { %v7423_v20 = vpop.permute.xlu1 %5024  ;;  %v4897_v28 = vunpack.i.h.bf16 %v6838_v37  ;;  %v4901_v56 = vunpack.i.l.bf16 %v6850_v12  ;;  %v1787_v21 = vsel %vm1786_vm7, %v7298_v17, %v4881_v23  ;;  %v1788_v48 = vsel %vm1786_vm7, %v7302_v31, %v4882_v49 }
 0x162   : > { %v4962_v19 = vunpack.i.h.bf16 %v7118_v25  ;;  %v4961_v13 = vunpack.i.l.bf16 %v7118_v25  ;;  %v1789_v43 = vsel %vm1786_vm7, %v7306_v52, %v4886_v16  ;;  %v1790_v37 = vsel %vm1786_vm7, %v7310_v61, %v4887_v22 }
 0x163   : > { %v7435_v1 = vpop.permute.xlu0 %5029  ;;  %v1791_v50 = vsel %vm1786_vm7, %v7314_v51, %v4891_v53  ;;  %v1792_v17 = vsel %vm1786_vm7, %v7321_v27, %v4892_v2  ;;  %v1793_v31 = vsel %vm1786_vm7, %v7325_v11, %v4896_v18  ;;  %v4902_v47 = vunpack.i.h.bf16 %v6850_v12 }
 0x164   : > { %v1794_v23 = vsel %vm1786_vm7, %v7329_v9, %v4897_v28  ;;  %v7481_v52 = vsel %vm1786_vm7, %v7333_v38, %v4901_v56  ;;  %v4907_v61 = vunpack.i.h.bf16 %v6894_v60  ;;  %v4966_v51 = vunpack.i.l.bf16 %v7159_v46 }
 0x165   : > { %v7458_v15 = vpop.permute.xlu1 %5034  ;;  %v4906_v27 = vunpack.i.l.bf16 %v6894_v60  ;;  %v4967_v11 = vunpack.i.h.bf16 %v7159_v46  ;;  %v1820_v12 = vsel %vm1819_vm8, %v1787_v21, %v4961_v13  ;;  %v1821_v2 = vsel %vm1819_vm8, %v1788_v48, %v4962_v19 }
 0x166   : > { %v4911_v38 = vunpack.i.l.bf16 %v6906_v36  ;;  %v4972_v56 = vunpack.i.h.bf16 %v7171_v5  ;;  %v1822_v60 = vsel %vm1819_vm8, %v1789_v43, %v4966_v51  ;;  %v4971_v46 = vunpack.i.l.bf16 %v7171_v5 }
 0x167   : > { %v5040_v63 = vpop.permute.xlu0 %5039  ;;  %v1823_v19 = vsel %vm1819_vm8, %v1790_v37, %v4967_v11 }
 0x168   : > { %v5042_v49 = vunpack.i.h.bf16 %v5040_v63  ;;  %v5041_v25 = vunpack.i.l.bf16 %v5040_v63  ;;  %v7513_v11 = vsel %vm1786_vm7, %v7359_v42, %v4911_v38 }
 0x169   : > { %v5045_v22 = vpop.permute.xlu1 %5044 }
 0x16a   : > { %v5047_v53 = vunpack.i.h.bf16 %v5045_v22  ;;  %v5046_v9 = vunpack.i.l.bf16 %v5045_v22  ;;  %v1853_v63 = vsel %vm1852_vm9, %v1820_v12, %v5041_v25  ;;  %v1854_v57 = vsel %vm1852_vm9, %v1821_v2, %v5042_v49 }
 0x16b   : > { %v5050_v16 = vpop.permute.xlu0 %5049  ;;  %v1796_v25 = vsel %vm1786_vm7, %v7339_v39, %v4902_v47  ;;  %v4912_v49 = vunpack.i.h.bf16 %v6906_v36  ;;  %v1798_v39 = vsel %vm1786_vm7, %v7355_v24, %v4907_v61  ;;  %v4976_v36 = vunpack.i.l.bf16 %v7194_v40  ;;  %v9071_v24 = vld [vmem:[#allocation38_spill] sm:$0xff] }
 0x16c   : > { %v5052_v18 = vunpack.i.h.bf16 %v5050_v16  ;;  %v5051_v28 = vunpack.i.l.bf16 %v5050_v16  ;;  %v1855_v43 = vsel %vm1852_vm9, %v1822_v60, %v5046_v9  ;;  %v1856_v5 = vsel %vm1852_vm9, %v1823_v19, %v5047_v53  ;;  %v9072_v60 = vld [vmem:[#allocation48_spill] sm:$0xff] }
 0x16d   : > { %v5055_v55 = vpop.permute.xlu1 %5054  ;;  %v1824_v53 = vsel %vm1819_vm8, %v1791_v50, %v4971_v46  ;;  %v1825_v9 = vsel %vm1819_vm8, %v1792_v17, %v4972_v56  ;;  %v4916_v61 = vunpack.i.l.bf16 %v9071_v24  ;;  %v1826_v50 = vsel %vm1819_vm8, %v1793_v31, %v4976_v36 }
 0x16e   : > { %v1886_v21 = vsel %vm1885_vm10, %v1853_v63, %v5051_v28  ;;  %v1887_v48 = vsel %vm1885_vm10, %v1854_v57, %v5052_v18  ;;  %v5057_v13 = vunpack.i.h.bf16 %v5055_v55  ;;  %v5056_v22 = vunpack.i.l.bf16 %v5055_v55 }
 0x16f   : > { %v5060_v16 = vpop.permute.xlu0 %5059  ;;  %v1918_v29 = vpack.c.bf16 %v1887_v48, %v1886_v21  ;;  %v1797_v55 = vsel %vm1786_vm7, %v7343_v8, %v4906_v27  ;;  %v4982_v21 = vunpack.i.h.bf16 %v9072_v60  ;;  %v4981_v17 = vunpack.i.l.bf16 %v9072_v60 }
 0x170   : > { %v1888_v51 = vsel %vm1885_vm10, %v1855_v43, %v5056_v22  ;;  %v1889_v12 = vsel %vm1885_vm10, %v1856_v5, %v5057_v13  ;;  %v5062_v57 = vunpack.i.h.bf16 %v5060_v16  ;;  %v5061_v2 = vunpack.i.l.bf16 %v5060_v16 }
 0x171   : > { %4433 = vmatprep.mubr.msk.bf16.mxu0 %vm1970_vm11, %v1918_v29  ;;  %v5065_v37 = vpop.permute.xlu1 %5064  ;;  %v1919_v47 = vpack.c.bf16 %v1889_v12, %v1888_v51  ;;  %v4977_v29 = vunpack.i.h.bf16 %v7194_v40  ;;  %v1800_v43 = vsel %vm1786_vm7, %v7363_v35, %v4912_v49  ;;  %v4917_v5 = vunpack.i.h.bf16 %v9071_v24 }
 0x172   : > { %v5067_v28 = vunpack.i.h.bf16 %v5065_v37  ;;  %v5066_v8 = vunpack.i.l.bf16 %v5065_v37  ;;  %v1857_v42 = vsel %vm1852_vm9, %v1824_v53, %v5061_v2  ;;  %v1858_v38 = vsel %vm1852_vm9, %v1825_v9, %v5062_v57  ;;  %v9074_v53 = vld [vmem:[#allocation47_spill] sm:$0xff] }
 0x173   : > { %v5070_v18 = vpop.permute.xlu0 %5069  ;;  %4434 = vmatmul.mubr.msk.bf16.vlgmr.msra.gmra.mrb[0].mxu0 %vm1970_vm11, %v1919_v47  ;;  %v1827_v48 = vsel %vm1819_vm8, %v1794_v23, %v4977_v29  ;;  %v9073_v23 = vld [vmem:[#allocation40_spill] sm:$0xff]  ;;  %v4986_v35 = vunpack.i.l.bf16 %v9074_v53  ;;  %v1801_v29 = vsel %vm1786_vm7, %v7374_v30, %v4916_v61 }
 0x174   : > { %v5072_v27 = vunpack.i.h.bf16 %v5070_v18  ;;  %v5071_v63 = vunpack.i.l.bf16 %v5070_v18  ;;  %v1859_v31 = vsel %vm1852_vm9, %v1826_v50, %v5066_v8  ;;  %v1860_v51 = vsel %vm1852_vm9, %v1827_v48, %v5067_v28  ;;  %v9075_v50 = vld [vmem:[#allocation50_spill] sm:$0xff] }
 0x175   : > { %v5075_v46 = vpop.permute.xlu1 %5074  ;;  %v4922_v37 = vunpack.i.h.bf16 %v9073_v23  ;;  %v4921_v47 = vunpack.i.l.bf16 %v9073_v23  ;;  %v1828_v18 = vsel %vm1819_vm8, %v7481_v52, %v4981_v17  ;;  %v1829_v28 = vsel %vm1819_vm8, %v1796_v25, %v4982_v21 }
 0x176   : > { %v1890_v40 = vsel %vm1885_vm10, %v1857_v42, %v5071_v63  ;;  %v1891_v56 = vsel %vm1885_vm10, %v1858_v38, %v5072_v27  ;;  %v5077_v19 = vunpack.i.h.bf16 %v5075_v46  ;;  %v5076_v13 = vunpack.i.l.bf16 %v5075_v46 }
 0x177   : > { %v5080_v22 = vpop.permute.xlu0 %5079  ;;  %v1920_v16 = vpack.c.bf16 %v1891_v56, %v1890_v40  ;;  %v4987_v8 = vunpack.i.h.bf16 %v9074_v53  ;;  %v1802_v38 = vsel %vm1786_vm7, %v7378_v58, %v4917_v5  ;;  %v4992_v40 = vunpack.i.h.bf16 %v9075_v50 }
 0x178   : > { %v1892_v12 = vsel %vm1885_vm10, %v1859_v31, %v5076_v13  ;;  %v1893_v57 = vsel %vm1885_vm10, %v1860_v51, %v5077_v19  ;;  %v5082_v2 = vunpack.i.h.bf16 %v5080_v22  ;;  %v5081_v36 = vunpack.i.l.bf16 %v5080_v22 }
 0x179   : > { %4437 = vmatprep.mubr.msk.bf16.mxu0 %vm1970_vm11, %v1920_v16  ;;  %v5085_v49 = vpop.permute.xlu1 %5084  ;;  %v1921_v9 = vpack.c.bf16 %v1893_v57, %v1892_v12  ;;  %v1830_v25 = vsel %vm1819_vm8, %v1797_v55, %v4986_v35  ;;  %v4991_v61 = vunpack.i.l.bf16 %v9075_v50  ;;  %v1831_v46 = vsel %vm1819_vm8, %v1798_v39, %v4987_v8  ;;  %v9076_v57 = vld [vmem:[#allocation39_spill] sm:$0xff] }
 0x17a   : > { %v5087_v63 = vunpack.i.h.bf16 %v5085_v49  ;;  %v5086_v24 = vunpack.i.l.bf16 %v5085_v49  ;;  %v1861_v30 = vsel %vm1852_vm9, %v1828_v18, %v5081_v36  ;;  %v1862_v52 = vsel %vm1852_vm9, %v1829_v28, %v5082_v2 }
 0x17b   : > { %v5090_v27 = vpop.permute.xlu0 %5089  ;;  %4438 = vmatmul.mubr.msk.bf16.gmra.mrb[4].mxu0 %vm1970_vm11, %v1921_v9  ;;  %v1803_v22 = vsel %vm1786_vm7, %v7386_v54, %v4921_v47  ;;  %v1804_v16 = vsel %vm1786_vm7, %v7390_v0, %v4922_v37  ;;  %v4927_v2 = vunpack.i.h.bf16 %v9076_v57  ;;  %v4926_v36 = vunpack.i.l.bf16 %v9076_v57  ;;  %v9077_v54 = vld [vmem:[#allocation49_spill] sm:$0xff]  ;;  %v9078_v37 = vld [vmem:[#allocation42_spill] sm:$0xff] }
 0x17c   : > { %v5092_v60 = vunpack.i.h.bf16 %v5090_v27  ;;  %v5091_v42 = vunpack.i.l.bf16 %v5090_v27  ;;  %v1863_v55 = vsel %vm1852_vm9, %v1830_v25, %v5086_v24  ;;  %v1864_v5 = vsel %vm1852_vm9, %v1831_v46, %v5087_v63 }
 0x17d   : > { %v5095_v56 = vpop.permute.xlu1 %5094  ;;  %v4996_v23 = vunpack.i.l.bf16 %v9077_v54  ;;  %v4932_v53 = vunpack.i.h.bf16 %v9078_v37  ;;  %v1832_v35 = vsel %vm1819_vm8, %v7513_v11, %v4991_v61  ;;  %v1833_v49 = vsel %vm1819_vm8, %v1800_v43, %v4992_v40 }
 0x17e   : > { %v1894_v21 = vsel %vm1885_vm10, %v1861_v30, %v5091_v42  ;;  %v1895_v17 = vsel %vm1885_vm10, %v1862_v52, %v5092_v60  ;;  %v5097_v48 = vunpack.i.h.bf16 %v5095_v56  ;;  %v5096_v19 = vunpack.i.l.bf16 %v5095_v56 }
 0x17f   : > { %v5100_v58 = vpop.permute.xlu0 %5099  ;;  %v1922_v13 = vpack.c.bf16 %v1895_v17, %v1894_v21  ;;  %v4997_v9 = vunpack.i.h.bf16 %v9077_v54  ;;  %v4931_v24 = vunpack.i.l.bf16 %v9078_v37  ;;  %v5002_v60 = vunpack.i.h.bf16 %v7294_v6 }
 0x180   : > { %v1896_v31 = vsel %vm1885_vm10, %v1863_v55, %v5096_v19  ;;  %v1897_v51 = vsel %vm1885_vm10, %v1864_v5, %v5097_v48  ;;  %v5102_v12 = vunpack.i.h.bf16 %v5100_v58  ;;  %v5101_v39 = vunpack.i.l.bf16 %v5100_v58  ;;  %v9079_v5 = vld [vmem:[#allocation41_spill] sm:$0xff] }
 0x181   : > { %4441 = vmatprep.mubr.msk.bf16.mxu0 %vm1970_vm11, %v1922_v13  ;;  %v5105_v47 = vpop.permute.xlu1 %5104  ;;  %v1923_v0 = vpack.c.bf16 %v1897_v51, %v1896_v31  ;;  %v1834_v11 = vsel %vm1819_vm8, %v1801_v29, %v4996_v23  ;;  %v5001_v43 = vunpack.i.l.bf16 %v7294_v6  ;;  %v1835_v25 = vsel %vm1819_vm8, %v1802_v38, %v4997_v9 }
 0x182   : > { %v5107_v28 = vunpack.i.h.bf16 %v5105_v47  ;;  %v5106_v8 = vunpack.i.l.bf16 %v5105_v47  ;;  %v1865_v42 = vsel %vm1852_vm9, %v1832_v35, %v5101_v39  ;;  %v1866_v50 = vsel %vm1852_vm9, %v1833_v49, %v5102_v12  ;;  %v9081_v49 = vld [vmem:[#allocation53_spill] sm:$0xff] }
 0x183   : > { %v5110_v18 = vpop.permute.xlu0 %5109  ;;  %4442 = vmatmul.mubr.msk.bf16.gmra.mrb[8].mxu0 %vm1970_vm11, %v1923_v0  ;;  %v1805_v46 = vsel %vm1786_vm7, %v7394_v33, %v4926_v36  ;;  %v1806_v48 = vsel %vm1786_vm7, %v7398_v32, %v4927_v2  ;;  %v1807_v55 = vsel %vm1786_vm7, %v7402_v14, %v4931_v24  ;;  %v4937_v33 = vunpack.i.h.bf16 %v9079_v5  ;;  %v9080_v14 = vld [vmem:[#allocation44_spill] sm:$0xff] }
 0x184   : > { %v5112_v27 = vunpack.i.h.bf16 %v5110_v18  ;;  %v5111_v63 = vunpack.i.l.bf16 %v5110_v18  ;;  %v1867_v29 = vsel %vm1852_vm9, %v1834_v11, %v5106_v8  ;;  %v1868_v6 = vsel %vm1852_vm9, %v1835_v25, %v5107_v28 }
 0x185   : > { %v5115_v52 = vpop.permute.xlu1 %5114  ;;  %v5006_v31 = vunpack.i.l.bf16 %v7335_v7  ;;  %v4936_v12 = vunpack.i.l.bf16 %v9079_v5  ;;  %v1836_v39 = vsel %vm1819_vm8, %v1803_v22, %v5001_v43  ;;  %v1837_v57 = vsel %vm1819_vm8, %v1804_v16, %v5002_v60 }
 0x186   : > { %v1898_v40 = vsel %vm1885_vm10, %v1865_v42, %v5111_v63  ;;  %v1899_v30 = vsel %vm1885_vm10, %v1866_v50, %v5112_v27  ;;  %v5117_v61 = vunpack.i.h.bf16 %v5115_v52  ;;  %v5116_v21 = vunpack.i.l.bf16 %v5115_v52 }
 0x187   : > { %v5120_v17 = vpop.permute.xlu0 %5119  ;;  %v1924_v56 = vpack.c.bf16 %v1899_v30, %v1898_v40  ;;  %v5007_v2 = vunpack.i.h.bf16 %v7335_v7  ;;  %v4941_v35 = vunpack.i.l.bf16 %v9080_v14  ;;  %v5012_v9 = vunpack.i.h.bf16 %v9081_v49 }
 0x188   : > { %v1900_v19 = vsel %vm1885_vm10, %v1867_v29, %v5116_v21  ;;  %v1901_v58 = vsel %vm1885_vm10, %v1868_v6, %v5117_v61  ;;  %v5122_v13 = vunpack.i.h.bf16 %v5120_v17  ;;  %v5121_v38 = vunpack.i.l.bf16 %v5120_v17 }
 0x189   : > { %4445 = vmatprep.mubr.msk.bf16.mxu0 %vm1970_vm11, %v1924_v56  ;;  %v5125_v32 = vpop.permute.xlu1 %5124  ;;  %v1925_v51 = vpack.c.bf16 %v1901_v58, %v1900_v19  ;;  %v1838_v22 = vsel %vm1819_vm8, %v1805_v46, %v5006_v31  ;;  %v5011_v16 = vunpack.i.l.bf16 %v9081_v49  ;;  %v1839_v63 = vsel %vm1819_vm8, %v1806_v48, %v5007_v2 }
 0x18a   : > { %v5127_v54 = vunpack.i.h.bf16 %v5125_v32  ;;  %v5126_v23 = vunpack.i.l.bf16 %v5125_v32  ;;  %v1869_v18 = vsel %vm1852_vm9, %v1836_v39, %v5121_v38  ;;  %v1870_v28 = vsel %vm1852_vm9, %v1837_v57, %v5122_v13 }
 0x18b   : > { %v5130_v36 = vpop.permute.xlu0 %5129  ;;  %4446 = vmatmul.mubr.msk.bf16.gmra.mrb[12].mxu0 %vm1970_vm11, %v1925_v51  ;;  %v1808_v11 = vsel %vm1786_vm7, %v7409_v10, %v4932_v53  ;;  %v4942_v43 = vunpack.i.h.bf16 %v9080_v14  ;;  %v1809_v37 = vsel %vm1786_vm7, %v7413_v62, %v4936_v12  ;;  %v1810_v10 = vsel %vm1786_vm7, %v7417_v4, %v4937_v33  ;;  %v9082_v53 = vld [vmem:[#allocation54_spill] sm:$0xff]  ;;  %v9083_v4 = vld [vmem:[#allocation43_spill] sm:$0xff] }
 0x18c   : > { %v5132_v47 = vunpack.i.h.bf16 %v5130_v36  ;;  %v5131_v0 = vunpack.i.l.bf16 %v5130_v36  ;;  %v1871_v40 = vsel %vm1852_vm9, %v1838_v22, %v5126_v23  ;;  %v1872_v30 = vsel %vm1852_vm9, %v1839_v63, %v5127_v54  ;;  %v9084_v22 = vld [vmem:[#allocation46_spill] sm:$0xff] }
 0x18d   : > { %v5135_v27 = vpop.permute.xlu1 %5134  ;;  %v5016_v17 = vunpack.i.l.bf16 %v9082_v53  ;;  %v1811_v48 = vsel %vm1786_vm7, %v7421_v59, %v4941_v35  ;;  %v1840_v29 = vsel %vm1819_vm8, %v1807_v55, %v5011_v16  ;;  %v1841_v6 = vsel %vm1819_vm8, %v1808_v11, %v5012_v9 }
 0x18e   : > { %v1902_v7 = vsel %vm1885_vm10, %v1869_v18, %v5131_v0  ;;  %v1903_v8 = vsel %vm1885_vm10, %v1870_v28, %v5132_v47  ;;  %v5137_v24 = vunpack.i.h.bf16 %v5135_v27  ;;  %v5136_v60 = vunpack.i.l.bf16 %v5135_v27 }
 0x18f   : > { %v5140_v42 = vpop.permute.xlu0 %5139  ;;  %v1926_v50 = vpack.c.bf16 %v1903_v8, %v1902_v7  ;;  %v5017_v19 = vunpack.i.h.bf16 %v9082_v53  ;;  %v4946_v33 = vunpack.i.l.bf16 %v9083_v4  ;;  %v5022_v31 = vunpack.i.h.bf16 %v7382_v45 }
 0x190   : > { %v1904_v52 = vsel %vm1885_vm10, %v1871_v40, %v5136_v60  ;;  %v1905_v25 = vsel %vm1885_vm10, %v1872_v30, %v5137_v24  ;;  %v5142_v61 = vunpack.i.h.bf16 %v5140_v42  ;;  %v5141_v21 = vunpack.i.l.bf16 %v5140_v42 }
 0x191   : > { %4449 = vmatprep.mubr.msk.bf16.mxu0 %vm1970_vm11, %v1926_v50  ;;  %v5145_v56 = vpop.permute.xlu1 %5144  ;;  %v1927_v46 = vpack.c.bf16 %v1905_v25, %v1904_v52  ;;  %v1842_v55 = vsel %vm1819_vm8, %v1809_v37, %v5016_v17  ;;  %v5021_v51 = vunpack.i.l.bf16 %v7382_v45  ;;  %v1843_v2 = vsel %vm1819_vm8, %v1810_v10, %v5017_v19 }
 0x192   : > { %v5147_v13 = vunpack.i.h.bf16 %v5145_v56  ;;  %v5146_v38 = vunpack.i.l.bf16 %v5145_v56  ;;  %v1873_v32 = vsel %vm1852_vm9, %v1840_v29, %v5141_v21  ;;  %v1874_v59 = vsel %vm1852_vm9, %v1841_v6, %v5142_v61  ;;  %v9085_v6 = vld [vmem:[#allocation45_spill] sm:$0xff] }
 0x193   : > { %v5150_v58 = vpop.permute.xlu0 %5149  ;;  %4450 = vmatmul.mubr.msk.bf16.gmra.mrb[16].mxu0 %vm1970_vm11, %v1927_v46  ;;  %v1812_v0 = vsel %vm1786_vm7, %v7427_v41, %v4942_v43  ;;  %v4947_v14 = vunpack.i.h.bf16 %v9083_v4  ;;  %v4952_v16 = vunpack.i.h.bf16 %v9084_v22  ;;  %v4951_v7 = vunpack.i.l.bf16 %v9084_v22 }
 0x194   : > { %v5152_v62 = vunpack.i.h.bf16 %v5150_v58  ;;  %v5151_v5 = vunpack.i.l.bf16 %v5150_v58  ;;  %v1875_v35 = vsel %vm1852_vm9, %v1842_v55, %v5146_v38  ;;  %v1876_v45 = vsel %vm1852_vm9, %v1843_v2, %v5147_v13 }
 0x195   : > { %v5155_v57 = vpop.permute.xlu1 %5154  ;;  %v5026_v41 = vunpack.i.l.bf16 %v7423_v20  ;;  %v1813_v63 = vsel %vm1786_vm7, %v7431_v26, %v4946_v33  ;;  %v1844_v24 = vsel %vm1819_vm8, %v1811_v48, %v5021_v51  ;;  %v1845_v60 = vsel %vm1819_vm8, %v1812_v0, %v5022_v31  ;;  %v9088_v51 = vld [vmem:[#allocation51_spill] sm:$0xff] }
 0x196   : > { %v1906_v12 = vsel %vm1885_vm10, %v1873_v32, %v5151_v5  ;;  %v1907_v39 = vsel %vm1885_vm10, %v1874_v59, %v5152_v62  ;;  %v5157_v36 = vunpack.i.h.bf16 %v5155_v57  ;;  %v5156_v54 = vunpack.i.l.bf16 %v5155_v57  ;;  %v9086_v59 = vld [vmem:[#allocation91_spill] sm:$0xff] }
 0x197   : > { %v5160_v23 = vpop.permute.xlu0 %5159  ;;  %v1928_v47 = vpack.c.bf16 %v1907_v39, %v1906_v12  ;;  %v5027_v42 = vunpack.i.h.bf16 %v7423_v20  ;;  %v1814_v52 = vsel %vm1786_vm7, %v7443_v44, %v4947_v14  ;;  %v5032_v25 = vunpack.i.h.bf16 %v7435_v1  ;;  %v9090_v14 = vld [vmem:[#allocation52_spill] sm:$0xff] }
 0x198   : > { %v1908_v49 = vsel %vm1885_vm10, %v1875_v35, %v5156_v54  ;;  %v1909_v9 = vsel %vm1885_vm10, %v1876_v45, %v5157_v36  ;;  %v5162_v18 = vunpack.i.h.bf16 %v5160_v23  ;;  %v5161_v28 = vunpack.i.l.bf16 %v5160_v23 }
 0x199   : > { %4453 = vmatprep.mubr.msk.bf16.mxu0 %vm1970_vm11, %v1928_v47  ;;  %v5165_v8 = vpop.permute.xlu1 %5164  ;;  %v1929_v27 = vpack.c.bf16 %v1909_v9, %v1908_v49  ;;  %v1846_v21 = vsel %vm1819_vm8, %v1813_v63, %v5026_v41  ;;  %v5031_v20 = vunpack.i.l.bf16 %v7435_v1  ;;  %v1847_v17 = vsel %vm1819_vm8, %v1814_v52, %v5027_v42  ;;  %v2416_v52 = vld [vmem:[#allocation2 + $0xa] sm:$0xff] }
 0x19a   : > { %v5167_v11 = vunpack.i.h.bf16 %v5165_v8  ;;  %v5166_v43 = vunpack.i.l.bf16 %v5165_v8  ;;  %v1877_v26 = vsel %vm1852_vm9, %v1844_v24, %v5161_v28  ;;  %v1878_v61 = vsel %vm1852_vm9, %v1845_v60, %v5162_v18 }
 0x19b   : > { %v5170_v50 = vpop.permute.xlu0 %5169  ;;  %4454 = vmatmul.mubr.msk.bf16.gmra.mrb[20].mxu0 %vm1970_vm11, %v1929_v27  ;;  %v1815_v29 = vsel %vm1786_vm7, %v7447_v34, %v4951_v7  ;;  %v4956_v19 = vunpack.i.l.bf16 %v9085_v6  ;;  %v1816_v4 = vsel %vm1786_vm7, %v7451_v3, %v4952_v16  ;;  %v4957_v33 = vunpack.i.h.bf16 %v9085_v6 }
 0x19c   : > { %v5172_v40 = vunpack.i.h.bf16 %v5170_v50  ;;  %v5171_v30 = vunpack.i.l.bf16 %v5170_v50  ;;  %v1879_v58 = vsel %vm1852_vm9, %v1846_v21, %v5166_v43  ;;  %v1880_v1 = vsel %vm1852_vm9, %v1847_v17, %v5167_v11  ;;  %v2383_v11 = vld [vmem:[#allocation2 + $0x1] sm:$0xff]  ;;  %v2384_v43 = vld [vmem:[#allocation2 + $0x9] sm:$0xff] }
 0x19d   : > { %v5175_v53 = vpop.permute.xlu1 %5174  ;;  %v5036_v34 = vunpack.i.l.bf16 %v7458_v15  ;;  %v9087_v55 = vunpack.i.l.bf16 %v9086_v59  ;;  %v1848_v39 = vsel %vm1819_vm8, %v1815_v29, %v5031_v20  ;;  %v1849_v57 = vsel %vm1819_vm8, %v1816_v4, %v5032_v25 }
 0x19e   : > { %v1910_v37 = vsel %vm1885_vm10, %v1877_v26, %v5171_v30  ;;  %v1911_v10 = vsel %vm1885_vm10, %v1878_v61, %v5172_v40  ;;  %v5177_v56 = vunpack.i.h.bf16 %v5175_v53  ;;  %v5176_v46 = vunpack.i.l.bf16 %v5175_v53  ;;  %v2415_v30 = vld [vmem:[#allocation2 + $0x2] sm:$0xff]  ;;  %v7710_v26 = vld [vmem:[%s8807_s2] ss:$0 sm:$0xff] }
 0x19f   : > { %v5180_v44 = vpop.permute.xlu0 %5179  ;;  %v1930_v48 = vpack.c.bf16 %v1911_v10, %v1910_v37  ;;  %v1784_v12 = vsel %vm1753_vm6, %v9088_v51, %v9087_v55  ;;  %v5037_v2 = vunpack.i.h.bf16 %v7458_v15  ;;  %v9089_v0 = vunpack.i.h.bf16 %v9086_v59 }
 0x1a0   : > { %v1912_v13 = vsel %vm1885_vm10, %v1879_v58, %v5176_v46  ;;  %v1913_v38 = vsel %vm1885_vm10, %v1880_v1, %v5177_v56  ;;  %v5182_v62 = vunpack.i.h.bf16 %v5180_v44  ;;  %v5181_v5 = vunpack.i.l.bf16 %v5180_v44 }
 0x1a1   : > { %4457 = vmatprep.mubr.msk.bf16.mxu0 %vm1970_vm11, %v1930_v48  ;;  %v5185_v31 = vpop.permute.xlu1 %5184  ;;  %v1931_v32 = vpack.c.bf16 %v1913_v38, %v1912_v13  ;;  %v1785_v35 = vsel %vm1753_vm6, %v9090_v14, %v9089_v0  ;;  %v1817_v45 = vsel %vm1786_vm7, %v1784_v12, %v4956_v19  ;;  %v5198_v40 = vpack.i.bf16 %v2384_v43, %v2383_v11 }
 0x1a2   : > { %v5187_v54 = vunpack.i.h.bf16 %v5185_v31  ;;  %v5186_v3 = vunpack.i.l.bf16 %v5185_v31  ;;  %v1881_v49 = vsel %vm1852_vm9, %v1848_v39, %v5181_v5  ;;  %v1882_v9 = vsel %vm1852_vm9, %v1849_v57, %v5182_v62 }
 0x1a3   : > { %v5190_v36 = vpop.permute.xlu0 %5189  ;;  %4458 = vmatmul.mubr.msk.bf16.gmra.mrb[24].mxu0 %vm1970_vm11, %v1931_v32  ;;  %v1818_v15 = vsel %vm1786_vm7, %v1785_v35, %v4957_v33  ;;  %v1850_v18 = vsel %vm1819_vm8, %v1817_v45, %v5036_v34  ;;  %5199 = vrot.lane.b32.xlu0 %v5198_v40, %s5913_s10  ;;  %v5203_v25 = vpack.i.bf16 %v2416_v52, %v2415_v30 }
 0x1a4   : > { %v5192_v23 = vunpack.i.h.bf16 %v5190_v36  ;;  %v5191_v47 = vunpack.i.l.bf16 %v5190_v36  ;;  %v1851_v7 = vsel %vm1819_vm8, %v1818_v15, %v5037_v2  ;;  %v1883_v63 = vsel %vm1852_vm9, %v1850_v18, %v5186_v3 }
 0x1a5   : > { %v5195_v16 = vpop.permute.xlu1 %5194  ;;  %v1884_v24 = vsel %vm1852_vm9, %v1851_v7, %v5187_v54 }
 0x1a6   : > { %v1914_v28 = vsel %vm1885_vm10, %v1881_v49, %v5191_v47  ;;  %v1915_v22 = vsel %vm1885_vm10, %v1882_v9, %v5192_v23  ;;  %v5197_v41 = vunpack.i.h.bf16 %v5195_v16  ;;  %v5196_v8 = vunpack.i.l.bf16 %v5195_v16 }
 0x1a7   : > { %v1932_v27 = vpack.c.bf16 %v1915_v22, %v1914_v28  ;;  %5204 = vrot.lane.b32.xlu0 %v5203_v25, %s5914_s11 }
 0x1a8   : > { %v1916_v60 = vsel %vm1885_vm10, %v1883_v63, %v5196_v8  ;;  %v1917_v42 = vsel %vm1885_vm10, %v1884_v24, %v5197_v41 }
 0x1a9   : > { %4461 = vmatprep.mubr.msk.bf16.mxu0 %vm1970_vm11, %v1932_v27  ;;  %v1933_v50 = vpack.c.bf16 %v1917_v42, %v1916_v60 }
 0x1ab   : > { %4462 = vmatmul.mubr.msk.bf16.gmra.mrb[28].mxu0 %vm1970_vm11, %v1933_v50 }
 0x246   : > { %v4435_v61 = vpop.f32.mrb[0].mxu0 }
 0x247   : > { %v2186_v21 = vadd.f32 %v4435_v61, %v7710_v26  ;;  %v2057_v20 = vpop.f32.mrb[1].mxu0 }
 0x248   : > { %v2184_v37 = vadd.f32 %v7710_v26, %v2057_v20  ;;  %v4436_v10 = vpop.f32.mrb[2].mxu0 }
 0x249   : > { %v2218_v53 = vmax.f32 %v2186_v21, 0.0  ;;  %v2187_v17 = vadd.f32 %v4436_v10, %v7710_v26  ;;  %v2060_v56 = vpop.f32.mrb[3].mxu0 }
 0x24a   : > { %v2216_v46 = vmax.f32 %v2184_v37, 0.0  ;;  %v2185_v44 = vadd.f32 %v7710_v26, %v2060_v56 }
 0x24b   : > { %2250 = vst.msk [vmem:[#allocation2 + $0x31] sm:$0xff] %vm224_vm0, %v2218_v53  ;;  %v2219_v48 = vmax.f32 %v2187_v17, 0.0 }
 0x24c   : > { %2248 = vst.msk [vmem:[#allocation2 + $0x19] sm:$0xff] %vm224_vm0, %v2216_v46  ;;  %v2217_v29 = vmax.f32 %v2185_v44, 0.0 }
 0x24d   : > { %2251 = vst.msk [vmem:[#allocation2 + $0x39] sm:$0xff] %vm224_vm0, %v2219_v48 }
 0x24e   : > { %2249 = vst.msk [vmem:[#allocation2 + $0x21] sm:$0xff] %vm224_vm0, %v2217_v29  ;;  %v4439_v6 = vpop.f32.mrb[4].mxu0 }
 0x24f   : > { %v2190_v19 = vadd.f32 %v4439_v6, %v7710_v26  ;;  %v2073_v58 = vpop.f32.mrb[5].mxu0 }
 0x250   : > { %v2188_v1 = vadd.f32 %v7710_v26, %v2073_v58  ;;  %v4440_v13 = vpop.f32.mrb[6].mxu0 }
 0x251   : > { %v2222_v38 = vmax.f32 %v2190_v19, 0.0  ;;  %v2191_v62 = vadd.f32 %v4440_v13, %v7710_v26  ;;  %v2076_v5 = vpop.f32.mrb[7].mxu0 }
 0x252   : > { %v2220_v4 = vmax.f32 %v2188_v1, 0.0  ;;  %v2189_v33 = vadd.f32 %v7710_v26, %v2076_v5  ;;  %v7725_v31 = vld [vmem:[#allocation2 + $0x30] sm:$0xff] }
 0x253   : > { %2254 = vst.msk [vmem:[#allocation2 + $0x61] sm:$0xff] %vm224_vm0, %v2222_v38  ;;  %v2223_v34 = vmax.f32 %v2191_v62, 0.0  ;;  %v2387_v55 = vld [vmem:[#allocation2 + $0x31] sm:$0xff]  ;;  %v2385_v30 = vld [vmem:[#allocation2 + $0x19] sm:$0xff] }
 0x254   : > { %2252 = vst.msk [vmem:[#allocation2 + $0x49] sm:$0xff] %vm224_vm0, %v2220_v4  ;;  %v2221_v32 = vmax.f32 %v2189_v33, 0.0  ;;  %v7728_v59 = vld [vmem:[#allocation2 + $0x38] sm:$0xff]  ;;  %v5843_v62 = vld [vmem:[%s8808_s3] sm:$0xff]  }
 0x255   : > { %v2388_v51 = vld [vmem:[#allocation2 + $0x39] sm:$0xff]  ;;  %2255 = vst.msk [vmem:[#allocation2 + $0x69] sm:$0xff] %vm224_vm0, %v2223_v34  ;;  %v5218_v12 = vpack.i.bf16 %v7728_v59, %v7725_v31  ;;  %v2386_v50 = vld [vmem:[#allocation2 + $0x21] sm:$0xff]  ;;  %4465 = vmatprep.subr.bf16.mxu1 %v5843_v62 }
 0x256   : > { %v5208_v39 = vpack.i.bf16 %v2388_v51, %v2387_v55  ;;  %2253 = vst.msk [vmem:[#allocation2 + $0x51] sm:$0xff] %vm224_vm0, %v2221_v32  ;;  %v4443_v57 = vpop.f32.mrb[8].mxu0  ;;  %v2419_v2 = vld [vmem:[#allocation2 + $0x32] sm:$0xff]  ;;  %v2420_v36 = vld [vmem:[#allocation2 + $0x3a] sm:$0xff]  ;;  %v5248_v25 = vpack.i.bf16 %v2386_v50, %v2385_v30  ;;  %v2418_v20 = vld [vmem:[#allocation2 + $0x22] sm:$0xff]  ;;  %4466 = vmatpush3.bf16.msra.mxu1 %v5843_v62 }
 0x257   : > { %v2194_v54 = vadd.f32 %v4443_v57, %v7710_v26  ;;  %5219 = vrot.lane.b32.xlu1 %v5218_v12, %s5915_s12  ;;  %v2089_v3 = vpop.f32.mrb[9].mxu0  ;;  %v5213_v45 = vpack.i.bf16 %v2420_v36, %v2419_v2  ;;  %v7752_v42 = vld [vmem:[#allocation2 + $0x20] sm:$0xff]  ;;  %v7758_v40 = vld [vmem:[#allocation2 + $0x18] sm:$0xff]  ;;  %v5844_v32 = vld [vmem:[%s8808_s3 + $0x8] sm:$0xff]  }
 0x258   : > { %5209 = vrot.lane.b32.xlu0 %v5208_v39, %s5913_s10  ;;  %v2192_v23 = vadd.f32 %v7710_v26, %v2089_v3  ;;  %v4444_v47 = vpop.f32.mrb[10].mxu0  ;;  %v5258_v52 = vpack.i.bf16 %v7752_v42, %v7758_v40  ;;  %v2417_v21 = vld [vmem:[#allocation2 + $0x1a] sm:$0xff]  ;;  %4467 = vmatprep.subr.bf16.mxu1 %v5844_v32 }
 0x259   : > { %v2226_v0 = vmax.f32 %v2194_v54, 0.0  ;;  %v2195_v14 = vadd.f32 %v4444_v47, %v7710_v26  ;;  %v2092_v35 = vpop.f32.mrb[11].mxu0  ;;  %v5253_v6 = vpack.i.bf16 %v2418_v20, %v2417_v21 }
 0x25a   : > { %v2224_v49 = vmax.f32 %v2192_v23, 0.0  ;;  %v2193_v9 = vadd.f32 %v7710_v26, %v2092_v35  ;;  %v2391_v46 = vld [vmem:[#allocation2 + $0x61] sm:$0xff]  ;;  %4468 = vmatpush3.bf16.msra.mxu1 %v5844_v32 }
 0x25b   : > { %2258 = vst.msk [vmem:[#allocation2 + $0x91] sm:$0xff] %vm224_vm0, %v2226_v0  ;;  %v2227_v15 = vmax.f32 %v2195_v14, 0.0  ;;  %5234 = vrot.lane.b32.xlu1 %v5218_v12, %s5918_s15  ;;  %v5845_v0 = vld [vmem:[%s8808_s3 + $0x10] sm:$0xff]   ;;  %v7804_v35 = vld [vmem:[#allocation2 + $0x60] sm:$0xff] }
 0x25c   : > { %5214 = vrot.lane.b32.xlu0 %v5213_v45, %s5914_s11  ;;  %2256 = vst.msk [vmem:[#allocation2 + $0x79] sm:$0xff] %vm224_vm0, %v2224_v49  ;;  %v2225_v18 = vmax.f32 %v2193_v9, 0.0  ;;  %v2392_v37 = vld [vmem:[#allocation2 + $0x69] sm:$0xff]  ;;  %4469 = vmatprep.subr.bf16.mxu1 %v5845_v0 }
 0x25d   : > { %2259 = vst.msk [vmem:[#allocation2 + $0x99] sm:$0xff] %vm224_vm0, %v2227_v15  ;;  %v7769_v19 = vpack.i.bf16 %v2392_v37, %v2391_v46  ;;  %v2423_v13 = vld [vmem:[#allocation2 + $0x62] sm:$0xff]  ;;  %v2424_v38 = vld [vmem:[#allocation2 + $0x6a] sm:$0xff] }
 0x25e   : > { %2257 = vst.msk [vmem:[#allocation2 + $0x81] sm:$0xff] %vm224_vm0, %v2225_v18  ;;  %v4447_v28 = vpop.f32.mrb[12].mxu0  ;;  %v7781_v33 = vpack.i.bf16 %v2424_v38, %v2423_v13  ;;  %v7794_v23 = vld [vmem:[#allocation2 + $0x68] sm:$0xff]  ;;  %v7810_v9 = vld [vmem:[#allocation2 + $0x50] sm:$0xff]  ;;  %4470 = vmatpush3.bf16.msra.mxu1 %v5845_v0 }
 0x25f   : > { %v2198_v22 = vadd.f32 %v4447_v28, %v7710_v26  ;;  %5239 = vrot.lane.b32.xlu1 %v5208_v39, %s5919_s16  ;;  %v2105_v16 = vpop.f32.mrb[13].mxu0  ;;  %v5846_v28 = vld [vmem:[%s8808_s3 + $0x18] sm:$0xff]  }
 0x260   : > { %5224 = vrot.lane.b32.xlu0 %v5208_v39, %s5916_s13  ;;  %v2196_v7 = vadd.f32 %v7710_v26, %v2105_v16  ;;  %v4448_v41 = vpop.f32.mrb[14].mxu0  ;;  %4471 = vmatprep.subr.bf16.mxu1 %v5846_v28 }
 0x261   : > { %v2230_v8 = vmax.f32 %v2198_v22, 0.0  ;;  %v2199_v27 = vadd.f32 %v4448_v41, %v7710_v26  ;;  %v2108_v63 = vpop.f32.mrb[15].mxu0 }
 0x262   : > { %v2228_v24 = vmax.f32 %v2196_v7, 0.0  ;;  %v2197_v60 = vadd.f32 %v7710_v26, %v2108_v63  ;;  %v7820_v7 = vld [vmem:[#allocation2 + $0x48] sm:$0xff]  ;;  %4472 = vmatpush3.bf16.msra.mxu1 %v5846_v28 }
 0x263   : > { %2262 = vst.msk [vmem:[#allocation2 + $0xc1] sm:$0xff] %vm224_vm0, %v2230_v8  ;;  %v2231_v11 = vmax.f32 %v2199_v27, 0.0  ;;  %5244 = vrot.lane.b32.xlu1 %v5213_v45, %s5920_s17  ;;  %v5323_v63 = vpack.i.bf16 %v7810_v9, %v7820_v7 }
 0x264   : > { %5229 = vrot.lane.b32.xlu0 %v5213_v45, %s5917_s14  ;;  %2260 = vst.msk [vmem:[#allocation2 + $0xa9] sm:$0xff] %vm224_vm0, %v2228_v24  ;;  %v2229_v43 = vmax.f32 %v2197_v60, 0.0  ;;  %v5283_v45 = vpack.i.bf16 %v7794_v23, %v7804_v35  ;;  %v2396_v13 = vld [vmem:[#allocation2 + $0x99] sm:$0xff] }
 0x265   : > { %2263 = vst.msk [vmem:[#allocation2 + $0xc9] sm:$0xff] %vm224_vm0, %v2231_v11  ;;  %v5847_v11 = vld [vmem:[%s8808_s3 + $0x20] ss:$0 sps:$4 sm:$0xff]   ;;  %v2427_v62 = vld [vmem:[#allocation2 + $0x92] sm:$0xff] }
 0x266   : > { %2261 = vst.msk [vmem:[#allocation2 + $0xb1] sm:$0xff] %vm224_vm0, %v2229_v43  ;;  %v4451_v61 = vpop.f32.mrb[16].mxu0  ;;  %4508 = vmatprep.subr.msk.bf16.mxu1 %vm2019_vm3, %v5847_v11  ;;  %v4020_v30 = vsel %vm2019_vm3, %v5847_v11, 0 }
 0x267   : > { %v2202_v10 = vadd.f32 %v4451_v61, %v7710_v26  ;;  %5249 = vrot.lane.b32.xlu1 %v5248_v25, %s5913_s10  ;;  %v2121_v53 = vpop.f32.mrb[17].mxu0  ;;  %4474 = vmatpush3.bf16.msra.mxu1 %v4020_v30 }
 0x268   : > { %5259 = vrot.lane.b32.xlu0 %v5258_v52, %s5915_s12  ;;  %v2200_v17 = vadd.f32 %v7710_v26, %v2121_v53  ;;  %v4452_v56 = vpop.f32.mrb[18].mxu0 }
 0x269   : > { %v2234_v44 = vmax.f32 %v2202_v10, 0.0  ;;  %v2203_v48 = vadd.f32 %v4452_v56, %v7710_v26  ;;  %v2124_v29 = vpop.f32.mrb[19].mxu0  ;;  %v2577_v10 = vld [vmem:[#allocation2 + $0x49] sm:$0xff] }
 0x26a   : > { %v2232_v58 = vmax.f32 %v2200_v17, 0.0  ;;  %v2201_v1 = vadd.f32 %v7710_v26, %v2124_v29  ;;  %v2609_v29 = vld [vmem:[#allocation2 + $0x4a] sm:$0xff]  ;;  %v2399_v0 = vld [vmem:[#allocation2 + $0xc1] sm:$0xff] }
 0x26b   : > { %2266 = vst.msk [vmem:[#allocation2 + $0xf1] sm:$0xff] %vm224_vm0, %v2234_v44  ;;  %v2235_v5 = vmax.f32 %v2203_v48, 0.0  ;;  %5254 = vrot.lane.b32.xlu1 %v5253_v6, %s5914_s11  ;;  %v7892_v28 = vld [vmem:[#allocation2 + $0xc0] sm:$0xff] }
 0x26c   : > { %5274 = vrot.lane.b32.xlu0 %v7769_v19, %s5913_s10  ;;  %2264 = vst.msk [vmem:[#allocation2 + $0xd9] sm:$0xff] %vm224_vm0, %v2232_v58  ;;  %v2233_v4 = vmax.f32 %v2201_v1, 0.0 }
 0x26d   : > { %2267 = vst.msk [vmem:[#allocation2 + $0xf9] sm:$0xff] %vm224_vm0, %v2235_v5  ;;  %v2428_v5 = vld [vmem:[#allocation2 + $0x9a] sm:$0xff]  ;;  %v2618_v11 = vld [vmem:[#allocation2 + $0xb2] sm:$0xff] }
 0x26e   : > { %2265 = vst.msk [vmem:[#allocation2 + $0xe1] sm:$0xff] %vm224_vm0, %v2233_v4  ;;  %v4455_v34 = vpop.f32.mrb[20].mxu0  ;;  %v5358_v4 = vpack.i.bf16 %v2428_v5, %v2427_v62 }
 0x26f   : > { %v2206_v55 = vadd.f32 %v4455_v34, %v7710_v26  ;;  %5264 = vrot.lane.b32.xlu1 %v5248_v25, %s5916_s13  ;;  %v2137_v51 = vpop.f32.mrb[21].mxu0  ;;  %v2578_v25 = vld [vmem:[#allocation2 + $0x51] sm:$0xff] }
 0x270   : > { %5279 = vrot.lane.b32.xlu0 %v7781_v33, %s5914_s11  ;;  %v2204_v12 = vadd.f32 %v7710_v26, %v2137_v51  ;;  %v4456_v39 = vpop.f32.mrb[22].mxu0  ;;  %v5333_v46 = vpack.i.bf16 %v2578_v25, %v2577_v10  ;;  %v7861_v34 = vld [vmem:[#allocation2 + $0x90] sm:$0xff]  ;;  %v7869_v51 = vld [vmem:[#allocation2 + $0x78] sm:$0xff] }
 0x271   : > { %v2238_v57 = vmax.f32 %v2206_v55, 0.0  ;;  %v2207_v2 = vadd.f32 %v4456_v39, %v7710_v26  ;;  %v2140_v36 = vpop.f32.mrb[23].mxu0  ;;  %v7865_v55 = vld [vmem:[#allocation2 + $0x80] sm:$0xff] }
 0x272   : > { %v2236_v54 = vmax.f32 %v2204_v12, 0.0  ;;  %v2205_v3 = vadd.f32 %v7710_v26, %v2140_v36  ;;  %v5403_v12 = vpack.i.bf16 %v7865_v55, %v7869_v51  ;;  %v2582_v39 = vld [vmem:[#allocation2 + $0x81] sm:$0xff]  ;;  %v2403_v25 = vld [vmem:[#allocation2 + $0xf1] sm:$0xff] }
 0x273   : > { %2270 = vst.msk [vmem:[#allocation2 + $0x121] sm:$0xff] %vm224_vm0, %v2238_v57  ;;  %v2239_v47 = vmax.f32 %v2207_v2, 0.0  ;;  %5269 = vrot.lane.b32.xlu1 %v5253_v6, %s5917_s14  ;;  %v2610_v6 = vld [vmem:[#allocation2 + $0x52] sm:$0xff]  ;;  %v2613_v36 = vld [vmem:[#allocation2 + $0x7a] sm:$0xff] }
 0x274   : > { %5289 = vrot.lane.b32.xlu0 %v7769_v19, %s5916_s13  ;;  %2268 = vst.msk [vmem:[#allocation2 + $0x109] sm:$0xff] %vm224_vm0, %v2236_v54  ;;  %v2237_v14 = vmax.f32 %v2205_v3, 0.0  ;;  %v5338_v1 = vpack.i.bf16 %v2610_v6, %v2609_v29  ;;  %v2581_v57 = vld [vmem:[#allocation2 + $0x79] sm:$0xff]  ;;  %v2614_v54 = vld [vmem:[#allocation2 + $0x82] sm:$0xff] }
 0x275   : > { %2271 = vst.msk [vmem:[#allocation2 + $0x129] sm:$0xff] %vm224_vm0, %v2239_v47  ;;  %v5413_v2 = vpack.i.bf16 %v2582_v39, %v2581_v57  ;;  %v5418_v3 = vpack.i.bf16 %v2614_v54, %v2613_v36  ;;  %v2400_v47 = vld [vmem:[#allocation2 + $0xc9] sm:$0xff]  ;;  %v2436_v10 = vld [vmem:[#allocation2 + $0xfa] sm:$0xff] }
 0x276   : > { %2269 = vst.msk [vmem:[#allocation2 + $0x111] sm:$0xff] %vm224_vm0, %v2237_v14  ;;  %v4459_v49 = vpop.f32.mrb[24].mxu0  ;;  %v5433_v14 = vpack.i.bf16 %v2400_v47, %v2399_v0  ;;  %v2463_v29 = vld [vmem:[#allocation2 + $0xd8] sm:$0xff] }
 0x277   : > { %v2210_v15 = vadd.f32 %v4459_v49, %v7710_v26  ;;  %5284 = vrot.lane.b32.xlu1 %v5283_v45, %s5915_s12  ;;  %v2153_v18 = vpop.f32.mrb[25].mxu0  ;;  %v2432_v49 = vld [vmem:[#allocation2 + $0xca] sm:$0xff] }
 0x278   : > { %5294 = vrot.lane.b32.xlu0 %v7781_v33, %s5917_s14  ;;  %v2208_v22 = vadd.f32 %v7710_v26, %v2153_v18  ;;  %v4460_v16 = vpop.f32.mrb[26].mxu0  ;;  %v7888_v18 = vld [vmem:[#allocation2 + $0xc8] sm:$0xff] }
 0x279   : > { %v2242_v41 = vmax.f32 %v2210_v15, 0.0  ;;  %v2211_v8 = vadd.f32 %v4460_v16, %v7710_v26  ;;  %v2156_v27 = vpop.f32.mrb[27].mxu0  ;;  %v2460_v16 = vld [vmem:[#allocation2 + $0xb0] sm:$0xff] }
 0x27a   : > { %v2240_v24 = vmax.f32 %v2208_v22, 0.0  ;;  %v2209_v60 = vadd.f32 %v7710_v26, %v2156_v27  ;;  %v5443_v22 = vpack.i.bf16 %v7888_v18, %v7892_v28  ;;  %v7901_v27 = vpop.permute.xlu0 %5199  ;;  %v2407_v39 = vld [vmem:[#allocation2 + $0x121] sm:$0xff] }
 0x27b   : > { %2274 = vst.msk [vmem:[#allocation2 + $0x151] sm:$0xff] %vm224_vm0, %v2242_v41  ;;  %v2243_v50 = vmax.f32 %v2211_v8, 0.0  ;;  %5299 = vrot.lane.b32.xlu1 %v5283_v45, %s5918_s15  ;;  %v2431_v45 = vld [vmem:[#allocation2 + $0xc2] sm:$0xff] }
 0x27c   : > { %5324 = vrot.lane.b32.xlu0 %v5323_v63, %s5915_s12  ;;  %2272 = vst.msk [vmem:[#allocation2 + $0x139] sm:$0xff] %vm224_vm0, %v2240_v24  ;;  %v2241_v43 = vmax.f32 %v2209_v60, 0.0  ;;  %v7883_v15 = vpack.i.bf16 %v2432_v49, %v2431_v45  ;;  %v2459_v41 = vld [vmem:[#allocation2 + $0xa8] sm:$0xff] }
 0x27d   : > { %2275 = vst.msk [vmem:[#allocation2 + $0x159] sm:$0xff] %vm224_vm0, %v2243_v50  ;;  %v5478_v8 = vpack.i.bf16 %v2460_v16, %v2459_v41  ;;  %v2585_v24 = vld [vmem:[#allocation2 + $0xa9] sm:$0xff]  ;;  %v2406_v0 = vld [vmem:[#allocation2 + $0x111] sm:$0xff]  ;;  %v5202_v41 = vunpack.i.h.bf16 %v7901_v27 }
 0x27e   : > { %2273 = vst.msk [vmem:[#allocation2 + $0x141] sm:$0xff] %vm224_vm0, %v2241_v43  ;;  %v4463_v52 = vpop.f32.mrb[28].mxu0  ;;  %v2617_v50 = vld [vmem:[#allocation2 + $0xaa] sm:$0xff]  ;;  %v7907_v43 = vpop.permute.xlu0 %5204 }
 0x27f   : > { %v2214_v61 = vadd.f32 %v4463_v52, %v7710_v26  ;;  %5304 = vrot.lane.b32.xlu1 %v7769_v19, %s5919_s16  ;;  %v2169_v21 = vpop.f32.mrb[29].mxu0  ;;  %v5493_v30 = vpack.i.bf16 %v2618_v11, %v2617_v50  ;;  %v2404_v52 = vld [vmem:[#allocation2 + $0xf9] sm:$0xff]  ;;  %v2440_v47 = vld [vmem:[#allocation2 + $0x12a] sm:$0xff] }
 0x280   : > { %5329 = vrot.lane.b32.xlu0 %v5323_v63, %s5918_s15  ;;  %v2212_v20 = vadd.f32 %v7710_v26, %v2169_v21  ;;  %v4464_v37 = vpop.f32.mrb[30].mxu0  ;;  %v2586_v63 = vld [vmem:[#allocation2 + $0xb1] sm:$0xff]  ;;  %v2351_v50 = vld [vmem:[#allocation2] sm:$0xff]  ;;  %v2352_v11 = vld [vmem:[#allocation2 + $0x8] sm:$0xff] }
 0x281   : > { %v2246_v53 = vmax.f32 %v2214_v61, 0.0  ;;  %v2215_v17 = vadd.f32 %v4464_v37, %v7710_v26  ;;  %v2172_v56 = vpop.f32.mrb[31].mxu0  ;;  %v5488_v60 = vpack.i.bf16 %v2586_v63, %v2585_v24  ;;  %v2435_v37 = vld [vmem:[#allocation2 + $0xf2] sm:$0xff]  ;;  %v2437_v24 = vld [vmem:[#allocation2 + $0x10a] sm:$0xff] }
 0x282   : > { %v2244_v44 = vmax.f32 %v2212_v20, 0.0  ;;  %v2213_v48 = vadd.f32 %v7710_v26, %v2172_v56  ;;  %v2395_v26 = vld [vmem:[#allocation2 + $0x91] sm:$0xff]  ;;  %v7915_v20 = vpack.i.bf16 %v2404_v52, %v2403_v25  ;;  %v7924_v56 = vpack.i.bf16 %v2436_v10, %v2435_v37 }
 0x283   : > { %2278 = vst.msk [vmem:[#allocation2 + $0x181] sm:$0xff] %vm224_vm0, %v2246_v53  ;;  %v2247_v19 = vmax.f32 %v2215_v17, 0.0  ;;  %5309 = vrot.lane.b32.xlu1 %v7781_v33, %s5920_s17  ;;  %v5353_v38 = vpack.i.bf16 %v2396_v13, %v2395_v26  ;;  %v7857_v33 = vld [vmem:[#allocation2 + $0x98] sm:$0xff]  ;;  %v2402_v13 = vld [vmem:[#allocation2 + $0xe1] sm:$0xff]  ;;  %v2468_v63 = vld [vmem:[#allocation2 + $0x110] sm:$0xff]  ;;  %v5207_v52 = vunpack.i.h.bf16 %v7907_v43  ;;  %v5206_v25 = vunpack.i.l.bf16 %v7907_v43 }
 0x284   : > { %5334 = vrot.lane.b32.xlu0 %v5333_v46, %s5919_s16  ;;  %2276 = vst.msk [vmem:[#allocation2 + $0x169] sm:$0xff] %vm224_vm0, %v2244_v44  ;;  %v2245_v58 = vmax.f32 %v2213_v48, 0.0  ;;  %v5363_v32 = vpack.i.bf16 %v7857_v33, %v7861_v34  ;;  %v2464_v44 = vld [vmem:[#allocation2 + $0xe0] sm:$0xff]  ;;  %v2465_v48 = vld [vmem:[#allocation2 + $0xf0] sm:$0xff] }
 0x285   : > { %2279 = vst.msk [vmem:[#allocation2 + $0x189] sm:$0xff] %vm224_vm0, %v2247_v19  ;;  %v2401_v26 = vld [vmem:[#allocation2 + $0xd9] sm:$0xff]  ;;  %v2411_v43 = vld [vmem:[#allocation2 + $0x151] sm:$0xff] }
 0x286   : > { %2277 = vst.msk [vmem:[#allocation2 + $0x171] sm:$0xff] %vm224_vm0, %v2245_v58  ;;  %v7942_v5 = vpack.i.bf16 %v2402_v13, %v2401_v26  ;;  %v2412_v13 = vld [vmem:[#allocation2 + $0x159] sm:$0xff] }
 0x287   : > { %5314 = vrot.lane.b32.xlu1 %v5333_v46, %s5913_s10 }
 0x288   : > { %5339 = vrot.lane.b32.xlu0 %v5338_v1, %s5920_s17 }
 0x28b   : > { %5319 = vrot.lane.b32.xlu1 %v5338_v1, %s5914_s11 }
 0x28c   : > { %5354 = vrot.lane.b32.xlu0 %v5353_v38, %s5913_s10 }
 0x28f   : > { %5344 = vrot.lane.b32.xlu1 %v5333_v46, %s5916_s13  ;;  %v2466_v46 = vld [vmem:[#allocation2 + $0xf8] sm:$0xff] }
 0x290   : > { %5359 = vrot.lane.b32.xlu0 %v5358_v4, %s5914_s11  ;;  %v7933_v58 = vpack.i.bf16 %v2466_v46, %v2465_v48 }
 0x293   : > { %5349 = vrot.lane.b32.xlu1 %v5338_v1, %s5917_s14  ;;  %v5533_v1 = vpack.i.bf16 %v2464_v44, %v2463_v29  ;;  %v3664_v44 = vsel %vm224_vm0, %v2352_v11, %v5202_v41 }
 0x294   : > { %5369 = vrot.lane.b32.xlu0 %v5353_v38, %s5916_s13 }
 0x297   : > { %5364 = vrot.lane.b32.xlu1 %v5363_v32, %s5915_s12 }
 0x298   : > { %5374 = vrot.lane.b32.xlu0 %v5358_v4, %s5917_s14 }
 0x29b   : > { %5379 = vrot.lane.b32.xlu1 %v5363_v32, %s5918_s15  ;;  %v2434_v32 = vld [vmem:[#allocation2 + $0xe2] sm:$0xff] }
 0x29c   : > { %5404 = vrot.lane.b32.xlu0 %v5403_v12, %s5915_s12 }
 0x29f   : > { %5384 = vrot.lane.b32.xlu1 %v5353_v38, %s5919_s16 }
 0x2a0   : > { %5409 = vrot.lane.b32.xlu0 %v5403_v12, %s5918_s15  ;;  %v2408_v12 = vld [vmem:[#allocation2 + $0x129] sm:$0xff] }
 0x2a1   : > { %v7951_v54 = vpack.i.bf16 %v2408_v12, %v2407_v39  ;;  %v3696_v12 = vsel %vm1687_vm4, %v3664_v44, %v5207_v52 }
 0x2a3   : > { %5389 = vrot.lane.b32.xlu1 %v5358_v4, %s5920_s17  ;;  %v2433_v4 = vld [vmem:[#allocation2 + $0xda] sm:$0xff] }
 0x2a4   : > { %5414 = vrot.lane.b32.xlu0 %v5413_v2, %s5919_s16  ;;  %v7949_v36 = vpack.i.bf16 %v2434_v32, %v2433_v4 }
 0x2a7   : > { %5394 = vrot.lane.b32.xlu1 %v5413_v2, %s5913_s10 }
 0x2a8   : > { %5419 = vrot.lane.b32.xlu0 %v5418_v3, %s5920_s17 }
 0x2ab   : > { %5399 = vrot.lane.b32.xlu1 %v5418_v3, %s5914_s11 }
 0x2ac   : > { %5434 = vrot.lane.b32.xlu0 %v5433_v14, %s5913_s10 }
 0x2af   : > { %5424 = vrot.lane.b32.xlu1 %v5413_v2, %s5916_s13 }
 0x2b0   : > { %5439 = vrot.lane.b32.xlu0 %v7883_v15, %s5914_s11 }
 0x2b3   : > { %5429 = vrot.lane.b32.xlu1 %v5418_v3, %s5917_s14  ;;  %v2439_v3 = vld [vmem:[#allocation2 + $0x122] sm:$0xff] }
 0x2b4   : > { %5449 = vrot.lane.b32.xlu0 %v5433_v14, %s5916_s13 }
 0x2b7   : > { %5444 = vrot.lane.b32.xlu1 %v5443_v22, %s5915_s12 }
 0x2b8   : > { %5454 = vrot.lane.b32.xlu0 %v7883_v15, %s5917_s14 }
 0x2bb   : > { %5459 = vrot.lane.b32.xlu1 %v5443_v22, %s5918_s15  ;;  %v7961_v22 = vpack.i.bf16 %v2440_v47, %v2439_v3  ;;  %v7989_v47 = vpack.i.bf16 %v2412_v13, %v2411_v43 }
 0x2bc   : > { %5479 = vrot.lane.b32.xlu0 %v5478_v8, %s5915_s12 }
 0x2bf   : > { %5464 = vrot.lane.b32.xlu1 %v5433_v14, %s5919_s16  ;;  %v2405_v14 = vld [vmem:[#allocation2 + $0x109] sm:$0xff] }
 0x2c0   : > { %5484 = vrot.lane.b32.xlu0 %v5478_v8, %s5918_s15  ;;  %v7963_v16 = vpack.i.bf16 %v2406_v0, %v2405_v14  ;;  %v5201_v8 = vunpack.i.l.bf16 %v7901_v27  ;;  %v2444_v0 = vld [vmem:[#allocation2 + $0x15a] sm:$0xff] }
 0x2c2   : > { %v3663_v48 = vsel %vm224_vm0, %v2351_v50, %v5201_v8 }
 0x2c3   : > { %5469 = vrot.lane.b32.xlu1 %v5488_v60, %s5913_s10  ;;  %v3695_v32 = vsel %vm1687_vm4, %v3663_v48, %v5206_v25 }
 0x2c4   : > { %5489 = vrot.lane.b32.xlu0 %v5488_v60, %s5919_s16 }
 0x2c7   : > { %5474 = vrot.lane.b32.xlu1 %v5493_v30, %s5914_s11 }
 0x2c8   : > { %5494 = vrot.lane.b32.xlu0 %v5493_v30, %s5920_s17 }
 0x2c9   : > { %v7911_v61 = vpop.permute.xlu1 %5219 }
 0x2ca   : > { %v7913_v21 = vpop.permute.xlu0 %5209 }
 0x2cb   : > { %5499 = vrot.lane.b32.xlu1 %v5488_v60, %s5916_s13  ;;  %v2438_v60 = vld [vmem:[#allocation2 + $0x112] sm:$0xff] }
 0x2cc   : > { %5509 = vrot.lane.b32.xlu0 %v7915_v20, %s5913_s10  ;;  %v7977_v46 = vpack.i.bf16 %v2438_v60, %v2437_v24 }
 0x2cd   : > { %v7920_v53 = vpop.permute.xlu1 %5234 }
 0x2ce   : > { %v7922_v17 = vpop.permute.xlu0 %5214  ;;  %v5237_v24 = vunpack.i.h.bf16 %v7920_v53  ;;  %v5236_v60 = vunpack.i.l.bf16 %v7920_v53 }
 0x2cf   : > { %5504 = vrot.lane.b32.xlu1 %v5493_v30, %s5917_s14  ;;  %v2467_v30 = vld [vmem:[#allocation2 + $0x108] sm:$0xff] }
 0x2d0   : > { %5514 = vrot.lane.b32.xlu0 %v7924_v56, %s5914_s11  ;;  %v7975_v27 = vpack.i.bf16 %v2468_v63, %v2467_v30 }
 0x2d1   : > { %v7929_v6 = vpop.permute.xlu1 %5239 }
 0x2d2   : > { %v7931_v19 = vpop.permute.xlu0 %5224  ;;  %v5241_v53 = vunpack.i.l.bf16 %v7929_v6 }
 0x2d3   : > { %5519 = vrot.lane.b32.xlu1 %v7933_v58, %s5915_s12 }
 0x2d4   : > { %5534 = vrot.lane.b32.xlu0 %v5533_v1, %s5915_s12 }
 0x2d5   : > { %v7938_v38 = vpop.permute.xlu1 %5244 }
 0x2d6   : > { %v7940_v62 = vpop.permute.xlu0 %5229  ;;  %v5246_v13 = vunpack.i.l.bf16 %v7938_v38 }
 0x2d7   : > { %5524 = vrot.lane.b32.xlu1 %v7942_v5, %s5913_s10 }
 0x2d8   : > { %5539 = vrot.lane.b32.xlu0 %v5533_v1, %s5918_s15 }
 0x2d9   : > { %v7947_v2 = vpop.permute.xlu1 %5249 }
 0x2da   : > { %v5260_v57 = vpop.permute.xlu0 %5259 }
 0x2db   : > { %5529 = vrot.lane.b32.xlu1 %v7949_v36, %s5914_s11  ;;  %v5262_v29 = vunpack.i.h.bf16 %v5260_v57  ;;  %v5261_v1 = vunpack.i.l.bf16 %v5260_v57  ;;  %v2443_v57 = vld [vmem:[#allocation2 + $0x152] sm:$0xff] }
 0x2dc   : > { %5544 = vrot.lane.b32.xlu0 %v7951_v54, %s5913_s10  ;;  %v8003_v25 = vpack.i.bf16 %v2444_v0, %v2443_v57 }
 0x2dd   : > { %v7957_v45 = vpop.permute.xlu1 %5254  ;;  %v3728_v14 = vsel %vm1720_vm5, %v3696_v12, %v5262_v29  ;;  %v3727_v41 = vsel %vm1720_vm5, %v3695_v32, %v5261_v1  ;;  %v5247_v1 = vunpack.i.h.bf16 %v7938_v38  ;;  %v2410_v32 = vld [vmem:[#allocation2 + $0x141] sm:$0xff] }
 0x2de   : > { %v7959_v49 = vpop.permute.xlu0 %5274  ;;  %v5257_v12 = vunpack.i.h.bf16 %v7957_v45 }
 0x2df   : > { %5554 = vrot.lane.b32.xlu1 %v7963_v16, %s5913_s10 }
 0x2e0   : > { %5549 = vrot.lane.b32.xlu0 %v7961_v22, %s5914_s11 }
 0x2e1   : > { %v5265_v37 = vpop.permute.xlu1 %5264 }
 0x2e2   : > { %v7973_v10 = vpop.permute.xlu0 %5279  ;;  %v5267_v26 = vunpack.i.h.bf16 %v5265_v37  ;;  %v5266_v4 = vunpack.i.l.bf16 %v5265_v37  ;;  %v5242_v37 = vunpack.i.h.bf16 %v7929_v6 }
 0x2e3   : > { %5559 = vrot.lane.b32.xlu1 %v7977_v46, %s5914_s11 }
 0x2e4   : > { %5564 = vrot.lane.b32.xlu0 %v7975_v27, %s5915_s12  ;;  %v3760_v50 = vsel %vm1753_vm6, %v3728_v14, %v5267_v26  ;;  %v3759_v11 = vsel %vm1753_vm6, %v3727_v41, %v5266_v4  ;;  %v5252_v26 = vunpack.i.h.bf16 %v7947_v2  ;;  %v5251_v4 = vunpack.i.l.bf16 %v7947_v2  ;;  %v2409_v41 = vld [vmem:[#allocation2 + $0x139] sm:$0xff] }
 0x2e5   : > { %v5270_v39 = vpop.permute.xlu1 %5269 }
 0x2e6   : > { %v7987_v3 = vpop.permute.xlu0 %5289  ;;  %v5272_v8 = vunpack.i.h.bf16 %v5270_v39  ;;  %v5271_v63 = vunpack.i.l.bf16 %v5270_v39  ;;  %v5256_v39 = vunpack.i.l.bf16 %v7957_v45  ;;  %v2441_v45 = vld [vmem:[#allocation2 + $0x13a] sm:$0xff] }
 0x2e7   : > { %5584 = vrot.lane.b32.xlu1 %v7883_v15, %s5920_s17 }
 0x2e8   : > { %5569 = vrot.lane.b32.xlu0 %v7989_v47, %s5913_s10  ;;  %v3791_v30 = vsel %vm1786_vm7, %v3759_v11, %v5271_v63  ;;  %v3792_v52 = vsel %vm1786_vm7, %v3760_v50, %v5272_v8  ;;  %v8031_v8 = vpack.i.bf16 %v2410_v32, %v2409_v41  ;;  %v3665_v63 = vsel %vm224_vm0, %v7758_v40, %v5251_v4 }
 0x2e9   : > { %v8007_v44 = vpop.permute.xlu1 %5284  ;;  %v3823_v29 = vsel %vm1819_vm8, %v3791_v30, %v5236_v60  ;;  %v3824_v15 = vsel %vm1819_vm8, %v3792_v52, %v5237_v24  ;;  %v3666_v24 = vsel %vm224_vm0, %v7752_v42, %v5252_v26  ;;  %v2442_v60 = vld [vmem:[#allocation2 + $0x142] sm:$0xff]  ;;  %v3697_v50 = vsel %vm1687_vm4, %v3665_v63, %v5256_v39  ;;  %v2445_v39 = vld [vmem:[#allocation2 + $0x16a] sm:$0xff] }
 0x2ea   : > { %v8009_v48 = vpop.permute.xlu0 %5294  ;;  %v3855_v6 = vsel %vm1852_vm9, %v3823_v29, %v5241_v53  ;;  %v3856_v43 = vsel %vm1852_vm9, %v3824_v15, %v5242_v37  ;;  %v3698_v11 = vsel %vm1687_vm4, %v3666_v24, %v5257_v12  ;;  %v5222_v30 = vunpack.i.h.bf16 %v7911_v61  ;;  %v2414_v53 = vld [vmem:[#allocation2 + $0x171] sm:$0xff] }
 0x2eb   : > { %5594 = vrot.lane.b32.xlu1 %v7942_v5, %s5916_s13  ;;  %v3887_v38 = vsel %vm1885_vm10, %v3855_v6, %v5246_v13  ;;  %v3888_v57 = vsel %vm1885_vm10, %v3856_v43, %v5247_v1  ;;  %v5221_v40 = vunpack.i.l.bf16 %v7911_v61  ;;  %v8048_v37 = vpack.i.bf16 %v2442_v60, %v2441_v45  ;;  %v2413_v61 = vld [vmem:[#allocation2 + $0x169] sm:$0xff] }
 0x2ec   : > { %5574 = vrot.lane.b32.xlu0 %v8003_v25, %s5914_s11  ;;  %v3919_v14 = vpack.c.bf16 %v3888_v57, %v3887_v38  ;;  %v3730_v29 = vsel %vm1720_vm5, %v3698_v11, %v5222_v30  ;;  %v5227_v15 = vunpack.i.h.bf16 %v7931_v19  ;;  %v5226_v1 = vunpack.i.l.bf16 %v7931_v19  ;;  %v2446_v38 = vld [vmem:[#allocation2 + $0x172] sm:$0xff] }
 0x2ed   : > { %v8027_v2 = vpop.permute.xlu1 %5299  ;;  %v8060_v4 = vpack.i.bf16 %v2414_v53, %v2413_v61  ;;  %v5232_v57 = vunpack.i.h.bf16 %v7940_v62  ;;  %v5231_v19 = vunpack.i.l.bf16 %v7940_v62 }
 0x2ee   : > { %v8029_v0 = vpop.permute.xlu0 %5324  ;;  %4475 = vmatprep.mubr.msk.bf16.mxu1 %vm1970_vm11, %v3919_v14  ;;  %v3762_v43 = vsel %vm1753_vm6, %v3730_v29, %v5227_v15 }
 0x2ef   : > { %5604 = vrot.lane.b32.xlu1 %v8031_v8, %s5913_s10  ;;  %v3794_v24 = vsel %vm1786_vm7, %v3762_v43, %v5232_v57  ;;  %v5212_v43 = vunpack.i.h.bf16 %v7913_v21 }
 0x2f0   : > { %5579 = vrot.lane.b32.xlu0 %v7942_v5, %s5919_s16  ;;  %v3729_v5 = vsel %vm1720_vm5, %v3697_v50, %v5221_v40  ;;  %v8074_v50 = vpack.i.bf16 %v2446_v38, %v2445_v39  ;;  %v5216_v39 = vunpack.i.l.bf16 %v7922_v17 }
 0x2f1   : > { %v8046_v52 = vpop.permute.xlu1 %5304  ;;  %v3761_v6 = vsel %vm1753_vm6, %v3729_v5, %v5226_v1 }
 0x2f2   : > { %v5330_v42 = vpop.permute.xlu0 %5329  ;;  %v3793_v63 = vsel %vm1786_vm7, %v3761_v6, %v5231_v19  ;;  %v5327_v19 = vunpack.i.h.bf16 %v8029_v0 }
 0x2f3   : > { %5609 = vrot.lane.b32.xlu1 %v8048_v37, %s5914_s11  ;;  %v5332_v32 = vunpack.i.h.bf16 %v5330_v42  ;;  %v5331_v12 = vunpack.i.l.bf16 %v5330_v42 }
 0x2f4   : > { %5589 = vrot.lane.b32.xlu0 %v7949_v36, %s5920_s17 }
 0x2f5   : > { %v8058_v13 = vpop.permute.xlu1 %5309  ;;  %v3826_v11 = vsel %vm1819_vm8, %v3794_v24, %v5332_v32  ;;  %v3825_v62 = vsel %vm1819_vm8, %v3793_v63, %v5331_v12  ;;  %v5211_v32 = vunpack.i.l.bf16 %v7913_v21  ;;  %v5217_v12 = vunpack.i.h.bf16 %v7922_v17 }
 0x2f6   : > { %v5335_v26 = vpop.permute.xlu0 %5334 }
 0x2f7   : > { %v5337_v14 = vunpack.i.h.bf16 %v5335_v26  ;;  %v5336_v41 = vunpack.i.l.bf16 %v5335_v26  ;;  %5614 = vrot.lane.b32.xlu1 %v8060_v4, %s5913_s10  ;;  %v3667_v17 = vsel %vm224_vm0, %v7725_v31, %v5211_v32 }
 0x2f8   : > { %5599 = vrot.lane.b32.xlu0 %v7915_v20, %s5916_s13 }
 0x2f9   : > { %v8072_v60 = vpop.permute.xlu1 %5314  ;;  %v3857_v42 = vsel %vm1852_vm9, %v3825_v62, %v5336_v41  ;;  %v3858_v53 = vsel %vm1852_vm9, %v3826_v11, %v5337_v14  ;;  %v5326_v14 = vunpack.i.l.bf16 %v8029_v0 }
 0x2fa   : > { %v5340_v45 = vpop.permute.xlu0 %5339 }
 0x2fb   : > { %v5342_v30 = vunpack.i.h.bf16 %v5340_v45  ;;  %v5341_v40 = vunpack.i.l.bf16 %v5340_v45  ;;  %5619 = vrot.lane.b32.xlu1 %v8074_v50, %s5914_s11  ;;  %v3668_v45 = vsel %vm224_vm0, %v7728_v59, %v5212_v43  ;;  %s215_s11 = sand.u32 1, %s5902_s19  }
 0x2fc   : > { %5629 = vrot.lane.b32.xlu0 %v7924_v56, %s5917_s14 }
 0x2fd   : > { %v3889_v5 = vsel %vm1885_vm10, %v3857_v42, %v5341_v40  ;;  %v3890_v29 = vsel %vm1885_vm10, %v3858_v53, %v5342_v30  ;;  %v8086_v15 = vpop.permute.xlu1 %5319  ;;  %v5302_v53 = vunpack.i.h.bf16 %v8027_v2 }
 0x2fe   : > { %v5355_v1 = vpop.permute.xlu0 %5354  ;;  %v3920_v61 = vpack.c.bf16 %v3890_v29, %v3889_v5  ;;  %v5301_v5 = vunpack.i.l.bf16 %v8027_v2 }
 0x2ff   : > { %v5357_v26 = vunpack.i.h.bf16 %v5355_v1  ;;  %v5356_v6 = vunpack.i.l.bf16 %v5355_v1  ;;  %5624 = vrot.lane.b32.xlu1 %v7949_v36, %s5917_s14 }
 0x300   : > { %4476 = vmatmul.mubr.msk.bf16.vlgmr.msra.gmra.mrb[0].mxu1 %vm1970_vm11, %v3920_v61  ;;  %5639 = vrot.lane.b32.xlu0 %v7975_v27, %s5918_s15 }
 0x301   : > { %v5345_v38 = vpop.permute.xlu1 %5344  ;;  %v3675_v27 = vsel %vm224_vm0, %v7861_v34, %v5356_v6  ;;  %v3676_v21 = vsel %vm224_vm0, %v7857_v33, %v5357_v26  ;;  %v3699_v33 = vsel %vm1687_vm4, %v3667_v17, %v5216_v39  ;;  %v3700_v34 = vsel %vm1687_vm4, %v3668_v45, %v5217_v12 }
 0x302   : > { %v5360_v57 = vpop.permute.xlu0 %5359  ;;  %v5347_v24 = vunpack.i.h.bf16 %v5345_v38  ;;  %v5346_v36 = vunpack.i.l.bf16 %v5345_v38  ;;  %v3732_v31 = vsel %vm1720_vm5, %v3700_v34, %v5327_v19  ;;  %v3731_v59 = vsel %vm1720_vm5, %v3699_v33, %v5326_v14  ;;  %v8149_v14 = vld [vmem:[#allocation2 + $0x128] sm:$0xff] }
 0x303   : > { %v5362_v41 = vunpack.i.h.bf16 %v5360_v57  ;;  %v5361_v63 = vunpack.i.l.bf16 %v5360_v57  ;;  %5634 = vrot.lane.b32.xlu1 %v7933_v58, %s5918_s15  ;;  %v5307_v26 = vunpack.i.h.bf16 %v8046_v52  ;;  %v5306_v6 = vunpack.i.l.bf16 %v8046_v52 }
 0x304   : > { %5649 = vrot.lane.b32.xlu0 %v7963_v16, %s5919_s16  ;;  %v3764_v29 = vsel %vm1753_vm6, %v3732_v31, %v5347_v24  ;;  %v3763_v58 = vsel %vm1753_vm6, %v3731_v59, %v5346_v36  ;;  %v5312_v39 = vunpack.i.h.bf16 %v8058_v13  ;;  %v5311_v38 = vunpack.i.l.bf16 %v8058_v13  ;;  %v8161_v24 = vld [vmem:[#allocation2 + $0x120] sm:$0xff] }
 0x305   : > { %v8110_v0 = vsel %vm1687_vm4, %v3675_v27, %v5361_v63  ;;  %v8113_v11 = vsel %vm1687_vm4, %v3676_v21, %v5362_v41  ;;  %v5350_v62 = vpop.permute.xlu1 %5349  ;;  %v5317_v57 = vunpack.i.h.bf16 %v8072_v60  ;;  %v5322_v41 = vunpack.i.h.bf16 %v8086_v15 }
 0x306   : > { %v8119_v30 = vpop.permute.xlu0 %5369  ;;  %v5352_v40 = vunpack.i.h.bf16 %v5350_v62  ;;  %v5351_v42 = vunpack.i.l.bf16 %v5350_v62  ;;  %v5321_v63 = vunpack.i.l.bf16 %v8086_v15  ;;  %v5663_v36 = vpack.i.bf16 %v8149_v14, %v8161_v24 }
 0x307   : > { %5644 = vrot.lane.b32.xlu1 %v7915_v20, %s5919_s16  ;;  %v5316_v20 = vunpack.i.l.bf16 %v8072_v60  ;;  %v5287_v33 = vunpack.i.h.bf16 %v8007_v44  ;;  %v5286_v34 = vunpack.i.l.bf16 %v8007_v44  ;;  %v5291_v59 = vunpack.i.l.bf16 %v7987_v3 }
 0x308   : > { %5659 = vrot.lane.b32.xlu0 %v7977_v46, %s5920_s17  ;;  %v3795_v1 = vsel %vm1786_vm7, %v3763_v58, %v5351_v42  ;;  %v3796_v61 = vsel %vm1786_vm7, %v3764_v29, %v5352_v40  ;;  %v8190_v58 = vld [vmem:[#allocation2 + $0x140] sm:$0xff] }
 0x309   : > { %v3827_v2 = vsel %vm1819_vm8, %v3795_v1, %v5301_v5  ;;  %v3828_v43 = vsel %vm1819_vm8, %v3796_v61, %v5302_v53  ;;  %v8137_v32 = vpop.permute.xlu1 %5364  ;;  %v3669_v15 = vsel %vm224_vm0, %v7820_v7, %v5316_v20  ;;  %v5297_v1 = vunpack.i.h.bf16 %v8009_v48 }
 0x30a   : > { %v8139_v12 = vpop.permute.xlu0 %5374  ;;  %v3859_v52 = vsel %vm1852_vm9, %v3827_v2, %v5306_v6  ;;  %v3860_v19 = vsel %vm1852_vm9, %v3828_v43, %v5307_v26  ;;  %v3701_v17 = vsel %vm1687_vm4, %v3669_v15, %v5321_v63  ;;  %v5296_v61 = vunpack.i.l.bf16 %v8009_v48  ;;  %v8198_v6 = vld [vmem:[#allocation2 + $0x138] sm:$0xff] }
 0x30b   : > { %5654 = vrot.lane.b32.xlu1 %v7924_v56, %s5920_s17  ;;  %v3891_v13 = vsel %vm1885_vm10, %v3859_v52, %v5311_v38  ;;  %v3892_v60 = vsel %vm1885_vm10, %v3860_v19, %v5312_v39  ;;  %v3670_v56 = vsel %vm224_vm0, %v7810_v9, %v5317_v57  ;;  %v3733_v9 = vsel %vm1720_vm5, %v3701_v17, %v5286_v34 }
 0x30c   : > { %5669 = vrot.lane.b32.xlu0 %v7963_v16, %s5916_s13  ;;  %v3921_v21 = vpack.c.bf16 %v3892_v60, %v3891_v13  ;;  %v3702_v45 = vsel %vm1687_vm4, %v3670_v56, %v5322_v41  ;;  %v3765_v44 = vsel %vm1753_vm6, %v3733_v9, %v5291_v59  ;;  %v5693_v48 = vpack.i.bf16 %v8190_v58, %v8198_v6 }
 0x30d   : > { %v8157_v27 = vpop.permute.xlu1 %5379  ;;  %v3734_v31 = vsel %vm1720_vm5, %v3702_v45, %v5287_v33  ;;  %v3797_v2 = vsel %vm1786_vm7, %v3765_v44, %v5296_v61  ;;  %v5277_v17 = vunpack.i.h.bf16 %v7959_v49  ;;  %v5282_v45 = vunpack.i.h.bf16 %v7973_v10 }
 0x30e   : > { %v8159_v16 = vpop.permute.xlu0 %5404  ;;  %4479 = vmatprep.mubr.msk.bf16.mxu1 %vm1970_vm11, %v3921_v21  ;;  %v5281_v33 = vunpack.i.l.bf16 %v7973_v10 }
 0x30f   : > { %5664 = vrot.lane.b32.xlu1 %v5663_v36, %s5915_s12  ;;  %v5407_v9 = vunpack.i.h.bf16 %v8159_v16 }
 0x310   : > { %5679 = vrot.lane.b32.xlu0 %v7977_v46, %s5917_s14  ;;  %v5292_v46 = vunpack.i.h.bf16 %v7987_v3 }
 0x311   : > { %v8177_v62 = vpop.permute.xlu1 %5384 }
 0x312   : > { %v5410_v7 = vpop.permute.xlu0 %5409  ;;  %v3766_v53 = vsel %vm1753_vm6, %v3734_v31, %v5292_v46  ;;  %v5406_v31 = vunpack.i.l.bf16 %v8159_v16  ;;  %v3672_v16 = vsel %vm224_vm0, %v7794_v23, %v5277_v17 }
 0x313   : > { %5674 = vrot.lane.b32.xlu1 %v7951_v54, %s5916_s13  ;;  %v5412_v5 = vunpack.i.h.bf16 %v5410_v7  ;;  %v5411_v29 = vunpack.i.l.bf16 %v5410_v7  ;;  %v3798_v43 = vsel %vm1786_vm7, %v3766_v53, %v5297_v1 }
 0x314   : > { %5689 = vrot.lane.b32.xlu0 %v5663_v36, %s5918_s15 }
 0x315   : > { %v8186_v40 = vpop.permute.xlu1 %5389  ;;  %v3830_v57 = vsel %vm1819_vm8, %v3798_v43, %v5412_v5  ;;  %v3829_v20 = vsel %vm1819_vm8, %v3797_v2, %v5411_v29 }
 0x316   : > { %v5415_v42 = vpop.permute.xlu0 %5414 }
 0x317   : > { %v5417_v26 = vunpack.i.h.bf16 %v5415_v42  ;;  %v5416_v3 = vunpack.i.l.bf16 %v5415_v42  ;;  %5684 = vrot.lane.b32.xlu1 %v7961_v22, %s5917_s14  ;;  %v8227_v42 = vld [vmem:[#allocation2 + $0x158] sm:$0xff] }
 0x318   : > { %5699 = vrot.lane.b32.xlu0 %v7951_v54, %s5919_s16 }
 0x319   : > { %v8202_v38 = vpop.permute.xlu1 %5394  ;;  %v3861_v19 = vsel %vm1852_vm9, %v3829_v20, %v5416_v3  ;;  %v3862_v41 = vsel %vm1852_vm9, %v3830_v57, %v5417_v26 }
 0x31a   : > { %v5420_v39 = vpop.permute.xlu0 %5419 }
 0x31b   : > { %v5422_v54 = vunpack.i.h.bf16 %v5420_v39  ;;  %v5421_v52 = vunpack.i.l.bf16 %v5420_v39  ;;  %5694 = vrot.lane.b32.xlu1 %v5693_v48, %s5918_s15  ;;  %v5382_v39 = vunpack.i.h.bf16 %v8157_v27 }
 0x31c   : > { %5709 = vrot.lane.b32.xlu0 %v7961_v22, %s5920_s17  ;;  %v5276_v22 = vunpack.i.l.bf16 %v7959_v49 }
 0x31d   : > { %v3893_v63 = vsel %vm1885_vm10, %v3861_v19, %v5421_v52  ;;  %v3894_v13 = vsel %vm1885_vm10, %v3862_v41, %v5422_v54  ;;  %v8215_v21 = vpop.permute.xlu1 %5399  ;;  %v5387_v19 = vunpack.i.h.bf16 %v8177_v62  ;;  %v5386_v41 = vunpack.i.l.bf16 %v8177_v62 }
 0x31e   : > { %v3922_v60 = vpack.c.bf16 %v3894_v13, %v3893_v63  ;;  %v5435_v36 = vpop.permute.xlu0 %5434  ;;  %v3671_v10 = vsel %vm224_vm0, %v7804_v35, %v5276_v22  ;;  %v5402_v22 = vunpack.i.h.bf16 %v8215_v21 }
 0x31f   : > { %v5437_v15 = vunpack.i.h.bf16 %v5435_v36  ;;  %v5436_v56 = vunpack.i.l.bf16 %v5435_v36  ;;  %5704 = vrot.lane.b32.xlu1 %v8031_v8, %s5919_s16  ;;  %v5391_v36 = vunpack.i.l.bf16 %v8186_v40 }
 0x320   : > { %4480 = vmatmul.mubr.msk.bf16.gmra.mrb[4].mxu1 %vm1970_vm11, %v3922_v60  ;;  %5719 = vrot.lane.b32.xlu0 %v5693_v48, %s5915_s12  ;;  %v5381_v48 = vunpack.i.l.bf16 %v8157_v27 }
 0x321   : > { %v5425_v34 = vpop.permute.xlu1 %5424  ;;  %v3679_v49 = vsel %vm224_vm0, %v7892_v28, %v5436_v56  ;;  %v3680_v44 = vsel %vm224_vm0, %v7888_v18, %v5437_v15  ;;  %v8247_v18 = vld [vmem:[#allocation2 + $0x150] sm:$0xff]  ;;  %v3703_v28 = vsel %vm1687_vm4, %v3671_v10, %v5281_v33  ;;  %v5397_v15 = vunpack.i.h.bf16 %v8202_v38 }
 0x322   : > { %v5440_v7 = vpop.permute.xlu0 %5439  ;;  %v5427_v53 = vunpack.i.h.bf16 %v5425_v34  ;;  %v5426_v5 = vunpack.i.l.bf16 %v5425_v34  ;;  %v5723_v23 = vpack.i.bf16 %v8227_v42, %v8247_v18  ;;  %v3735_v3 = vsel %vm1720_vm5, %v3703_v28, %v5406_v31 }
 0x323   : > { %v5442_v46 = vunpack.i.h.bf16 %v5440_v7  ;;  %v5441_v59 = vunpack.i.l.bf16 %v5440_v7  ;;  %5714 = vrot.lane.b32.xlu1 %v8048_v37, %s5920_s17  ;;  %v5396_v56 = vunpack.i.l.bf16 %v8202_v38  ;;  %v3674_v31 = vsel %vm224_vm0, %v7865_v55, %v5397_v15 }
 0x324   : > { %5729 = vrot.lane.b32.xlu0 %v8031_v8, %s5916_s13  ;;  %v3704_v8 = vsel %vm1687_vm4, %v3672_v16, %v5282_v45  ;;  %v3767_v20 = vsel %vm1753_vm6, %v3735_v3, %v5426_v5  ;;  %v5401_v45 = vunpack.i.l.bf16 %v8215_v21  ;;  %v8298_v21 = vld [vmem:[#allocation2 + $0x170] sm:$0xff]  ;;  %v5372_v16 = vunpack.i.h.bf16 %v8119_v30 }
 0x325   : > { %v8240_v29 = vsel %vm1687_vm4, %v3679_v49, %v5441_v59  ;;  %v8243_v1 = vsel %vm1687_vm4, %v3680_v44, %v5442_v46  ;;  %v5430_v61 = vpop.permute.xlu1 %5429  ;;  %v3736_v26 = vsel %vm1720_vm5, %v3704_v8, %v5407_v9  ;;  %v3673_v9 = vsel %vm224_vm0, %v7869_v51, %v5396_v56 }
 0x326   : > { %v8251_v35 = vpop.permute.xlu0 %5449  ;;  %v5432_v2 = vunpack.i.h.bf16 %v5430_v61  ;;  %v5431_v43 = vunpack.i.l.bf16 %v5430_v61  ;;  %v3768_v57 = vsel %vm1753_vm6, %v3736_v26, %v5427_v53  ;;  %v3705_v46 = vsel %vm1687_vm4, %v3673_v9, %v5401_v45  ;;  %v8308_v53 = vld [vmem:[#allocation2 + $0x168] sm:$0xff] }
 0x327   : > { %5724 = vrot.lane.b32.xlu1 %v5723_v23, %s5915_s12  ;;  %v3706_v59 = vsel %vm1687_vm4, %v3674_v31, %v5402_v22  ;;  %v5367_v49 = vunpack.i.h.bf16 %v8137_v32  ;;  %v5366_v51 = vunpack.i.l.bf16 %v8137_v32  ;;  %v5371_v28 = vunpack.i.l.bf16 %v8119_v30  ;;  %v2509_v9 = vld [vmem:[#allocation2 + $0x181] sm:$0xff]  ;;  %v2371_v31 = vld [vmem:[#allocation2 + $0xf0] sm:$0xff] }
 0x328   : > { %5739 = vrot.lane.b32.xlu0 %v8048_v37, %s5917_s14  ;;  %v3799_v54 = vsel %vm1786_vm7, %v3767_v20, %v5431_v43  ;;  %v3800_v52 = vsel %vm1786_vm7, %v3768_v57, %v5432_v2  ;;  %v5392_v37 = vunpack.i.h.bf16 %v8186_v40  ;;  %v5377_v2 = vunpack.i.h.bf16 %v8139_v12 }
 0x329   : > { %v3831_v63 = vsel %vm1819_vm8, %v3799_v54, %v5381_v48  ;;  %v3832_v27 = vsel %vm1819_vm8, %v3800_v52, %v5382_v39  ;;  %v8270_v13 = vpop.permute.xlu1 %5444  ;;  %v3737_v5 = vsel %vm1720_vm5, %v3705_v46, %v5366_v51  ;;  %v3738_v10 = vsel %vm1720_vm5, %v3706_v59, %v5367_v49  ;;  %v2372_v46 = vld [vmem:[#allocation2 + $0xf8] sm:$0xff] }
 0x32a   : > { %v8272_v60 = vpop.permute.xlu0 %5454  ;;  %v3863_v62 = vsel %vm1852_vm9, %v3831_v63, %v5386_v41  ;;  %v3864_v17 = vsel %vm1852_vm9, %v3832_v27, %v5387_v19  ;;  %v3769_v61 = vsel %vm1753_vm6, %v3737_v5, %v5371_v28  ;;  %v5376_v43 = vunpack.i.l.bf16 %v8139_v12  ;;  %v2478_v27 = vld [vmem:[#allocation2 + $0x188] sm:$0xff] }
 0x32b   : > { %5734 = vrot.lane.b32.xlu1 %v7989_v47, %s5916_s13  ;;  %v3895_v33 = vsel %vm1885_vm10, %v3863_v62, %v5391_v36  ;;  %v3896_v40 = vsel %vm1885_vm10, %v3864_v17, %v5392_v37  ;;  %v2477_v17 = vld [vmem:[#allocation2 + $0x180] sm:$0xff] }
 0x32c   : > { %5749 = vrot.lane.b32.xlu0 %v5723_v23, %s5918_s15  ;;  %v3923_v7 = vpack.c.bf16 %v3896_v40, %v3895_v33  ;;  %v3770_v23 = vsel %vm1753_vm6, %v3738_v10, %v5372_v16  ;;  %v3801_v30 = vsel %vm1786_vm7, %v3769_v61, %v5376_v43  ;;  %v5783_v22 = vpack.i.bf16 %v2478_v27, %v2477_v17  ;;  %v2541_v5 = vld [vmem:[#allocation2 + $0x182] sm:$0xff]  ;;  %v2542_v10 = vld [vmem:[#allocation2 + $0x18a] sm:$0xff]  ;;  %v2573_v61 = vld [vmem:[#allocation2 + $0x198] sm:$0xff] }
 0x32d   : > { %v8287_v34 = vpop.permute.xlu1 %5459  ;;  %v3802_v48 = vsel %vm1786_vm7, %v3770_v23, %v5377_v2  ;;  %v2574_v23 = vld [vmem:[#allocation2 + $0x1a0] sm:$0xff] }
 0x32e   : > { %v8289_v38 = vpop.permute.xlu0 %5479  ;;  %4483 = vmatprep.mubr.msk.bf16.mxu1 %vm1970_vm11, %v3923_v7 }
 0x32f   : > { %5744 = vrot.lane.b32.xlu1 %v8003_v25, %s5917_s14 }
 0x330   : > { %5759 = vrot.lane.b32.xlu0 %v7989_v47, %s5919_s16  ;;  %v5753_v47 = vpack.i.bf16 %v8298_v21, %v8308_v53 }
 0x331   : > { %v8306_v44 = vpop.permute.xlu1 %5464 }
 0x332   : > { %v5485_v55 = vpop.permute.xlu0 %5484 }
 0x333   : > { %5754 = vrot.lane.b32.xlu1 %v5753_v47, %s5918_s15  ;;  %v5487_v26 = vunpack.i.h.bf16 %v5485_v55  ;;  %v5486_v3 = vunpack.i.l.bf16 %v5485_v55 }
 0x334   : > { %5769 = vrot.lane.b32.xlu0 %v8003_v25, %s5920_s17 }
 0x335   : > { %v8319_v8 = vpop.permute.xlu1 %5469  ;;  %v3834_v54 = vsel %vm1819_vm8, %v3802_v48, %v5487_v26  ;;  %v3833_v52 = vsel %vm1819_vm8, %v3801_v30, %v5486_v3  ;;  %v5803_v26 = vpack.i.bf16 %v2542_v10, %v2541_v5  ;;  %v5813_v3 = vpack.i.bf16 %v2574_v23, %v2573_v61 }
 0x336   : > { %v5490_v32 = vpop.permute.xlu0 %5489  ;;  %v5467_v23 = vunpack.i.h.bf16 %v8306_v44 }
 0x337   : > { %v5492_v25 = vunpack.i.h.bf16 %v5490_v32  ;;  %v5491_v39 = vunpack.i.l.bf16 %v5490_v32  ;;  %5764 = vrot.lane.b32.xlu1 %v8060_v4, %s5919_s16 }
 0x338   : > { %5779 = vrot.lane.b32.xlu0 %v5753_v47, %s5915_s12 }
 0x339   : > { %v8330_v20 = vpop.permute.xlu1 %5474  ;;  %v3865_v41 = vsel %vm1852_vm9, %v3833_v52, %v5491_v39  ;;  %v3866_v63 = vsel %vm1852_vm9, %v3834_v54, %v5492_v25  ;;  %v2605_v25 = vld [vmem:[#allocation2 + $0x199] sm:$0xff]  ;;  %v2606_v39 = vld [vmem:[#allocation2 + $0x1a1] sm:$0xff] }
 0x33a   : > { %v5495_v57 = vpop.permute.xlu0 %5494  ;;  %v5823_v30 = vpack.i.bf16 %v2606_v39, %v2605_v25  ;;  %v2637_v54 = vld [vmem:[#allocation2 + $0x19a] sm:$0xff]  ;;  %v2638_v52 = vld [vmem:[#allocation2 + $0x1a2] sm:$0xff]  ;;  %v5476_v5 = vunpack.i.l.bf16 %v8330_v20  ;;  %v2366_v25 = vld [vmem:[#allocation2 + $0xb0] sm:$0xff] }
 0x33b   : > { %v5497_v19 = vunpack.i.h.bf16 %v5495_v57  ;;  %v5496_v12 = vunpack.i.l.bf16 %v5495_v57  ;;  %5774 = vrot.lane.b32.xlu1 %v8074_v50, %s5920_s17 }
 0x33c   : > { %5789 = vrot.lane.b32.xlu0 %v8060_v4, %s5916_s13  ;;  %v2510_v4 = vld [vmem:[#allocation2 + $0x189] sm:$0xff] }
 0x33d   : > { %v3897_v37 = vsel %vm1885_vm10, %v3865_v41, %v5496_v12  ;;  %v3898_v36 = vsel %vm1885_vm10, %v3866_v63, %v5497_v19  ;;  %v8342_v56 = vpop.permute.xlu1 %5499  ;;  %v5793_v51 = vpack.i.bf16 %v2510_v4, %v2509_v9  ;;  %v5482_v19 = vunpack.i.h.bf16 %v8289_v38 }
 0x33e   : > { %v3924_v15 = vpack.c.bf16 %v3898_v36, %v3897_v37  ;;  %v5510_v62 = vpop.permute.xlu0 %5509  ;;  %v5481_v12 = vunpack.i.l.bf16 %v8289_v38  ;;  %v5502_v27 = vunpack.i.h.bf16 %v8342_v56  ;;  %v5501_v37 = vunpack.i.l.bf16 %v8342_v56 }
 0x33f   : > { %v5512_v45 = vunpack.i.h.bf16 %v5510_v62  ;;  %v5511_v33 = vunpack.i.l.bf16 %v5510_v62  ;;  %5784 = vrot.lane.b32.xlu1 %v5783_v22, %s5915_s12  ;;  %v5833_v36 = vpack.i.bf16 %v2638_v52, %v2637_v54  ;;  %v3740_v4 = vsel %vm1720_vm5, %v8113_v11, %v5482_v19 }
 0x340   : > { %4484 = vmatmul.mubr.msk.bf16.gmra.mrb[8].mxu1 %vm1970_vm11, %v3924_v15  ;;  %5799 = vrot.lane.b32.xlu0 %v8074_v50, %s5917_s14  ;;  %v3739_v38 = vsel %vm1720_vm5, %v8110_v0, %v5481_v12  ;;  %v3772_v9 = vsel %vm1753_vm6, %v3740_v4, %v5502_v27 }
 0x341   : > { %v5505_v40 = vpop.permute.xlu1 %5504  ;;  %v3683_v55 = vsel %vm224_vm0, %v2371_v31, %v5511_v33  ;;  %v3684_v47 = vsel %vm224_vm0, %v2372_v46, %v5512_v45 }
 0x342   : > { %v5515_v7 = vpop.permute.xlu0 %5514  ;;  %v5507_v15 = vunpack.i.h.bf16 %v5505_v40  ;;  %v5506_v62 = vunpack.i.l.bf16 %v5505_v40  ;;  %v3771_v40 = vsel %vm1753_vm6, %v3739_v38, %v5501_v37  ;;  %v5447_v37 = vunpack.i.h.bf16 %v8270_v13 }
 0x343   : > { %v5517_v59 = vunpack.i.h.bf16 %v5515_v7  ;;  %v5516_v49 = vunpack.i.l.bf16 %v5515_v7  ;;  %5794 = vrot.lane.b32.xlu1 %v5793_v51, %s5916_s13 }
 0x344   : > { %5809 = vrot.lane.b32.xlu0 %v5783_v22, %s5918_s15  ;;  %v3803_v0 = vsel %vm1786_vm7, %v3771_v40, %v5506_v62  ;;  %v3804_v11 = vsel %vm1786_vm7, %v3772_v9, %v5507_v15  ;;  %v5451_v9 = vunpack.i.l.bf16 %v8251_v35 }
 0x345   : > { %v8352_v50 = vsel %vm1687_vm4, %v3683_v55, %v5516_v49  ;;  %v8355_v16 = vsel %vm1687_vm4, %v3684_v47, %v5517_v59  ;;  %v8358_v28 = vpop.permute.xlu1 %5519  ;;  %v5461_v49 = vunpack.i.l.bf16 %v8287_v34  ;;  %v5471_v55 = vunpack.i.l.bf16 %v8319_v8 }
 0x346   : > { %v8360_v32 = vpop.permute.xlu0 %5534  ;;  %v5477_v47 = vunpack.i.h.bf16 %v8330_v20 }
 0x347   : > { %5804 = vrot.lane.b32.xlu1 %v5803_v26, %s5917_s14  ;;  %v3835_v10 = vsel %vm1819_vm8, %v3803_v0, %v5461_v49  ;;  %s4327_s14 = sshll.u32 %s215_s11, 8 }
 0x348   : > { %5819 = vrot.lane.b32.xlu0 %v5793_v51, %s5919_s16  ;;  %v5472_v51 = vunpack.i.h.bf16 %v8319_v8 }
 0x349   : > { %v8366_v43 = vpop.permute.xlu1 %5524 }
 0x34a   : > { %v8364_v2 = vpop.permute.xlu0 %5539  ;;  %v3678_v8 = vsel %vm224_vm0, %v2366_v25, %v5472_v51 }
 0x34b   : > { %5814 = vrot.lane.b32.xlu1 %v5813_v3, %s5918_s15  ;;  %v2365_v3 = vld [vmem:[#allocation2 + $0xa8] sm:$0xff]  ;;  %v5542_v49 = vunpack.i.h.bf16 %v8364_v2  ;;  %s8634_s15 = scalar_lea.vmem [#allocation3], %s4327_s14 }
 0x34c   : > { %5829 = vrot.lane.b32.xlu0 %v5803_v26, %s5920_s17  ;;  %v5466_v26 = vunpack.i.l.bf16 %v8306_v44  ;;  %v3710_v44 = vsel %vm1687_vm4, %v3678_v8, %v5477_v47 }
 0x34d   : > { %v8370_v48 = vpop.permute.xlu1 %5529  ;;  %v3742_v38 = vsel %vm1720_vm5, %v3710_v44, %v5447_v37 }
 0x34e   : > { %v5545_v57 = vpop.permute.xlu0 %5544  ;;  %v3867_v20 = vsel %vm1852_vm9, %v3835_v10, %v5466_v26 }
 0x34f   : > { %v5547_v41 = vunpack.i.h.bf16 %v5545_v57  ;;  %v5546_v63 = vunpack.i.l.bf16 %v5545_v57  ;;  %5824 = vrot.lane.b32.xlu1 %v5823_v30, %s5919_s16  ;;  %v3677_v30 = vsel %vm224_vm0, %v2365_v3, %v5471_v55  ;;  %v5457_v55 = vunpack.i.h.bf16 %v8272_v60  ;;  %s4380_s16 = sshll.u32 %s5974_s22, 12  ;;  %s8763_s22 = scalar_lea.sflag [#allocation4], %s215_s11 }
 0x350   : > { %s8754_s8 = scalar_lea.hbm %s8810_s5, %s4380_s16 }
 0x351   : > { %v8377_v22 = vpop.permute.xlu1 %5554  ;;  %v3687_v7 = vsel %vm224_vm0, %v8161_v24, %v5546_v63  ;;  %v3688_v56 = vsel %vm224_vm0, %v8149_v14, %v5547_v41  ;;  %v5462_v14 = vunpack.i.h.bf16 %v8287_v34  ;;  %v3709_v41 = vsel %vm1687_vm4, %v3677_v30, %v5476_v5 }
 0x352   : > { %v5550_v17 = vpop.permute.xlu0 %5549 }
 0x353   : > { %v5552_v45 = vunpack.i.h.bf16 %v5550_v17  ;;  %v5551_v33 = vunpack.i.l.bf16 %v5550_v17  ;;  %5834 = vrot.lane.b32.xlu1 %v5833_v36, %s5920_s17  ;;  %v3836_v61 = vsel %vm1819_vm8, %v3804_v11, %v5462_v14  ;;  %v5446_v36 = vunpack.i.l.bf16 %v8270_v13  ;;  %s4261_s17 = sshll.u32 %s8634_s15, 4  ;;  %s8757_s17 = int_to_ptr.vmem [resolvable:$true] %s4261_s17 }
 0x354   : > { %v3868_v52 = vsel %vm1852_vm9, %v3836_v61, %v5467_v23  ;;  %v5452_v13 = vunpack.i.h.bf16 %v8251_v35  ;;  %v5456_v35 = vunpack.i.l.bf16 %v8272_v60  ;;  %s5848_s9 = scalar_lea.vmem %s8757_s17, 4096  ;;  %p5855_p0 = scmp.lt.s32.totalorder %s8757_s17, %s5853_s25 }
 0x355   : > { %v8390_v31 = vsel %vm1687_vm4, %v3687_v7, %v5551_v33  ;;  %v8393_v46 = vsel %vm1687_vm4, %v3688_v56, %v5552_v45  ;;  %v8400_v59 = vpop.permute.xlu1 %5559  ;;  %v3741_v4 = vsel %vm1720_vm5, %v3709_v41, %v5446_v36  ;;  %p5849_p11 = scmp.ne.s32.totalorder %s8757_s17, %s5848_s9  ;;  %p5856_p1 = scmp.lt.s32.totalorder %s5854_s26, %s5848_s9 }
 0x356   : > { %v8398_v24 = vpop.permute.xlu0 %5564  ;;  %v3773_v14 = vsel %vm1753_vm6, %v3741_v4, %v5451_v9  ;;  %v5526_v4 = vunpack.i.l.bf16 %v8366_v43 }
 0x357   : > { %v3805_v23 = vsel %vm1786_vm7, %v3773_v14, %v5456_v35  ;;  %p5850_p12 = pnand %p5849_p11, %p5991_p5  ;;  %p5857_p2 = por %p5856_p1, %p5855_p0 }
 0x359   : > { %v5585_v39 = vpop.permute.xlu1 %5584  ;;  %p5851_p13 = pneg %p5850_p12 }
 0x35a   : > { %v5570_v34 = vpop.permute.xlu0 %5569  ;;  %v5587_v57 = vunpack.i.h.bf16 %v5585_v39  ;;  %v5586_v54 = vunpack.i.l.bf16 %v5585_v39 }
 0x35b   : > { %v5572_v19 = vunpack.i.h.bf16 %v5570_v34  ;;  %v5571_v12 = vunpack.i.l.bf16 %v5570_v34  ;;  %p5858_p3 = pnand %p5857_p2, %p5851_p13 }
 0x35c   : > { %v3900_v63 = vsel %vm1885_vm10, %v3868_v52, %v5587_v57  ;;  %v3899_v27 = vsel %vm1885_vm10, %v3867_v20, %v5586_v54 }
 0x35d   : > { %v3925_v15 = vpack.c.bf16 %v3900_v63, %v3899_v27  ;;  %v8422_v62 = vpop.permute.xlu1 %5594  ;;  %v3691_v7 = vsel %vm224_vm0, %v8247_v18, %v5571_v12  ;;  %v3692_v56 = vsel %vm224_vm0, %v8227_v42, %v5572_v19  ;;  %v3774_v18 = vsel %vm1753_vm6, %v3742_v38, %v5452_v13 }
 0x35e   : > { %v5575_v17 = vpop.permute.xlu0 %5574  ;;  %v5541_v42 = vunpack.i.l.bf16 %v8364_v2  ;;  %v3806_v26 = vsel %vm1786_vm7, %v3774_v18, %v5457_v55  ;;  %v5531_v13 = vunpack.i.l.bf16 %v8370_v48 }
 0x35f   : > { %v5577_v45 = vunpack.i.h.bf16 %v5575_v17  ;;  %v5576_v33 = vunpack.i.l.bf16 %v5575_v17  ;;  %4487 = vmatprep.mubr.msk.bf16.mxu1 %vm1970_vm11, %v3925_v15  ;;  %v3838_v25 = vsel %vm1819_vm8, %v3806_v26, %v5542_v49  ;;  %v5536_v49 = vunpack.i.l.bf16 %v8360_v32 }
 0x360   : > { %v3837_v39 = vsel %vm1819_vm8, %v3805_v23, %v5541_v42  ;;  %v2370_v42 = vld [vmem:[#allocation2 + $0xe0] sm:$0xff] }
 0x361   : > { %v8434_v40 = vsel %vm1687_vm4, %v3691_v7, %v5576_v33  ;;  %v8437_v0 = vsel %vm1687_vm4, %v3692_v56, %v5577_v45  ;;  %v5605_v51 = vpop.permute.xlu1 %5604  ;;  %v5527_v33 = vunpack.i.h.bf16 %v8366_v43  ;;  %v5532_v56 = vunpack.i.h.bf16 %v8370_v48 }
 0x362   : > { %v5580_v11 = vpop.permute.xlu0 %5579  ;;  %v5607_v10 = vunpack.i.h.bf16 %v5605_v51  ;;  %v5606_v61 = vunpack.i.l.bf16 %v5605_v51  ;;  %v5537_v43 = vunpack.i.h.bf16 %v8360_v32  ;;  %v3743_v26 = vsel %vm1720_vm5, %v8240_v29, %v5536_v49 }
 0x363   : > { %v5582_v47 = vunpack.i.h.bf16 %v5580_v11  ;;  %v5581_v5 = vunpack.i.l.bf16 %v5580_v11  ;;  %v3682_v51 = vsel %vm224_vm0, %v2370_v42, %v5527_v33 }
 0x364   : > { %v3689_v20 = vsel %vm224_vm0, %v8198_v6, %v5606_v61  ;;  %v3690_v52 = vsel %vm224_vm0, %v8190_v58, %v5607_v10  ;;  %v3714_v55 = vsel %vm1687_vm4, %v3682_v51, %v5532_v56  ;;  %v5522_v10 = vunpack.i.h.bf16 %v8358_v28 }
 0x365   : > { %v5610_v30 = vpop.permute.xlu1 %5609  ;;  %v3870_v8 = vsel %vm1852_vm9, %v3838_v25, %v5582_v47  ;;  %v3869_v60 = vsel %vm1852_vm9, %v3837_v39, %v5581_v5  ;;  %v5521_v61 = vunpack.i.l.bf16 %v8358_v28  ;;  %v3744_v32 = vsel %vm1720_vm5, %v8243_v1, %v5537_v43 }
 0x366   : > { %v5590_v3 = vpop.permute.xlu0 %5589  ;;  %v5612_v57 = vunpack.i.h.bf16 %v5610_v30  ;;  %v5611_v54 = vunpack.i.l.bf16 %v5610_v30  ;;  %v5597_v39 = vunpack.i.h.bf16 %v8422_v62  ;;  %v3746_v30 = vsel %vm1720_vm5, %v3714_v55, %v5522_v10 }
 0x367   : > { %v5592_v34 = vunpack.i.h.bf16 %v5590_v3  ;;  %v5591_v2 = vunpack.i.l.bf16 %v5590_v3 }
 0x368   : > { %v8458_v44 = vsel %vm1687_vm4, %v3689_v20, %v5611_v54  ;;  %v8461_v63 = vsel %vm1687_vm4, %v3690_v52, %v5612_v57 }
 0x369   : > { %v3901_v19 = vsel %vm1885_vm10, %v3869_v60, %v5591_v2  ;;  %v3902_v12 = vsel %vm1885_vm10, %v3870_v8, %v5592_v34  ;;  %v5615_v37 = vpop.permute.xlu1 %5614  ;;  %v5596_v34 = vunpack.i.l.bf16 %v8422_v62 }
 0x36a   : > { %v3926_v41 = vpack.c.bf16 %v3902_v12, %v3901_v19  ;;  %v5600_v27 = vpop.permute.xlu0 %5599  ;;  %v5617_v36 = vunpack.i.h.bf16 %v5615_v37  ;;  %v5616_v6 = vunpack.i.l.bf16 %v5615_v37 }
 0x36b   : > { %v5602_v35 = vunpack.i.h.bf16 %v5600_v27  ;;  %v5601_v47 = vunpack.i.l.bf16 %v5600_v27 }
 0x36c   : > { %4488 = vmatmul.mubr.msk.bf16.gmra.mrb[12].mxu1 %vm1970_vm11, %v3926_v41  ;;  %v3693_v38 = vsel %vm224_vm0, %v8308_v53, %v5616_v6  ;;  %v3694_v7 = vsel %vm224_vm0, %v8298_v21, %v5617_v36  ;;  %v2369_v53 = vld [vmem:[#allocation2 + $0xd8] sm:$0xff] }
 0x36d   : > { %v5620_v17 = vpop.permute.xlu1 %5619  ;;  %v3681_v21 = vsel %vm224_vm0, %v2369_v53, %v5526_v4  ;;  %v3778_v8 = vsel %vm1753_vm6, %v3746_v30, %v5602_v35 }
 0x36e   : > { %v5630_v15 = vpop.permute.xlu0 %5629  ;;  %v5622_v58 = vunpack.i.h.bf16 %v5620_v17  ;;  %v5621_v45 = vunpack.i.l.bf16 %v5620_v17  ;;  %v3713_v48 = vsel %vm1687_vm4, %v3681_v21, %v5531_v13  ;;  %v3776_v17 = vsel %vm1753_vm6, %v3744_v32, %v5597_v39 }
 0x36f   : > { %v5632_v3 = vunpack.i.h.bf16 %v5630_v15  ;;  %v5631_v25 = vunpack.i.l.bf16 %v5630_v15  ;;  %v3745_v2 = vsel %vm1720_vm5, %v3713_v48, %v5521_v61 }
 0x370   : > { %v8473_v9 = vsel %vm1687_vm4, %v3693_v38, %v5621_v45  ;;  %v8476_v11 = vsel %vm1687_vm4, %v3694_v7, %v5622_v58  ;;  %v3777_v28 = vsel %vm1753_vm6, %v3745_v2, %v5601_v47  ;;  %v3775_v58 = vsel %vm1753_vm6, %v3743_v26, %v5596_v34 }
 0x371   : > { %v5625_v18 = vpop.permute.xlu1 %5624  ;;  %v3809_v12 = vsel %vm1786_vm7, %v3777_v28, %v5631_v25  ;;  %v3810_v62 = vsel %vm1786_vm7, %v3778_v8, %v5632_v3  ;;  %v5567_v26 = vunpack.i.h.bf16 %v8398_v24  ;;  %v5566_v3 = vunpack.i.l.bf16 %v8398_v24 }
 0x372   : > { %v5640_v14 = vpop.permute.xlu0 %5639  ;;  %v5627_v54 = vunpack.i.h.bf16 %v5625_v18  ;;  %v5626_v20 = vunpack.i.l.bf16 %v5625_v18 }
 0x373   : > { %v5642_v60 = vunpack.i.h.bf16 %v5640_v14  ;;  %v5641_v57 = vunpack.i.l.bf16 %v5640_v14 }
 0x374   : > { %v3808_v38 = vsel %vm1786_vm7, %v3776_v17, %v5627_v54  ;;  %v3807_v7 = vsel %vm1786_vm7, %v3775_v58, %v5626_v20 }
 0x375   : > { %v5635_v23 = vpop.permute.xlu1 %5634  ;;  %v3841_v45 = vsel %vm1819_vm8, %v3809_v12, %v5641_v57  ;;  %v3842_v33 = vsel %vm1819_vm8, %v3810_v62, %v5642_v60  ;;  %v3748_v57 = vsel %vm1720_vm5, %v8355_v16, %v5567_v26 }
 0x376   : > { %v5650_v5 = vpop.permute.xlu0 %5649  ;;  %v5637_v41 = vunpack.i.h.bf16 %v5635_v23  ;;  %v5636_v27 = vunpack.i.l.bf16 %v5635_v23 }
 0x377   : > { %v5652_v29 = vunpack.i.h.bf16 %v5650_v5  ;;  %v5651_v52 = vunpack.i.l.bf16 %v5650_v5 }
 0x378   : > { %v3839_v18 = vsel %vm1819_vm8, %v3807_v7, %v5636_v27  ;;  %v3840_v43 = vsel %vm1819_vm8, %v3808_v38, %v5637_v41  ;;  %v2373_v38 = vld [vmem:[#allocation2 + $0x108] sm:$0xff]  ;;  %v2374_v7 = vld [vmem:[#allocation2 + $0x110] sm:$0xff] }
 0x379   : > { %v5645_v19 = vpop.permute.xlu1 %5644  ;;  %v3873_v56 = vsel %vm1852_vm9, %v3841_v45, %v5651_v52  ;;  %v3874_v13 = vsel %vm1852_vm9, %v3842_v33, %v5652_v29  ;;  %v5557_v52 = vunpack.i.h.bf16 %v8377_v22 }
 0x37a   : > { %v5660_v1 = vpop.permute.xlu0 %5659  ;;  %v5647_v6 = vunpack.i.h.bf16 %v5645_v19  ;;  %v5646_v15 = vunpack.i.l.bf16 %v5645_v19  ;;  %v5556_v19 = vunpack.i.l.bf16 %v8377_v22 }
 0x37b   : > { %v5662_v37 = vunpack.i.h.bf16 %v5660_v1  ;;  %v5661_v36 = vunpack.i.l.bf16 %v5660_v1  ;;  %v3747_v1 = vsel %vm1720_vm5, %v8352_v50, %v5566_v3 }
 0x37c   : > { %v3871_v51 = vsel %vm1852_vm9, %v3839_v18, %v5646_v15  ;;  %v3872_v48 = vsel %vm1852_vm9, %v3840_v43, %v5647_v6  ;;  %v5562_v6 = vunpack.i.h.bf16 %v8400_v59  ;;  %v5561_v15 = vunpack.i.l.bf16 %v8400_v59 }
 0x37d   : > { %v5655_v14 = vpop.permute.xlu1 %5654  ;;  %v3905_v42 = vsel %vm1885_vm10, %v3873_v56, %v5661_v36  ;;  %v3906_v21 = vsel %vm1885_vm10, %v3874_v13, %v5662_v37  ;;  %v3685_v43 = vsel %vm224_vm0, %v2373_v38, %v5556_v19  ;;  %v3686_v59 = vsel %vm224_vm0, %v2374_v7, %v5557_v52 }
 0x37e   : > { %v5670_v4 = vpop.permute.xlu0 %5669  ;;  %v5657_v49 = vunpack.i.h.bf16 %v5655_v14  ;;  %v5656_v53 = vunpack.i.l.bf16 %v5655_v14  ;;  %v3928_v61 = vpack.c.bf16 %v3906_v21, %v3905_v42  ;;  %v3717_v21 = vsel %vm1687_vm4, %v3685_v43, %v5561_v15 }
 0x37f   : > { %v5672_v25 = vunpack.i.h.bf16 %v5670_v4  ;;  %v5671_v39 = vunpack.i.l.bf16 %v5670_v4 }
 0x380   : > { %v3903_v55 = vsel %vm1885_vm10, %v3871_v51, %v5656_v53  ;;  %v3904_v35 = vsel %vm1885_vm10, %v3872_v48, %v5657_v49  ;;  %v3718_v51 = vsel %vm1687_vm4, %v3686_v59, %v5562_v6 }
 0x381   : > { %v3927_v5 = vpack.c.bf16 %v3904_v35, %v3903_v55  ;;  %v5665_v10 = vpop.permute.xlu1 %5664  ;;  %v3780_v29 = vsel %vm1753_vm6, %v3748_v57, %v5672_v25  ;;  %v3779_v24 = vsel %vm1753_vm6, %v3747_v1, %v5671_v39 }
 0x382   : > { %v5680_v47 = vpop.permute.xlu0 %5679  ;;  %v5667_v58 = vunpack.i.h.bf16 %v5665_v10  ;;  %v5666_v45 = vunpack.i.l.bf16 %v5665_v10 }
 0x383   : > { %4491 = vmatprep.mubr.msk.bf16.mxu1 %vm1970_vm11, %v3927_v5  ;;  %v5682_v34 = vunpack.i.h.bf16 %v5680_v47  ;;  %v5681_v2 = vunpack.i.l.bf16 %v5680_v47 }
 0x384   : > { %4492 = vmatmul.mubr.msk.bf16.gmra.mrb[16].mxu1 %vm1970_vm11, %v3928_v61  ;;  %v3750_v35 = vsel %vm1720_vm5, %v3718_v51, %v5667_v58  ;;  %v3749_v47 = vsel %vm1720_vm5, %v3717_v21, %v5666_v45 }
 0x385   : > { %v5675_v32 = vpop.permute.xlu1 %5674  ;;  %v3811_v12 = vsel %vm1786_vm7, %v3779_v24, %v5681_v2  ;;  %v3812_v62 = vsel %vm1786_vm7, %v3780_v29, %v5682_v34 }
 0x386   : > { %v5690_v23 = vpop.permute.xlu0 %5689  ;;  %v5677_v56 = vunpack.i.h.bf16 %v5675_v32  ;;  %v5676_v13 = vunpack.i.l.bf16 %v5675_v32 }
 0x387   : > { %v5692_v8 = vunpack.i.h.bf16 %v5690_v23  ;;  %v5691_v28 = vunpack.i.l.bf16 %v5690_v23 }
 0x388   : > { %v3781_v61 = vsel %vm1753_vm6, %v3749_v47, %v5676_v13  ;;  %v3782_v23 = vsel %vm1753_vm6, %v3750_v35, %v5677_v56 }
 0x389   : > { %v5685_v60 = vpop.permute.xlu1 %5684  ;;  %v3843_v16 = vsel %vm1819_vm8, %v3811_v12, %v5691_v28  ;;  %v3844_v27 = vsel %vm1819_vm8, %v3812_v62, %v5692_v8 }
 0x38a   : > { %v5700_v30 = vpop.permute.xlu0 %5699  ;;  %v5687_v49 = vunpack.i.h.bf16 %v5685_v60  ;;  %v5686_v53 = vunpack.i.l.bf16 %v5685_v60 }
 0x38b   : > { %v5702_v54 = vunpack.i.h.bf16 %v5700_v30  ;;  %v5701_v20 = vunpack.i.l.bf16 %v5700_v30 }
 0x38c   : > { %v3813_v26 = vsel %vm1786_vm7, %v3781_v61, %v5686_v53  ;;  %v3814_v3 = vsel %vm1786_vm7, %v3782_v23, %v5687_v49 }
 0x38d   : > { %v5695_v36 = vpop.permute.xlu1 %5694  ;;  %v3875_v17 = vsel %vm1852_vm9, %v3843_v16, %v5701_v20  ;;  %v3876_v22 = vsel %vm1852_vm9, %v3844_v27, %v5702_v54 }
 0x38e   : > { %v5710_v41 = vpop.permute.xlu0 %5709  ;;  %v5697_v48 = vunpack.i.h.bf16 %v5695_v36  ;;  %v5696_v55 = vunpack.i.l.bf16 %v5695_v36 }
 0x38f   : > { %v5712_v50 = vunpack.i.h.bf16 %v5710_v41  ;;  %v5711_v37 = vunpack.i.l.bf16 %v5710_v41 }
 0x390   : > { %v3845_v39 = vsel %vm1819_vm8, %v3813_v26, %v5696_v55  ;;  %v3846_v34 = vsel %vm1819_vm8, %v3814_v3, %v5697_v48 }
 0x391   : > { %v3907_v33 = vsel %vm1885_vm10, %v3875_v17, %v5711_v37  ;;  %v3908_v4 = vsel %vm1885_vm10, %v3876_v22, %v5712_v50  ;;  %v5705_v42 = vpop.permute.xlu1 %5704 }
 0x392   : > { %v3929_v14 = vpack.c.bf16 %v3908_v4, %v3907_v33  ;;  %v5720_v18 = vpop.permute.xlu0 %5719  ;;  %v5707_v5 = vunpack.i.h.bf16 %v5705_v42  ;;  %v5706_v10 = vunpack.i.l.bf16 %v5705_v42 }
 0x393   : > { %v5722_v52 = vunpack.i.h.bf16 %v5720_v18  ;;  %v5721_v19 = vunpack.i.l.bf16 %v5720_v18 }
 0x394   : > { %4495 = vmatprep.mubr.msk.bf16.mxu1 %vm1970_vm11, %v3929_v14  ;;  %v3877_v8 = vsel %vm1852_vm9, %v3845_v39, %v5706_v10  ;;  %v3878_v28 = vsel %vm1852_vm9, %v3846_v34, %v5707_v5 }
 0x395   : > { %v5715_v25 = vpop.permute.xlu1 %5714  ;;  %v3752_v6 = vsel %vm1720_vm5, %v8393_v46, %v5722_v52  ;;  %v3751_v15 = vsel %vm1720_vm5, %v8390_v31, %v5721_v19 }
 0x396   : > { %v5730_v32 = vpop.permute.xlu0 %5729  ;;  %v5717_v2 = vunpack.i.h.bf16 %v5715_v25  ;;  %v5716_v30 = vunpack.i.l.bf16 %v5715_v25 }
 0x397   : > { %v5732_v12 = vunpack.i.h.bf16 %v5730_v32  ;;  %v5731_v62 = vunpack.i.l.bf16 %v5730_v32 }
 0x398   : > { %v3909_v60 = vsel %vm1885_vm10, %v3877_v8, %v5716_v30  ;;  %v3910_v57 = vsel %vm1885_vm10, %v3878_v28, %v5717_v2 }
 0x399   : > { %v3930_v54 = vpack.c.bf16 %v3910_v57, %v3909_v60  ;;  %v5725_v20 = vpop.permute.xlu1 %5724  ;;  %v3783_v58 = vsel %vm1753_vm6, %v3751_v15, %v5731_v62  ;;  %v3784_v45 = vsel %vm1753_vm6, %v3752_v6, %v5732_v12 }
 0x39a   : > { %v5740_v1 = vpop.permute.xlu0 %5739  ;;  %v5727_v43 = vunpack.i.h.bf16 %v5725_v20  ;;  %v5726_v59 = vunpack.i.l.bf16 %v5725_v20 }
 0x39b   : > { %4496 = vmatmul.mubr.msk.bf16.gmra.mrb[20].mxu1 %vm1970_vm11, %v3930_v54  ;;  %v5742_v41 = vunpack.i.h.bf16 %v5740_v1  ;;  %v5741_v16 = vunpack.i.l.bf16 %v5740_v1 }
 0x39c   : > { %v3754_v61 = vsel %vm1720_vm5, %v8461_v63, %v5727_v43  ;;  %v3753_v23 = vsel %vm1720_vm5, %v8458_v44, %v5726_v59 }
 0x39d   : > { %v5735_v24 = vpop.permute.xlu1 %5734  ;;  %v3815_v33 = vsel %vm1786_vm7, %v3783_v58, %v5741_v16  ;;  %v3816_v4 = vsel %vm1786_vm7, %v3784_v45, %v5742_v41 }
 0x39e   : > { %v5750_v29 = vpop.permute.xlu0 %5749  ;;  %v5737_v42 = vunpack.i.h.bf16 %v5735_v24  ;;  %v5736_v21 = vunpack.i.l.bf16 %v5735_v24 }
 0x39f   : > { %v5752_v50 = vunpack.i.h.bf16 %v5750_v29  ;;  %v5751_v37 = vunpack.i.l.bf16 %v5750_v29 }
 0x3a0   : > { %v3785_v3 = vsel %vm1753_vm6, %v3753_v23, %v5736_v21  ;;  %v3786_v25 = vsel %vm1753_vm6, %v3754_v61, %v5737_v42 }
 0x3a1   : > { %v5745_v36 = vpop.permute.xlu1 %5744  ;;  %v3847_v7 = vsel %vm1819_vm8, %v3815_v33, %v5751_v37  ;;  %v3848_v56 = vsel %vm1819_vm8, %v3816_v4, %v5752_v50 }
 0x3a2   : > { %v5760_v27 = vpop.permute.xlu0 %5759  ;;  %v5747_v55 = vunpack.i.h.bf16 %v5745_v36  ;;  %v5746_v35 = vunpack.i.l.bf16 %v5745_v36 }
 0x3a3   : > { %v5762_v17 = vunpack.i.h.bf16 %v5760_v27  ;;  %v5761_v22 = vunpack.i.l.bf16 %v5760_v27 }
 0x3a4   : > { %v3817_v34 = vsel %vm1786_vm7, %v3785_v3, %v5746_v35  ;;  %v3818_v2 = vsel %vm1786_vm7, %v3786_v25, %v5747_v55 }
 0x3a5   : > { %v5755_v14 = vpop.permute.xlu1 %5754  ;;  %v3879_v31 = vsel %vm1852_vm9, %v3847_v7, %v5761_v22  ;;  %v3880_v18 = vsel %vm1852_vm9, %v3848_v56, %v5762_v17 }
 0x3a6   : > { %v5770_v38 = vpop.permute.xlu0 %5769  ;;  %v5757_v5 = vunpack.i.h.bf16 %v5755_v14  ;;  %v5756_v10 = vunpack.i.l.bf16 %v5755_v14 }
 0x3a7   : > { %v5772_v13 = vunpack.i.h.bf16 %v5770_v38  ;;  %v5771_v46 = vunpack.i.l.bf16 %v5770_v38 }
 0x3a8   : > { %v3849_v8 = vsel %vm1819_vm8, %v3817_v34, %v5756_v10  ;;  %v3850_v28 = vsel %vm1819_vm8, %v3818_v2, %v5757_v5 }
 0x3a9   : > { %v3911_v49 = vsel %vm1885_vm10, %v3879_v31, %v5771_v46  ;;  %v3912_v53 = vsel %vm1885_vm10, %v3880_v18, %v5772_v13  ;;  %v5765_v47 = vpop.permute.xlu1 %5764 }
 0x3aa   : > { %v3931_v51 = vpack.c.bf16 %v3912_v53, %v3911_v49  ;;  %v5780_v48 = vpop.permute.xlu0 %5779  ;;  %v5767_v32 = vunpack.i.h.bf16 %v5765_v47  ;;  %v5766_v26 = vunpack.i.l.bf16 %v5765_v47 }
 0x3ab   : > { %v5782_v12 = vunpack.i.h.bf16 %v5780_v48  ;;  %v5781_v62 = vunpack.i.l.bf16 %v5780_v48 }
 0x3ac   : > { %4499 = vmatprep.mubr.msk.bf16.mxu1 %vm1970_vm11, %v3931_v51  ;;  %v3881_v44 = vsel %vm1852_vm9, %v3849_v8, %v5766_v26  ;;  %v3882_v57 = vsel %vm1852_vm9, %v3850_v28, %v5767_v32 }
 0x3ad   : > { %v5775_v30 = vpop.permute.xlu1 %5774  ;;  %v3756_v17 = vsel %vm1720_vm5, %v8437_v0, %v5782_v12  ;;  %v3755_v22 = vsel %vm1720_vm5, %v8434_v40, %v5781_v62  ;;  %v9094_v12 = vld [vmem:[#allocation9_spill] sm:$0xff] }
 0x3ae   : > { %v5790_v39 = vpop.permute.xlu0 %5789  ;;  %v5777_v63 = vunpack.i.h.bf16 %v5775_v30  ;;  %v5776_v60 = vunpack.i.l.bf16 %v5775_v30  ;;  %v2281_v62 = vsel %vm224_vm0, %v9094_v12, 0.0 }
 0x3af   : > { %v5792_v41 = vunpack.i.h.bf16 %v5790_v39  ;;  %v5791_v16 = vunpack.i.l.bf16 %v5790_v39 }
 0x3b0   : > { %v3913_v1 = vsel %vm1885_vm10, %v3881_v44, %v5776_v60  ;;  %v3914_v54 = vsel %vm1885_vm10, %v3882_v57, %v5777_v63  ;;  %v9091_v57 = vld [vmem:[#allocation6_spill] sm:$0xff] }
 0x3b1   : > { %v3932_v29 = vpack.c.bf16 %v3914_v54, %v3913_v1  ;;  %v5785_v24 = vpop.permute.xlu1 %5784  ;;  %v3787_v33 = vsel %vm1753_vm6, %v3755_v22, %v5791_v16  ;;  %v3788_v4 = vsel %vm1753_vm6, %v3756_v17, %v5792_v41  ;;  %v2282_v1 = vsel %vm224_vm0, %v9091_v57, 0.0  ;;  %v8620_v54 = vld [vmem:[%s8809_s4] ss:$0 sm:$0xff] }
 0x3b2   : > { %v5800_v20 = vpop.permute.xlu0 %5799  ;;  %v5787_v43 = vunpack.i.h.bf16 %v5785_v24  ;;  %v5786_v59 = vunpack.i.l.bf16 %v5785_v24  ;;  %v9093_v24 = vld [vmem:[#allocation7_spill] sm:$0xff] }
 0x3b3   : > { %4500 = vmatmul.mubr.msk.bf16.gmra.mrb[24].mxu1 %vm1970_vm11, %v3932_v29  ;;  %v5802_v27 = vunpack.i.h.bf16 %v5800_v20  ;;  %v5801_v50 = vunpack.i.l.bf16 %v5800_v20  ;;  %v9092_v20 = vld [vmem:[#allocation8_spill] sm:$0xff] }
 0x3b4   : > { %v3757_v10 = vsel %vm1720_vm5, %v8473_v9, %v5786_v59  ;;  %v3758_v61 = vsel %vm1720_vm5, %v8476_v11, %v5787_v43  ;;  %v2280_v29 = vsel %vm224_vm0, %v9092_v20, 0.0 }
 0x3b5   : > { %v5795_v19 = vpop.permute.xlu1 %5794  ;;  %v3819_v38 = vsel %vm1786_vm7, %v3787_v33, %v5801_v50  ;;  %v3820_v7 = vsel %vm1786_vm7, %v3788_v4, %v5802_v27  ;;  %v2319_v41 = vadd.f32 %v8620_v54, %v2280_v29  ;;  %v2320_v50 = vadd.f32 %v8620_v54, %v2281_v62  ;;  %v9096_v4 = vld [vmem:[#allocation10_spill] sm:$0xff] }
 0x3b6   : > { %v5810_v52 = vpop.permute.xlu0 %5809  ;;  %v5797_v42 = vunpack.i.h.bf16 %v5795_v19  ;;  %v5796_v21 = vunpack.i.l.bf16 %v5795_v19  ;;  %v2321_v19 = vadd.f32 %v8620_v54, %v2282_v1  ;;  %v9105_v1 = vld [vmem:[#allocation21_spill] sm:$0xff] }
 0x3b7   : > { %v5812_v36 = vunpack.i.h.bf16 %v5810_v52  ;;  %v5811_v6 = vunpack.i.l.bf16 %v5810_v52  ;;  %v2283_v52 = vsel %vm224_vm0, %v9093_v24, 0.0  ;;  %v2295_v20 = vsel %vm224_vm0, %v9105_v1, 0.0  ;;  %v9106_v24 = vld [vmem:[#allocation19_spill] sm:$0xff] }
 0x3b8   : > { %v3789_v26 = vsel %vm1753_vm6, %v3757_v10, %v5796_v21  ;;  %v3790_v3 = vsel %vm1753_vm6, %v3758_v61, %v5797_v42  ;;  %v2322_v16 = vadd.f32 %v8620_v54, %v2283_v52  ;;  %v2293_v52 = vsel %vm224_vm0, %v9106_v24, 0.0  ;;  %v9118_v1 = vld [vmem:[#allocation31_spill] sm:$0xff] }
 0x3b9   : > { %v5805_v15 = vpop.permute.xlu1 %5804  ;;  %v3851_v13 = vsel %vm1819_vm8, %v3819_v38, %v5811_v6  ;;  %v3852_v46 = vsel %vm1819_vm8, %v3820_v7, %v5812_v36  ;;  %v2284_v38 = vsel %vm224_vm0, %v9096_v4, 0.0  ;;  %v9097_v7 = vld [vmem:[#allocation13_spill] sm:$0xff]  ;;  %v2334_v12 = vadd.f32 %v8620_v54, %v2295_v20 }
 0x3ba   : > { %v5820_v37 = vpop.permute.xlu0 %5819  ;;  %v5807_v48 = vunpack.i.h.bf16 %v5805_v15  ;;  %v5806_v55 = vunpack.i.l.bf16 %v5805_v15  ;;  %v2305_v20 = vsel %vm224_vm0, %v9118_v1, 0.0 }
 0x3bb   : > { %v5822_v58 = vunpack.i.h.bf16 %v5820_v37  ;;  %v5821_v45 = vunpack.i.l.bf16 %v5820_v37 }
 0x3bc   : > { %v3821_v25 = vsel %vm1786_vm7, %v3789_v26, %v5806_v55  ;;  %v3822_v39 = vsel %vm1786_vm7, %v3790_v3, %v5807_v48  ;;  %v9099_v48 = vld [vmem:[#allocation16_spill] sm:$0xff] }
 0x3bd   : > { %v5815_v31 = vpop.permute.xlu1 %5814  ;;  %v3883_v40 = vsel %vm1852_vm9, %v3851_v13, %v5821_v45  ;;  %v3884_v18 = vsel %vm1852_vm9, %v3852_v46, %v5822_v58  ;;  %v9095_v45 = vld [vmem:[#allocation12_spill] sm:$0xff]  ;;  %v9098_v46 = vld [vmem:[#allocation11_spill] sm:$0xff]  ;;  %v2290_v55 = vsel %vm224_vm0, %v9099_v48, 0.0 }
 0x3be   : > { %v5830_v56 = vpop.permute.xlu0 %5829  ;;  %v5817_v47 = vunpack.i.h.bf16 %v5815_v31  ;;  %v5816_v5 = vunpack.i.l.bf16 %v5815_v31  ;;  %v2286_v33 = vsel %vm224_vm0, %v9095_v45, 0.0  ;;  %v2329_v61 = vadd.f32 %v8620_v54, %v2290_v55  ;;  %v9113_v55 = vld [vmem:[#allocation29_spill] sm:$0xff] }
 0x3bf   : > { %v5832_v14 = vunpack.i.h.bf16 %v5830_v56  ;;  %v5831_v0 = vunpack.i.l.bf16 %v5830_v56  ;;  %v2287_v56 = vsel %vm224_vm0, %v9097_v7, 0.0  ;;  %v2325_v13 = vadd.f32 %v8620_v54, %v2286_v33  ;;  %v9109_v33 = vld [vmem:[#allocation25_spill] sm:$0xff]  ;;  %v9110_v7 = vld [vmem:[#allocation23_spill] sm:$0xff] }
 0x3c0   : > { %v3853_v2 = vsel %vm1819_vm8, %v3821_v25, %v5816_v5  ;;  %v3854_v9 = vsel %vm1819_vm8, %v3822_v39, %v5817_v47  ;;  %v2326_v31 = vadd.f32 %v8620_v54, %v2287_v56  ;;  %v9101_v5 = vld [vmem:[#allocation17_spill] sm:$0xff]  ;;  %v2299_v4 = vsel %vm224_vm0, %v9109_v33, 0.0  ;;  %v9122_v33 = vld [vmem:[#allocation35_spill] sm:$0xff] }
 0x3c1   : > { %v3915_v49 = vsel %vm1885_vm10, %v3883_v40, %v5831_v0  ;;  %v3916_v53 = vsel %vm1885_vm10, %v3884_v18, %v5832_v14  ;;  %v5825_v35 = vpop.permute.xlu1 %5824  ;;  %v2285_v14 = vsel %vm224_vm0, %v9098_v46, 0.0  ;;  %v2323_v0 = vadd.f32 %v8620_v54, %v2284_v38 }
 0x3c2   : > { %v3933_v51 = vpack.c.bf16 %v3916_v53, %v3915_v49  ;;  %v5827_v23 = vunpack.i.h.bf16 %v5825_v35  ;;  %v5826_v32 = vunpack.i.l.bf16 %v5825_v35  ;;  %v2324_v18 = vadd.f32 %v8620_v54, %v2285_v14  ;;  %v9100_v35 = vld [vmem:[#allocation14_spill] sm:$0xff] }
 0x3c3   : > { %v2288_v47 = vsel %vm224_vm0, %v9100_v35, 0.0  ;;  %v2291_v10 = vsel %vm224_vm0, %v9101_v5, 0.0  ;;  %v2297_v56 = vsel %vm224_vm0, %v9110_v7, 0.0  ;;  %v2338_v46 = vadd.f32 %v8620_v54, %v2299_v4  ;;  %v9114_v5 = vld [vmem:[#allocation27_spill] sm:$0xff] }
 0x3c4   : > { %4503 = vmatprep.mubr.msk.bf16.mxu1 %vm1970_vm11, %v3933_v51  ;;  %v3885_v11 = vsel %vm1852_vm9, %v3853_v2, %v5826_v32  ;;  %v3886_v28 = vsel %vm1852_vm9, %v3854_v9, %v5827_v23  ;;  %v9102_v23 = vld [vmem:[#allocation15_spill] sm:$0xff]  ;;  %v2327_v26 = vadd.f32 %v8620_v54, %v2288_v47  ;;  %v2330_v3 = vadd.f32 %v8620_v54, %v2291_v10 }
 0x3c5   : > { %v5835_v34 = vpop.permute.xlu1 %5834  ;;  %v2289_v32 = vsel %vm224_vm0, %v9102_v23, 0.0  ;;  %v2303_v35 = vsel %vm224_vm0, %v9113_v55, 0.0  ;;  %v2301_v10 = vsel %vm224_vm0, %v9114_v5, 0.0  ;;  %v2309_v4 = vsel %vm224_vm0, %v9122_v33, 0.0 }
 0x3c6   : > { %v5837_v30 = vunpack.i.h.bf16 %v5835_v34  ;;  %v5836_v8 = vunpack.i.l.bf16 %v5835_v34  ;;  %v2328_v39 = vadd.f32 %v8620_v54, %v2289_v32  ;;  %v2342_v23 = vadd.f32 %v8620_v54, %v2303_v35 }
 0x3c8   : > { %v3917_v63 = vsel %vm1885_vm10, %v3885_v11, %v5836_v8  ;;  %v3918_v60 = vsel %vm1885_vm10, %v3886_v28, %v5837_v30 }
 0x3c9   : > { %v3934_v44 = vpack.c.bf16 %v3918_v60, %v3917_v63  ;;  %v9103_v63 = vld [vmem:[#allocation20_spill] sm:$0xff] }
 0x3ca   : > { %v2294_v60 = vsel %vm224_vm0, %v9103_v63, 0.0 }
 0x3cb   : > { %4504 = vmatmul.mubr.msk.bf16.gmra.mrb[28].mxu1 %vm1970_vm11, %v3934_v44  ;;  %v9104_v44 = vld [vmem:[#allocation18_spill] sm:$0xff]  ;;  %v2333_v29 = vadd.f32 %v8620_v54, %v2294_v60  ;;  %v9117_v60 = vld [vmem:[#allocation33_spill] sm:$0xff] }
 0x3cc   : > { %v2292_v57 = vsel %vm224_vm0, %v9104_v44, 0.0  ;;  %v2307_v44 = vsel %vm224_vm0, %v9117_v60, 0.0 }
 0x3cd   : > { %v2346_v24 = vadd.f32 %v8620_v54, %v2307_v44 }
 0x3d3   : > { %v4477_v27 = vpop.f32.mrb[0].mxu1 }
 0x3d4   : > { %v4185_v37 = vadd.f32 %v4477_v27, %v2321_v19  ;;  %v4056_v36 = vpop.f32.mrb[1].mxu1  ;;  %v2331_v19 = vadd.f32 %v8620_v54, %v2292_v57 }
 0x3d5   : > { %v4183_v6 = vadd.f32 %v4056_v36, %v2319_v41  ;;  %v4478_v15 = vpop.f32.mrb[2].mxu1  ;;  %v2332_v41 = vadd.f32 %v8620_v54, %v2293_v52 }
 0x3d6   : > { %4217 = vst [vmem:[%s8634_s15 + $0x10] sm:$0xff] %v4185_v37  ;;  %v4186_v17 = vadd.f32 %v4478_v15, %v2322_v16  ;;  %v4059_v22 = vpop.f32.mrb[3].mxu1 }
 0x3d7   : > { %4215 = vst [vmem:[%s8634_s15] sm:$0xff] %v4183_v6  ;;  %v4184_v58 = vadd.f32 %v4059_v22, %v2320_v50 }
 0x3d8   : > { %4218 = vst [vmem:[%s8634_s15 + $0x18] sm:$0xff] %v4186_v17  ;;  %v9107_v17 = vld [vmem:[#allocation24_spill] sm:$0xff] }
 0x3d9   : > { %4216 = vst [vmem:[%s8634_s15 + $0x8] sm:$0xff] %v4184_v58  ;;  %v2298_v22 = vsel %vm224_vm0, %v9107_v17, 0.0  ;;  %v9108_v58 = vld [vmem:[#allocation22_spill] sm:$0xff] }
 0x3da   : > { %v2296_v45 = vsel %vm224_vm0, %v9108_v58, 0.0  ;;  %v2337_v38 = vadd.f32 %v8620_v54, %v2298_v22  ;;  %v9121_v22 = vld [vmem:[#allocation37_spill] sm:$0xff] }
 0x3db   : > { %v2311_v58 = vsel %vm224_vm0, %v9121_v22, 0.0 }
 0x3dc   : > { %v2350_v7 = vadd.f32 %v8620_v54, %v2311_v58 }
 0x3f3   : > { %v4481_v40 = vpop.f32.mrb[4].mxu1 }
 0x3f4   : > { %v4189_v43 = vadd.f32 %v4481_v40, %v2325_v13  ;;  %v4072_v59 = vpop.f32.mrb[5].mxu1  ;;  %v2335_v13 = vadd.f32 %v8620_v54, %v2296_v45 }
 0x3f5   : > { %v4187_v49 = vadd.f32 %v4072_v59, %v2323_v0  ;;  %v4482_v53 = vpop.f32.mrb[6].mxu1  ;;  %v2336_v0 = vadd.f32 %v8620_v54, %v2297_v56 }
 0x3f6   : > { %4221 = vst [vmem:[%s8634_s15 + $0x30] sm:$0xff] %v4189_v43  ;;  %v4190_v42 = vadd.f32 %v4482_v53, %v2326_v31  ;;  %v4075_v21 = vpop.f32.mrb[7].mxu1 }
 0x3f7   : > { %4219 = vst [vmem:[%s8634_s15 + $0x20] sm:$0xff] %v4187_v49  ;;  %v4188_v51 = vadd.f32 %v4075_v21, %v2324_v18 }
 0x3f8   : > { %4222 = vst [vmem:[%s8634_s15 + $0x38] sm:$0xff] %v4190_v42  ;;  %v9111_v42 = vld [vmem:[#allocation28_spill] sm:$0xff] }
 0x3f9   : > { %4220 = vst [vmem:[%s8634_s15 + $0x28] sm:$0xff] %v4188_v51  ;;  %v2302_v21 = vsel %vm224_vm0, %v9111_v42, 0.0  ;;  %v9112_v51 = vld [vmem:[#allocation26_spill] sm:$0xff] }
 0x3fa   : > { %v2300_v48 = vsel %vm224_vm0, %v9112_v51, 0.0  ;;  %v2341_v47 = vadd.f32 %v8620_v54, %v2302_v21 }
 0x413   : > { %v4485_v25 = vpop.f32.mrb[8].mxu1 }
 0x414   : > { %v4193_v34 = vadd.f32 %v4485_v25, %v2329_v61  ;;  %v4088_v2 = vpop.f32.mrb[9].mxu1  ;;  %v2339_v61 = vadd.f32 %v8620_v54, %v2300_v48 }
 0x415   : > { %v4191_v9 = vadd.f32 %v4088_v2, %v2327_v26  ;;  %v4486_v30 = vpop.f32.mrb[10].mxu1  ;;  %v2340_v26 = vadd.f32 %v8620_v54, %v2301_v10 }
 0x416   : > { %4225 = vst [vmem:[%s8634_s15 + $0x50] sm:$0xff] %v4193_v34  ;;  %v4194_v8 = vadd.f32 %v4486_v30, %v2330_v3  ;;  %v4091_v11 = vpop.f32.mrb[11].mxu1 }
 0x417   : > { %4223 = vst [vmem:[%s8634_s15 + $0x40] sm:$0xff] %v4191_v9  ;;  %v4192_v28 = vadd.f32 %v4091_v11, %v2328_v39 }
 0x418   : > { %4226 = vst [vmem:[%s8634_s15 + $0x58] sm:$0xff] %v4194_v8  ;;  %v9115_v8 = vld [vmem:[#allocation32_spill] sm:$0xff] }
 0x419   : > { %4224 = vst [vmem:[%s8634_s15 + $0x48] sm:$0xff] %v4192_v28  ;;  %v2306_v11 = vsel %vm224_vm0, %v9115_v8, 0.0  ;;  %v9116_v28 = vld [vmem:[#allocation30_spill] sm:$0xff] }
 0x41a   : > { %v2304_v63 = vsel %vm224_vm0, %v9116_v28, 0.0  ;;  %v2345_v57 = vadd.f32 %v8620_v54, %v2306_v11 }
 0x43f   : > { %v4489_v62 = vpop.f32.mrb[12].mxu1 }
 0x440   : > { %v4197_v16 = vadd.f32 %v4489_v62, %v2333_v29  ;;  %v4104_v27 = vpop.f32.mrb[13].mxu1  ;;  %v2343_v29 = vadd.f32 %v8620_v54, %v2304_v63 }
 0x441   : > { %v4195_v50 = vadd.f32 %v4104_v27, %v2331_v19  ;;  %v4490_v37 = vpop.f32.mrb[14].mxu1  ;;  %v2344_v19 = vadd.f32 %v8620_v54, %v2305_v20 }
 0x442   : > { %4229 = vst [vmem:[%s8634_s15 + $0x70] sm:$0xff] %v4197_v16  ;;  %v4198_v36 = vadd.f32 %v4490_v37, %v2334_v12  ;;  %v4107_v6 = vpop.f32.mrb[15].mxu1 }
 0x443   : > { %4227 = vst [vmem:[%s8634_s15 + $0x60] sm:$0xff] %v4195_v50  ;;  %v4196_v15 = vadd.f32 %v4107_v6, %v2332_v41 }
 0x444   : > { %4230 = vst [vmem:[%s8634_s15 + $0x78] sm:$0xff] %v4198_v36  ;;  %v9119_v36 = vld [vmem:[#allocation36_spill] sm:$0xff] }
 0x445   : > { %4228 = vst [vmem:[%s8634_s15 + $0x68] sm:$0xff] %v4196_v15  ;;  %v2310_v6 = vsel %vm224_vm0, %v9119_v36, 0.0  ;;  %v9120_v15 = vld [vmem:[#allocation34_spill] sm:$0xff] }
 0x446   : > { %v2308_v17 = vsel %vm224_vm0, %v9120_v15, 0.0  ;;  %v2349_v45 = vadd.f32 %v8620_v54, %v2310_v6 }
 0x457   : > { %v4493_v14 = vpop.f32.mrb[16].mxu1 }
 0x458   : > { %v4201_v31 = vadd.f32 %v4493_v14, %v2337_v38  ;;  %v4120_v40 = vpop.f32.mrb[17].mxu1  ;;  %v2347_v38 = vadd.f32 %v8620_v54, %v2308_v17 }
 0x459   : > { %v4199_v18 = vadd.f32 %v4120_v40, %v2335_v13  ;;  %v4494_v43 = vpop.f32.mrb[18].mxu1  ;;  %v2348_v13 = vadd.f32 %v8620_v54, %v2309_v4 }
 0x45a   : > { %4233 = vst [vmem:[%s8634_s15 + $0x90] sm:$0xff] %v4201_v31  ;;  %v4202_v59 = vadd.f32 %v4494_v43, %v2338_v46  ;;  %v4123_v49 = vpop.f32.mrb[19].mxu1 }
 0x45b   : > { %4231 = vst [vmem:[%s8634_s15 + $0x80] sm:$0xff] %v4199_v18  ;;  %v4200_v53 = vadd.f32 %v4123_v49, %v2336_v0 }
 0x45c   : > { %4234 = vst [vmem:[%s8634_s15 + $0x98] sm:$0xff] %v4202_v59 }
 0x45d   : > { %4232 = vst [vmem:[%s8634_s15 + $0x88] sm:$0xff] %v4200_v53 }
 0x46e   : > { %v4497_v32 = vpop.f32.mrb[20].mxu1 }
 0x46f   : > { %v4205_v3 = vadd.f32 %v4497_v32, %v2341_v47  ;;  %v4136_v25 = vpop.f32.mrb[21].mxu1 }
 0x470   : > { %v4203_v39 = vadd.f32 %v4136_v25, %v2339_v61  ;;  %v4498_v34 = vpop.f32.mrb[22].mxu1 }
 0x471   : > { %4237 = vst [vmem:[%s8634_s15 + $0xb0] sm:$0xff] %v4205_v3  ;;  %v4206_v2 = vadd.f32 %v4498_v34, %v2342_v23  ;;  %v4139_v9 = vpop.f32.mrb[23].mxu1 }
 0x472   : > { %4235 = vst [vmem:[%s8634_s15 + $0xa0] sm:$0xff] %v4203_v39  ;;  %v4204_v30 = vadd.f32 %v4139_v9, %v2340_v26 }
 0x473   : > { %4238 = vst [vmem:[%s8634_s15 + $0xb8] sm:$0xff] %v4206_v2 }
 0x474   : > { %4236 = vst [vmem:[%s8634_s15 + $0xa8] sm:$0xff] %v4204_v30 }
 0x486   : > { %v4501_v52 = vpop.f32.mrb[24].mxu1 }
 0x487   : > { %v4209_v12 = vadd.f32 %v4501_v52, %v2345_v57  ;;  %v4152_v62 = vpop.f32.mrb[25].mxu1 }
 0x488   : > { %v4207_v41 = vadd.f32 %v4152_v62, %v2343_v29  ;;  %v4502_v16 = vpop.f32.mrb[26].mxu1 }
 0x489   : > { %4241 = vst [vmem:[%s8634_s15 + $0xd0] sm:$0xff] %v4209_v12  ;;  %v4210_v27 = vadd.f32 %v4502_v16, %v2346_v24  ;;  %v4155_v50 = vpop.f32.mrb[27].mxu1 }
 0x48a   : > { %4239 = vst [vmem:[%s8634_s15 + $0xc0] sm:$0xff] %v4207_v41  ;;  %v4208_v37 = vadd.f32 %v4155_v50, %v2344_v19 }
 0x48b   : > { %4242 = vst [vmem:[%s8634_s15 + $0xd8] sm:$0xff] %v4210_v27 }
 0x48c   : > { %4240 = vst [vmem:[%s8634_s15 + $0xc8] sm:$0xff] %v4208_v37 }
 0x49e   : > { %v4505_v56 = vpop.f32.mrb[28].mxu1 }
 0x49f   : > { %v4213_v46 = vadd.f32 %v4505_v56, %v2349_v45  ;;  %v4168_v14 = vpop.f32.mrb[29].mxu1 }
 0x4a0   : > { %v4211_v0 = vadd.f32 %v4168_v14, %v2347_v38  ;;  %v4506_v31 = vpop.f32.mrb[30].mxu1 }
 0x4a1   : > { %4245 = vst [vmem:[%s8634_s15 + $0xf0] sm:$0xff] %v4213_v46  ;;  %v4214_v40 = vadd.f32 %v4506_v31, %v2350_v7  ;;  %v4171_v18 = vpop.f32.mrb[31].mxu1 }
 0x4a2   : > { %4243 = vst [vmem:[%s8634_s15 + $0xe0] sm:$0xff] %v4211_v0  ;;  %v4212_v43 = vadd.f32 %v4171_v18, %v2348_v13 }
 0x4a3   : > { %4246 = vst [vmem:[%s8634_s15 + $0xf8] sm:$0xff] %v4214_v40 }
 0x4a4   : > { %4244 = vst [vmem:[%s8634_s15 + $0xe8] sm:$0xff] %v4212_v43 }
 0x4a5   : > { %5861 = shalt.err (!%p5858_p3)
}
 0x4a6   : > { %s5862_s30 = scalar_lea.hbm %s8754_s8, 4096  ;;  %s5866_s13 = scalar_lea.hbm %s8810_s5, 8192 }
 0x4a7   : > { %p5863_p4 = scmp.ne.s32.totalorder %s8754_s8, %s5862_s30  ;;  %p5867_p9 = scmp.lt.u32.totalorder %s8754_s8, %s8810_s5 }
 0x4a8   : > { %p5868_p10 = scmp.lt.u32.totalorder %s5866_s13, %s5862_s30  ;;  %p5870_p12 = scmp.lt.u32.totalorder %s5862_s30, %s8754_s8 }
 0x4a9   : > { %p5864_p7 = pnand %p5863_p4, %p5991_p5 }
 0x4aa   : > { %p5869_p11 = por %p5868_p10, %p5867_p9 }
 0x4ab   : > { %p5865_p8 = pneg %p5864_p7 }
 0x4ac   : > { %p5871_p13 = por %p5870_p12, %p5869_p11 }
 0x4ae   : > { %p5872_p0 = pnand %p5871_p13, %p5865_p8 }
 0x4b0   : > { %5875 = shalt.err (!%p5872_p0)
}
 0x4b1   : > { %s5922_s16 = smov 128  }
 0x4b2   : > { %4509 = dma.vmem_to_hbm [thread:$0]  (%p5991_p5), %s8757_s17, 4096, %s8754_s8, %s8763_s22, %s5922_s16, %s5922_s16, %s5913_s10  }
 0x4b3 PF: > { %p4515_p1 = scmp.ge.s32.totalorder %s5910_s21, 2  ;;  %s4276_s6 = sand.u32 1, %s5898_s18  }
 0x4b4   : > { %s4277_s7 = scalar_lea.sflag [#allocation4], %s4276_s6 }
 0x4b5   : > { %p4512_p2 = pnand %p4515_p1, %p5995_p6 }
 0x4b7   : > { %5893 = dma.done.wait (!%p4512_p2), %s4277_s7, 4096  }
 0x4b8   : > { %5895 = vsyncadd (!%p4512_p2), %s4277_s7, 4294963200  ;;  %p15_p3 = scmp.ge.s32.totalorder %s5978_s24, 4   ;;  %s9123_s18 = smov %s5902_s19 }
 0x4b9   : > { %s9124_s19 = smov %s5906_s20  ;;  %s9125_s20 = smov %s5989_s27 }
 0x4ba   : > { %s9126_s21 = smov %s5978_s24  ;;  %17 = sbr.rel (!%p15_p3) target bundleno = 3 (0x3), region = 78 }
 0x4c1   :  { %4282 = vsyncpa [#allocation4], 1 }
 0x4c2   :  { %4284 = vsyncpa [#allocation4 + $0x1], 1 }

</bundles_post_ra>
